<compile_context>
chip_gen: v6e
topology: v6e:2x2x1
jax: 0.10.0
libtpu: 0.0.40
codegen_flags: <defaults>
</compile_context>

<pallas_src>
import functools

import numpy as np

import jax
import jax.numpy as jnp
from jax import lax
from jax.experimental import pallas as pl
from jax.experimental.pallas import tpu as pltpu


def _const_spec(shape):
    """Whole array resident in VMEM, same block for every grid step."""
    nd = len(shape)
    return pl.BlockSpec(shape, lambda n, _nd=nd: (0,) * _nd)


def _pick_samples_per_step(n, max_b=8):
    # Review item 1: put as many samples as possible on the matmul M axis.
    # Cap at 8 (>=256 rows once S>=32, filling the v6e/v7x MXU; v5e's 128x128
    # MXU saturates earlier but the extra rows are harmless).  For N>8 this
    # automatically keeps >=2 grid steps so v7x's two TensorCores both get
    # work via dimension_semantics=("parallel",).
    b = 1
    for cand in range(1, min(n, max_b) + 1):
        if n % cand == 0:
            b = cand
    return b


# ------------------------------ fused kernel -------------------------------- #

def _encoder_kernel(p1_ref, w1_ref, b1_ref, wres_ref, gres_ref, bres_ref,
                    w2_ref, b2_ref, mask_ref, o_ref,
                    *, B, S, Wg, C, n_blocks, inv_count, eps, pool_rows):
    # p1_ref  : (4, B*S, 9*Cin) bf16  conv1 im2col rows, one set per 2x2 pool
    #                                 window, on the zero-padded per-sample grid
    # w1_ref  : (9*Cin, C) bf16 ; b1_ref : (1, C) f32
    # wres_ref: (2*n_blocks, 9*C, C) bf16   res conv weights, (kh,kw,cin)-major
    # gres_ref, bres_ref: (2*n_blocks, 1, C) f32   InstanceNorm affine params
    # w2_ref  : (9*C, 128) bf16 (Cout 8 padded to 128) ; b2_ref : (1, 128) f32
    # mask_ref: (B*S, C) f32   1.0 on interior rows of the padded grid, else 0
    # o_ref   : (B, M4, 128) f32   lane-dense output slab for these samples
    M = B * S

    # Hoisted once (review item 6): interior mask, flat and per-sample views.
    mask_bc = mask_ref[...]                        # (M, C) f32
    mask3 = mask_bc.reshape(B, S, C)

    # ---- stage 1: conv1(+bias) -> ReLU -> MaxPool(2,2).
    # Single MXU contraction over all 4 pool windows (M = 4*B*S), then a cheap
    # VPU max-reduce over the window axis (review item 2).
    k1 = p1_ref.shape[-1]
    y1 = jnp.dot(p1_ref[...].reshape(4 * M, k1), w1_ref[...],
                 preferred_element_type=jnp.float32) + b1_ref[...]
    y1 = jnp.maximum(y1, 0.0)
    x = jnp.max(y1.reshape(4, M, C), axis=0) * mask_bc     # (M, C) f32

    def conv3x3(x_act, get_w):
        # Stride-1 3x3 conv on the flattened padded grid (review items 3+4):
        # column taps (dj=-1,0,+1) folded into K via two +-1 row rolls and a
        # lane concat of the small (M, C) activation, cast to bf16 ONCE;
        # row taps (di) become 3 accumulated MXU contractions whose LHS is a
        # roll by +-Wg (Wg is a multiple of 8, so the bf16 rolls stay sublane
        # aligned).  jnp.roll lowers to two aligned slices + a concat; the
        # circularly wrapped rows only land on masked (non-interior) rows.
        q = jnp.concatenate(
            [jnp.roll(x_act, 1, axis=0),        # x[r-1]  (dj = -1)
             x_act,                             # x[r]    (dj =  0)
             jnp.roll(x_act, -1, axis=0)],      # x[r+1]  (dj = +1)
            axis=1).astype(jnp.bfloat16)        # (M, 3*C) bf16, one small cast
        acc = None
        for t, di in enumerate((-1, 0, 1)):
            lhs = q if di == 0 else jnp.roll(q, -di * Wg, axis=0)
            part = jnp.dot(lhs, get_w(t), preferred_element_type=jnp.float32)
            acc = part if acc is None else acc + part
        return acc                              # (M, Cout) f32

    def instance_norm(y, gamma, beta, relu):
        # Per-(sample, channel) biased stats over the H*W interior rows only.
        y3 = y.reshape(B, S, C)
        ym = y3 * mask3
        mean = jnp.sum(ym, axis=1, keepdims=True) * inv_count        # (B,1,C)
        d = y3 - mean
        var = jnp.sum(d * d * mask3, axis=1, keepdims=True) * inv_count
        out = d * jax.lax.rsqrt(var + eps) * gamma + beta
        if relu:
            out = jnp.maximum(out, 0.0)
        return out.reshape(M, C) * mask_bc      # re-establish zero padding rows

    # ---- stage 2: residual blocks (the reference module has NO skip
    # connection).  fori_loop bounds live ranges instead of a 12x-unrolled
    # trace (review item 5); weights are indexed dynamically per block.
    def res_block(blk, x_carry):
        k = 2 * blk

        def w_a(t):
            return wres_ref[k, pl.ds(t * 3 * C, 3 * C), :]

        def w_b(t):
            return wres_ref[k + 1, pl.ds(t * 3 * C, 3 * C), :]

        h = conv3x3(x_carry, w_a)
        h = instance_norm(h, gres_ref[k], bres_ref[k], relu=True)
        h = conv3x3(h, w_b)
        return instance_norm(h, gres_ref[k + 1], bres_ref[k + 1], relu=False)

    x = lax.fori_loop(0, n_blocks, res_block, x)

    # ---- stage 3: conv2(+bias) -> ReLU -> MaxPool(2,1).  The stride-2 conv is
    # realised by evaluating the stride-1 conv on the padded grid and sampling
    # odd grid rows; channels are padded to 128 lanes so the single output
    # store is lane-dense (review item 7).  The per-row gather is tiny here
    # (B*M4*4 rows); a vectorised strided-slab gather would replace it for
    # large spatial outputs.
    y2 = conv3x3(x, lambda t: w2_ref[pl.ds(t * 3 * C, 3 * C), :])
    y2 = jnp.maximum(y2 + b2_ref[...], 0.0)                 # (M, 128) f32
    samples = []
    for b in range(B):
        pos_vals = []
        for rows in pool_rows:                  # static per-sample grid rows
            r0 = b * S + rows[0]
            m = y2[r0:r0 + 1, :]
            for rq in rows[1:]:
                r = b * S + rq
                m = jnp.maximum(m, y2[r:r + 1, :])
            pos_vals.append(m)
        samples.append(jnp.concatenate(pos_vals, axis=0)
                       if len(pos_vals) > 1 else pos_vals[0])
    o_ref[...] = jnp.stack(samples, axis=0)                 # one dense store


# --------------------------- parameters & forward --------------------------- #

def init_params(key, input_nc, resblocks=6):
    def conv_w(k, cout, cin, kh, kw):
        fan_in = cin * kh * kw
        return jax.random.normal(k, (cout, cin, kh, kw), jnp.float32) / jnp.sqrt(
            jnp.float32(fan_in))

    keys = jax.random.split(key, 4 + 2 * resblocks)
    params = {
        "conv1_w": conv_w(keys[0], 64, input_nc, 3, 3),
        "conv1_b": 0.05 * jax.random.normal(keys[1], (64,), jnp.float32),
        "conv2_w": conv_w(keys[2], 8, 64, 3, 3),
        "conv2_b": 0.05 * jax.random.normal(keys[3], (8,), jnp.float32),
        "res": [],
    }
    for i in range(resblocks):
        params["res"].append({
            "w1": conv_w(keys[4 + 2 * i], 64, 64, 3, 3),
            # PyTorch default InstanceNorm2d affine init: weight=1, bias=0
            "g1": jnp.ones((64,), jnp.float32),
            "b1": jnp.zeros((64,), jnp.float32),
            "w2": conv_w(keys[5 + 2 * i], 64, 64, 3, 3),
            "g2": jnp.ones((64,), jnp.float32),
            "b2": jnp.zeros((64,), jnp.float32),
        })
    return params


def encoder_forward(params, x_nchw, samples_per_step=None):
    # layout: accept NCHW (PyTorch convention), return NCHW.
    x = jnp.transpose(x_nchw, (0, 2, 3, 1)).astype(jnp.float32)   # NHWC
    N, H0, W0, Cin = x.shape
    C, C2, C2pad = 64, 8, 128

    B = samples_per_step or _pick_samples_per_step(N)
    assert N % B == 0

    # ---- conv1 geometry (k3, s3, p3) followed by MaxPool(2, s2)
    H1 = (H0 + 2 * 3 - 3) // 3 + 1
    W1 = (W0 + 2 * 3 - 3) // 3 + 1
    Hpool = (H1 - 2) // 2 + 1
    Wpool = (W1 - 2) // 2 + 1
    assert Hpool >= 3 and Wpool >= 3, "input too small for conv2 + MaxPool(2,1)"
    Hg = Hpool + 2                            # zero-padded grid height
    Wg = -(-(Wpool + 2) // 8) * 8             # padded grid width, multiple of 8
                                              # -> every in-kernel row shift is
                                              #    sublane aligned (even as bf16)
    S = Hg * Wg                               # per-sample rows (multiple of 8)
    K1 = 9 * Cin
    # VMEM note (v7x, 64 MiB): resident weights ~1 MiB; activations/im2col scale
    # as B*S ~ B*(H0/6)^2 -> for very large inputs reduce B or tile spatially.

    # conv1 im2col: stride == kernel -> pure layout reshape, no duplication.
    xp = jnp.pad(x, ((0, 0), (3, 3), (3, 3), (0, 0)))
    xp = xp[:, :3 * H1, :3 * W1, :]
    im = xp.reshape(N, H1, 3, W1, 3, Cin).transpose(0, 1, 3, 2, 4, 5)
    im = im.reshape(N, H1, W1, K1)

    # The 4 disjoint maxpool windows, placed on the zero-padded per-sample grid.
    wins = []
    for a in (0, 1):
        for bb in (0, 1):
            w = im[:, a:a + 2 * (Hpool - 1) + 1:2,
                   bb:bb + 2 * (Wpool - 1) + 1:2, :]           # (N,Hpool,Wpool,K1)
            w = jnp.pad(w, ((0, 0), (1, Hg - Hpool - 1),
                            (1, Wg - Wpool - 1), (0, 0)))      # (N,Hg,Wg,K1)
            wins.append(w.reshape(N, S, K1))
    p1 = jnp.stack(wins, axis=0).reshape(4, N * S, K1).astype(jnp.bfloat16)

    # Interior-row mask, pre-broadcast to (B*S, C) so the kernel hoists it once.
    m_np = np.zeros((Hg, Wg), np.float32)
    m_np[1:1 + Hpool, 1:1 + Wpool] = 1.0
    mask = jnp.asarray(np.tile(m_np.reshape(S, 1), (B, C)))

    # ---- weights reshaped to (kh, kw, cin)-major contraction layouts (bf16)
    def flat_w(wt):          # (Cout, Cin, 3, 3) -> (9*Cin, Cout)
        return jnp.transpose(wt, (2, 3, 1, 0)).reshape(-1, wt.shape[0])

    w1 = flat_w(params["conv1_w"]).astype(jnp.bfloat16)               # (K1, 64)
    b1 = params["conv1_b"].reshape(1, C).astype(jnp.float32)
    wres = jnp.stack([flat_w(blk[k]) for blk in params["res"]
                      for k in ("w1", "w2")], axis=0).astype(jnp.bfloat16)
    gres = jnp.stack([blk[k].reshape(1, C).astype(jnp.float32)
                      for blk in params["res"] for k in ("g1", "g2")], axis=0)
    bres = jnp.stack([blk[k].reshape(1, C).astype(jnp.float32)
                      for blk in params["res"] for k in ("b1", "b2")], axis=0)
    w2 = jnp.pad(flat_w(params["conv2_w"]),
                 ((0, 0), (0, C2pad - C2))).astype(jnp.bfloat16)       # (9C,128)
    b2 = jnp.pad(params["conv2_b"], (0, C2pad - C2)).reshape(1, C2pad)
    b2 = b2.astype(jnp.float32)

    # ---- conv2 (k3, s2, p1) + MaxPool(2, s1): static padded-grid rows to pool
    H3 = (Hpool - 1) // 2 + 1
    W3 = (Wpool - 1) // 2 + 1
    H4, W4 = H3 - 1, W3 - 1
    M4 = H4 * W4
    pool_rows = tuple(
        tuple((2 * (pi + u) + 1) * Wg + (2 * (pj + v) + 1)
              for u in (0, 1) for v in (0, 1))
        for pi in range(H4) for pj in range(W4))

    n_blocks = len(params["res"])
    kernel = functools.partial(
        _encoder_kernel, B=B, S=S, Wg=Wg, C=C, n_blocks=n_blocks,
        inv_count=1.0 / float(Hpool * Wpool), eps=1e-5, pool_rows=pool_rows)

    # Advisory cost hint so XLA schedules the surrounding layout ops sensibly.
    flops = 2 * N * S * (4 * K1 * C + 2 * n_blocks * 9 * C * C + 9 * C * C2pad)
    bytes_accessed = (int(p1.size) * 2 + int(wres.size) * 2 + int(w1.size) * 2
                      + int(w2.size) * 2 + int(mask.size) * 4
                      + N * M4 * C2pad * 4)
    cost = pl.CostEstimate(flops=int(flops),
                           transcendentals=int(2 * n_blocks * N * C),
                           bytes_accessed=int(bytes_accessed))

    out = pl.pallas_call(
        kernel,
        out_shape=jax.ShapeDtypeStruct((N, M4, C2pad), jnp.float32),
        grid=(N // B,),
        in_specs=[
            pl.BlockSpec((4, B * S, K1), lambda n: (0, n, 0)),  # per-step im2col
            _const_spec((K1, C)),                               # w1 (resident)
            _const_spec((1, C)),                                # b1
            _const_spec((2 * n_blocks, 9 * C, C)),              # res conv weights
            _const_spec((2 * n_blocks, 1, C)),                  # IN gamma
            _const_spec((2 * n_blocks, 1, C)),                  # IN beta
            _const_spec((9 * C, C2pad)),                        # w2 (lane-padded)
            _const_spec((1, C2pad)),                            # b2
            _const_spec((B * S, C)),                            # interior mask
        ],
        out_specs=pl.BlockSpec((B, M4, C2pad), lambda n: (n, 0, 0)),
        compiler_params=pltpu.CompilerParams(
            dimension_semantics=("parallel",)),
        cost_estimate=cost,
    )(p1, w1, b1, wres, gres, bres, w2, b2, mask)

    out = out[:, :, :C2].reshape(N, H4, W4, C2)
    return jnp.transpose(out, (0, 3, 1, 2))    # back to NCHW


# TODO(synk): torch.autograd.set_detect_anomaly and the InstanceNorm
# track_running_stats buffer updates are training-time side effects with no
# bearing on the forward output; they are intentionally omitted.

if __name__ == "__main__":
    key = jax.random.PRNGKey(0)
    k_x, k_p = jax.random.split(key)
    input_nc = 4
    x = jax.random.normal(k_x, (2, input_nc, 16, 16), jnp.float32)   # NCHW
    params = init_params(k_p, input_nc, resblocks=6)

    fwd = jax.jit(encoder_forward)
    out = jax.block_until_ready(fwd(params, x))

    assert out.shape == (2, 8, 1, 1), out.shape      # matches PyTorch Encoder on 16x16
    assert out.dtype == jnp.float32
    assert bool(jnp.all(jnp.isfinite(out)))
    print("KERNEL_OK")
</pallas_src>

<mosaic_0001>
module attributes {stable_mosaic.version = 11 : i64} {
  func.func @_encoder_kernel(%arg0: i32, %arg1: memref<4x80x36xbf16, #tpu.memory_space<vmem>>, %arg2: memref<36x64xbf16, #tpu.memory_space<vmem>>, %arg3: memref<1x64xf32, #tpu.memory_space<vmem>>, %arg4: memref<12x576x64xbf16, #tpu.memory_space<vmem>>, %arg5: memref<12x1x64xf32, #tpu.memory_space<vmem>>, %arg6: memref<12x1x64xf32, #tpu.memory_space<vmem>>, %arg7: memref<576x128xbf16, #tpu.memory_space<vmem>>, %arg8: memref<1x128xf32, #tpu.memory_space<vmem>>, %arg9: memref<80x64xf32, #tpu.memory_space<vmem>>, %arg10: memref<2x1x128xf32, #tpu.memory_space<vmem>>) attributes {dimension_semantics = [#tpu.dimension_semantics<parallel>], iteration_bounds = array<i64: 1>, scalar_prefetch = 0 : i64, scratch_operands = 0 : i64, tpu.core_type = #tpu.core_type<tc>, window_params = [{transform_indices = @transform_0, window_bounds = array<i64: 4, 80, 36>}, {pipeline_mode = #tpu.pipeline_mode<synchronous>, transform_indices = @transform_1, window_bounds = array<i64: 36, 64>}, {pipeline_mode = #tpu.pipeline_mode<synchronous>, transform_indices = @transform_2, window_bounds = array<i64: 1, 64>}, {pipeline_mode = #tpu.pipeline_mode<synchronous>, transform_indices = @transform_3, window_bounds = array<i64: 12, 576, 64>}, {pipeline_mode = #tpu.pipeline_mode<synchronous>, transform_indices = @transform_4, window_bounds = array<i64: 12, 1, 64>}, {pipeline_mode = #tpu.pipeline_mode<synchronous>, transform_indices = @transform_5, window_bounds = array<i64: 12, 1, 64>}, {pipeline_mode = #tpu.pipeline_mode<synchronous>, transform_indices = @transform_6, window_bounds = array<i64: 576, 128>}, {pipeline_mode = #tpu.pipeline_mode<synchronous>, transform_indices = @transform_7, window_bounds = array<i64: 1, 128>}, {pipeline_mode = #tpu.pipeline_mode<synchronous>, transform_indices = @transform_8, window_bounds = array<i64: 80, 64>}, {transform_indices = @transform_9, window_bounds = array<i64: 2, 1, 128>}]} {
    %c0 = arith.constant 0 : index
    %c0_0 = arith.constant 0 : index
    %0 = vector.load %arg9[%c0, %c0_0] : memref<80x64xf32, #tpu.memory_space<vmem>>, vector<80x64xf32>
    %1 = vector.shape_cast %0 : vector<80x64xf32> to vector<2x40x64xf32>
    %c0_1 = arith.constant 0 : index
    %c0_2 = arith.constant 0 : index
    %c0_3 = arith.constant 0 : index
    %2 = vector.load %arg1[%c0_1, %c0_2, %c0_3] : memref<4x80x36xbf16, #tpu.memory_space<vmem>>, vector<4x80x36xbf16>
    %3 = vector.shape_cast %2 : vector<4x80x36xbf16> to vector<320x36xbf16>
    %c0_4 = arith.constant 0 : index
    %c0_5 = arith.constant 0 : index
    %4 = vector.load %arg2[%c0_4, %c0_5] : memref<36x64xbf16, #tpu.memory_space<vmem>>, vector<36x64xbf16>
    %cst = arith.constant dense<0.000000e+00> : vector<320x64xf32>
    %5 = tpu.matmul %3, %4, %cst {dimension_numbers = #tpu.dot_dimension_numbers<[1], [0], [0], [1], [0, 0, 1, 1], [], []>} : vector<320x36xbf16>, vector<36x64xbf16>, vector<320x64xf32> -> vector<320x64xf32>
    %c0_6 = arith.constant 0 : index
    %c0_7 = arith.constant 0 : index
    %6 = vector.load %arg3[%c0_6, %c0_7] : memref<1x64xf32, #tpu.memory_space<vmem>>, vector<1x64xf32>
    %7 = vector.broadcast %6 : vector<1x64xf32> to vector<320x64xf32>
    %8 = arith.addf %5, %7 : vector<320x64xf32>
    %cst_8 = arith.constant 0.000000e+00 : f32
    %9 = vector.broadcast %cst_8 : f32 to vector<320x64xf32>
    %10 = arith.maximumf %8, %9 : vector<320x64xf32>
    %11 = vector.shape_cast %10 : vector<320x64xf32> to vector<4x80x64xf32>
    %cst_9 = arith.constant dense<0xFF800000> : vector<80x64xf32>
    %12 = vector.multi_reduction <maximumf>, %11, %cst_9 [0] : vector<4x80x64xf32> to vector<80x64xf32>
    %13 = arith.mulf %12, %0 : vector<80x64xf32>
    %c0_i32 = arith.constant 0 : i32
    %c6_i32 = arith.constant 6 : i32
    %14 = arith.addi %c0_i32, %c6_i32 : i32
    %c1_i32 = arith.constant 1 : i32
    %15 = scf.for %arg11 = %c0_i32 to %14 step %c1_i32 iter_args(%arg12 = %13) -> (vector<80x64xf32>)  : i32 {
      %c2_i32 = arith.constant 2 : i32
      %61 = arith.muli %c2_i32, %arg11 : i32
      %62 = vector.extract_strided_slice %arg12 {offsets = [79, 0], sizes = [1, 64], strides = [1, 1]} : vector<80x64xf32> to vector<1x64xf32>
      %63 = vector.extract_strided_slice %arg12 {offsets = [0, 0], sizes = [79, 64], strides = [1, 1]} : vector<80x64xf32> to vector<79x64xf32>
      %64 = tpu.concatenate %62, %63 in 0 : vector<1x64xf32>, vector<79x64xf32> -> vector<80x64xf32>
      %65 = vector.extract_strided_slice %arg12 {offsets = [1, 0], sizes = [79, 64], strides = [1, 1]} : vector<80x64xf32> to vector<79x64xf32>
      %66 = vector.extract_strided_slice %arg12 {offsets = [0, 0], sizes = [1, 64], strides = [1, 1]} : vector<80x64xf32> to vector<1x64xf32>
      %67 = tpu.concatenate %65, %66 in 0 : vector<79x64xf32>, vector<1x64xf32> -> vector<80x64xf32>
      %68 = tpu.concatenate %64, %arg12, %67 in 1 : vector<80x64xf32>, vector<80x64xf32>, vector<80x64xf32> -> vector<80x192xf32>
      %69 = arith.truncf %68 : vector<80x192xf32> to vector<80x192xbf16>
      %70 = vector.extract_strided_slice %69 {offsets = [72, 0], sizes = [8, 192], strides = [1, 1]} : vector<80x192xbf16> to vector<8x192xbf16>
      %71 = vector.extract_strided_slice %69 {offsets = [0, 0], sizes = [72, 192], strides = [1, 1]} : vector<80x192xbf16> to vector<72x192xbf16>
      %72 = tpu.concatenate %70, %71 in 0 : vector<8x192xbf16>, vector<72x192xbf16> -> vector<80x192xbf16>
      %73 = arith.index_cast %61 : i32 to index
      %c0_24 = arith.constant 0 : index
      %c0_25 = arith.constant 0 : index
      %74 = vector.load %arg4[%73, %c0_24, %c0_25] : memref<12x576x64xbf16, #tpu.memory_space<vmem>>, vector<1x192x64xbf16>
      %75 = vector.shape_cast %74 : vector<1x192x64xbf16> to vector<192x64xbf16>
      %cst_26 = arith.constant dense<0.000000e+00> : vector<80x64xf32>
      %76 = tpu.matmul %72, %75, %cst_26 {dimension_numbers = #tpu.dot_dimension_numbers<[1], [0], [0], [1], [0, 0, 1, 1], [], []>} : vector<80x192xbf16>, vector<192x64xbf16>, vector<80x64xf32> -> vector<80x64xf32>
      %77 = arith.index_cast %61 : i32 to index
      %c192_27 = arith.constant 192 : index
      %c0_28 = arith.constant 0 : index
      %78 = vector.load %arg4[%77, %c192_27, %c0_28] : memref<12x576x64xbf16, #tpu.memory_space<vmem>>, vector<1x192x64xbf16>
      %79 = vector.shape_cast %78 : vector<1x192x64xbf16> to vector<192x64xbf16>
      %cst_29 = arith.constant dense<0.000000e+00> : vector<80x64xf32>
      %80 = tpu.matmul %69, %79, %cst_29 {dimension_numbers = #tpu.dot_dimension_numbers<[1], [0], [0], [1], [0, 0, 1, 1], [], []>} : vector<80x192xbf16>, vector<192x64xbf16>, vector<80x64xf32> -> vector<80x64xf32>
      %81 = arith.addf %76, %80 : vector<80x64xf32>
      %82 = vector.extract_strided_slice %69 {offsets = [8, 0], sizes = [72, 192], strides = [1, 1]} : vector<80x192xbf16> to vector<72x192xbf16>
      %83 = vector.extract_strided_slice %69 {offsets = [0, 0], sizes = [8, 192], strides = [1, 1]} : vector<80x192xbf16> to vector<8x192xbf16>
      %84 = tpu.concatenate %82, %83 in 0 : vector<72x192xbf16>, vector<8x192xbf16> -> vector<80x192xbf16>
      %85 = arith.index_cast %61 : i32 to index
      %c384_30 = arith.constant 384 : index
      %c0_31 = arith.constant 0 : index
      %86 = vector.load %arg4[%85, %c384_30, %c0_31] : memref<12x576x64xbf16, #tpu.memory_space<vmem>>, vector<1x192x64xbf16>
      %87 = vector.shape_cast %86 : vector<1x192x64xbf16> to vector<192x64xbf16>
      %cst_32 = arith.constant dense<0.000000e+00> : vector<80x64xf32>
      %88 = tpu.matmul %84, %87, %cst_32 {dimension_numbers = #tpu.dot_dimension_numbers<[1], [0], [0], [1], [0, 0, 1, 1], [], []>} : vector<80x192xbf16>, vector<192x64xbf16>, vector<80x64xf32> -> vector<80x64xf32>
      %89 = arith.addf %81, %88 : vector<80x64xf32>
      %90 = arith.index_cast %61 : i32 to index
      %c0_33 = arith.constant 0 : index
      %c0_34 = arith.constant 0 : index
      %91 = vector.load %arg5[%90, %c0_33, %c0_34] : memref<12x1x64xf32, #tpu.memory_space<vmem>>, vector<1x1x64xf32>
      %92 = vector.shape_cast %91 : vector<1x1x64xf32> to vector<1x64xf32>
      %93 = arith.index_cast %61 : i32 to index
      %c0_35 = arith.constant 0 : index
      %c0_36 = arith.constant 0 : index
      %94 = vector.load %arg6[%93, %c0_35, %c0_36] : memref<12x1x64xf32, #tpu.memory_space<vmem>>, vector<1x1x64xf32>
      %95 = vector.shape_cast %94 : vector<1x1x64xf32> to vector<1x64xf32>
      %96 = vector.shape_cast %89 : vector<80x64xf32> to vector<2x40x64xf32>
      %97 = arith.mulf %96, %1 : vector<2x40x64xf32>
      %cst_37 = arith.constant dense<0.000000e+00> : vector<2x64xf32>
      %98 = vector.multi_reduction <add>, %97, %cst_37 [1] : vector<2x40x64xf32> to vector<2x64xf32>
      %99 = vector.shape_cast %98 : vector<2x64xf32> to vector<2x1x64xf32>
      %cst_38 = arith.constant 0.111111112 : f32
      %100 = vector.broadcast %cst_38 : f32 to vector<2x1x64xf32>
      %101 = arith.mulf %99, %100 : vector<2x1x64xf32>
      %102 = vector.broadcast %101 : vector<2x1x64xf32> to vector<2x40x64xf32>
      %103 = arith.subf %96, %102 : vector<2x40x64xf32>
      %104 = arith.mulf %103, %103 : vector<2x40x64xf32>
      %105 = arith.mulf %104, %1 : vector<2x40x64xf32>
      %cst_39 = arith.constant dense<0.000000e+00> : vector<2x64xf32>
      %106 = vector.multi_reduction <add>, %105, %cst_39 [1] : vector<2x40x64xf32> to vector<2x64xf32>
      %107 = vector.shape_cast %106 : vector<2x64xf32> to vector<2x1x64xf32>
      %cst_40 = arith.constant 0.111111112 : f32
      %108 = vector.broadcast %cst_40 : f32 to vector<2x1x64xf32>
      %109 = arith.mulf %107, %108 : vector<2x1x64xf32>
      %cst_41 = arith.constant 9.99999974E-6 : f32
      %110 = vector.broadcast %cst_41 : f32 to vector<2x1x64xf32>
      %111 = arith.addf %109, %110 : vector<2x1x64xf32>
      %112 = math.rsqrt %111 : vector<2x1x64xf32>
      %113 = vector.broadcast %112 : vector<2x1x64xf32> to vector<2x40x64xf32>
      %114 = arith.mulf %103, %113 : vector<2x40x64xf32>
      %115 = vector.shape_cast %92 : vector<1x64xf32> to vector<1x1x64xf32>
      %116 = vector.broadcast %115 : vector<1x1x64xf32> to vector<2x40x64xf32>
      %117 = arith.mulf %114, %116 : vector<2x40x64xf32>
      %118 = vector.shape_cast %95 : vector<1x64xf32> to vector<1x1x64xf32>
      %119 = vector.broadcast %118 : vector<1x1x64xf32> to vector<2x40x64xf32>
      %120 = arith.addf %117, %119 : vector<2x40x64xf32>
      %cst_42 = arith.constant 0.000000e+00 : f32
      %121 = vector.broadcast %cst_42 : f32 to vector<2x40x64xf32>
      %122 = arith.maximumf %120, %121 : vector<2x40x64xf32>
      %123 = vector.shape_cast %122 : vector<2x40x64xf32> to vector<80x64xf32>
      %124 = arith.mulf %123, %0 : vector<80x64xf32>
      %125 = vector.extract_strided_slice %124 {offsets = [79, 0], sizes = [1, 64], strides = [1, 1]} : vector<80x64xf32> to vector<1x64xf32>
      %126 = vector.extract_strided_slice %124 {offsets = [0, 0], sizes = [79, 64], strides = [1, 1]} : vector<80x64xf32> to vector<79x64xf32>
      %127 = tpu.concatenate %125, %126 in 0 : vector<1x64xf32>, vector<79x64xf32> -> vector<80x64xf32>
      %128 = vector.extract_strided_slice %124 {offsets = [1, 0], sizes = [79, 64], strides = [1, 1]} : vector<80x64xf32> to vector<79x64xf32>
      %129 = vector.extract_strided_slice %124 {offsets = [0, 0], sizes = [1, 64], strides = [1, 1]} : vector<80x64xf32> to vector<1x64xf32>
      %130 = tpu.concatenate %128, %129 in 0 : vector<79x64xf32>, vector<1x64xf32> -> vector<80x64xf32>
      %131 = tpu.concatenate %127, %124, %130 in 1 : vector<80x64xf32>, vector<80x64xf32>, vector<80x64xf32> -> vector<80x192xf32>
      %132 = arith.truncf %131 : vector<80x192xf32> to vector<80x192xbf16>
      %133 = vector.extract_strided_slice %132 {offsets = [72, 0], sizes = [8, 192], strides = [1, 1]} : vector<80x192xbf16> to vector<8x192xbf16>
      %134 = vector.extract_strided_slice %132 {offsets = [0, 0], sizes = [72, 192], strides = [1, 1]} : vector<80x192xbf16> to vector<72x192xbf16>
      %135 = tpu.concatenate %133, %134 in 0 : vector<8x192xbf16>, vector<72x192xbf16> -> vector<80x192xbf16>
      %c1_i32_43 = arith.constant 1 : i32
      %136 = arith.addi %61, %c1_i32_43 : i32
      %137 = arith.index_cast %136 : i32 to index
      %c0_44 = arith.constant 0 : index
      %c0_45 = arith.constant 0 : index
      %138 = vector.load %arg4[%137, %c0_44, %c0_45] : memref<12x576x64xbf16, #tpu.memory_space<vmem>>, vector<1x192x64xbf16>
      %139 = vector.shape_cast %138 : vector<1x192x64xbf16> to vector<192x64xbf16>
      %cst_46 = arith.constant dense<0.000000e+00> : vector<80x64xf32>
      %140 = tpu.matmul %135, %139, %cst_46 {dimension_numbers = #tpu.dot_dimension_numbers<[1], [0], [0], [1], [0, 0, 1, 1], [], []>} : vector<80x192xbf16>, vector<192x64xbf16>, vector<80x64xf32> -> vector<80x64xf32>
      %c1_i32_47 = arith.constant 1 : i32
      %141 = arith.addi %61, %c1_i32_47 : i32
      %142 = arith.index_cast %141 : i32 to index
      %c192_48 = arith.constant 192 : index
      %c0_49 = arith.constant 0 : index
      %143 = vector.load %arg4[%142, %c192_48, %c0_49] : memref<12x576x64xbf16, #tpu.memory_space<vmem>>, vector<1x192x64xbf16>
      %144 = vector.shape_cast %143 : vector<1x192x64xbf16> to vector<192x64xbf16>
      %cst_50 = arith.constant dense<0.000000e+00> : vector<80x64xf32>
      %145 = tpu.matmul %132, %144, %cst_50 {dimension_numbers = #tpu.dot_dimension_numbers<[1], [0], [0], [1], [0, 0, 1, 1], [], []>} : vector<80x192xbf16>, vector<192x64xbf16>, vector<80x64xf32> -> vector<80x64xf32>
      %146 = arith.addf %140, %145 : vector<80x64xf32>
      %147 = vector.extract_strided_slice %132 {offsets = [8, 0], sizes = [72, 192], strides = [1, 1]} : vector<80x192xbf16> to vector<72x192xbf16>
      %148 = vector.extract_strided_slice %132 {offsets = [0, 0], sizes = [8, 192], strides = [1, 1]} : vector<80x192xbf16> to vector<8x192xbf16>
      %149 = tpu.concatenate %147, %148 in 0 : vector<72x192xbf16>, vector<8x192xbf16> -> vector<80x192xbf16>
      %c1_i32_51 = arith.constant 1 : i32
      %150 = arith.addi %61, %c1_i32_51 : i32
      %151 = arith.index_cast %150 : i32 to index
      %c384_52 = arith.constant 384 : index
      %c0_53 = arith.constant 0 : index
      %152 = vector.load %arg4[%151, %c384_52, %c0_53] : memref<12x576x64xbf16, #tpu.memory_space<vmem>>, vector<1x192x64xbf16>
      %153 = vector.shape_cast %152 : vector<1x192x64xbf16> to vector<192x64xbf16>
      %cst_54 = arith.constant dense<0.000000e+00> : vector<80x64xf32>
      %154 = tpu.matmul %149, %153, %cst_54 {dimension_numbers = #tpu.dot_dimension_numbers<[1], [0], [0], [1], [0, 0, 1, 1], [], []>} : vector<80x192xbf16>, vector<192x64xbf16>, vector<80x64xf32> -> vector<80x64xf32>
      %155 = arith.addf %146, %154 : vector<80x64xf32>
      %c1_i32_55 = arith.constant 1 : i32
      %156 = arith.addi %61, %c1_i32_55 : i32
      %157 = arith.index_cast %156 : i32 to index
      %c0_56 = arith.constant 0 : index
      %c0_57 = arith.constant 0 : index
      %158 = vector.load %arg5[%157, %c0_56, %c0_57] : memref<12x1x64xf32, #tpu.memory_space<vmem>>, vector<1x1x64xf32>
      %159 = vector.shape_cast %158 : vector<1x1x64xf32> to vector<1x64xf32>
      %c1_i32_58 = arith.constant 1 : i32
      %160 = arith.addi %61, %c1_i32_58 : i32
      %161 = arith.index_cast %160 : i32 to index
      %c0_59 = arith.constant 0 : index
      %c0_60 = arith.constant 0 : index
      %162 = vector.load %arg6[%161, %c0_59, %c0_60] : memref<12x1x64xf32, #tpu.memory_space<vmem>>, vector<1x1x64xf32>
      %163 = vector.shape_cast %162 : vector<1x1x64xf32> to vector<1x64xf32>
      %164 = vector.shape_cast %155 : vector<80x64xf32> to vector<2x40x64xf32>
      %165 = arith.mulf %164, %1 : vector<2x40x64xf32>
      %cst_61 = arith.constant dense<0.000000e+00> : vector<2x64xf32>
      %166 = vector.multi_reduction <add>, %165, %cst_61 [1] : vector<2x40x64xf32> to vector<2x64xf32>
      %167 = vector.shape_cast %166 : vector<2x64xf32> to vector<2x1x64xf32>
      %cst_62 = arith.constant 0.111111112 : f32
      %168 = vector.broadcast %cst_62 : f32 to vector<2x1x64xf32>
      %169 = arith.mulf %167, %168 : vector<2x1x64xf32>
      %170 = vector.broadcast %169 : vector<2x1x64xf32> to vector<2x40x64xf32>
      %171 = arith.subf %164, %170 : vector<2x40x64xf32>
      %172 = arith.mulf %171, %171 : vector<2x40x64xf32>
      %173 = arith.mulf %172, %1 : vector<2x40x64xf32>
      %cst_63 = arith.constant dense<0.000000e+00> : vector<2x64xf32>
      %174 = vector.multi_reduction <add>, %173, %cst_63 [1] : vector<2x40x64xf32> to vector<2x64xf32>
      %175 = vector.shape_cast %174 : vector<2x64xf32> to vector<2x1x64xf32>
      %cst_64 = arith.constant 0.111111112 : f32
      %176 = vector.broadcast %cst_64 : f32 to vector<2x1x64xf32>
      %177 = arith.mulf %175, %176 : vector<2x1x64xf32>
      %cst_65 = arith.constant 9.99999974E-6 : f32
      %178 = vector.broadcast %cst_65 : f32 to vector<2x1x64xf32>
      %179 = arith.addf %177, %178 : vector<2x1x64xf32>
      %180 = math.rsqrt %179 : vector<2x1x64xf32>
      %181 = vector.broadcast %180 : vector<2x1x64xf32> to vector<2x40x64xf32>
      %182 = arith.mulf %171, %181 : vector<2x40x64xf32>
      %183 = vector.shape_cast %159 : vector<1x64xf32> to vector<1x1x64xf32>
      %184 = vector.broadcast %183 : vector<1x1x64xf32> to vector<2x40x64xf32>
      %185 = arith.mulf %182, %184 : vector<2x40x64xf32>
      %186 = vector.shape_cast %163 : vector<1x64xf32> to vector<1x1x64xf32>
      %187 = vector.broadcast %186 : vector<1x1x64xf32> to vector<2x40x64xf32>
      %188 = arith.addf %185, %187 : vector<2x40x64xf32>
      %189 = vector.shape_cast %188 : vector<2x40x64xf32> to vector<80x64xf32>
      %190 = arith.mulf %189, %0 : vector<80x64xf32>
      scf.yield %190 : vector<80x64xf32>
    }
    %c6_i32_10 = arith.constant 6 : i32
    %16 = vector.extract_strided_slice %15 {offsets = [79, 0], sizes = [1, 64], strides = [1, 1]} : vector<80x64xf32> to vector<1x64xf32>
    %17 = vector.extract_strided_slice %15 {offsets = [0, 0], sizes = [79, 64], strides = [1, 1]} : vector<80x64xf32> to vector<79x64xf32>
    %18 = tpu.concatenate %16, %17 in 0 : vector<1x64xf32>, vector<79x64xf32> -> vector<80x64xf32>
    %19 = vector.extract_strided_slice %15 {offsets = [1, 0], sizes = [79, 64], strides = [1, 1]} : vector<80x64xf32> to vector<79x64xf32>
    %20 = vector.extract_strided_slice %15 {offsets = [0, 0], sizes = [1, 64], strides = [1, 1]} : vector<80x64xf32> to vector<1x64xf32>
    %21 = tpu.concatenate %19, %20 in 0 : vector<79x64xf32>, vector<1x64xf32> -> vector<80x64xf32>
    %22 = tpu.concatenate %18, %15, %21 in 1 : vector<80x64xf32>, vector<80x64xf32>, vector<80x64xf32> -> vector<80x192xf32>
    %23 = arith.truncf %22 : vector<80x192xf32> to vector<80x192xbf16>
    %24 = vector.extract_strided_slice %23 {offsets = [72, 0], sizes = [8, 192], strides = [1, 1]} : vector<80x192xbf16> to vector<8x192xbf16>
    %25 = vector.extract_strided_slice %23 {offsets = [0, 0], sizes = [72, 192], strides = [1, 1]} : vector<80x192xbf16> to vector<72x192xbf16>
    %26 = tpu.concatenate %24, %25 in 0 : vector<8x192xbf16>, vector<72x192xbf16> -> vector<80x192xbf16>
    %c0_11 = arith.constant 0 : index
    %c0_12 = arith.constant 0 : index
    %27 = vector.load %arg7[%c0_11, %c0_12] : memref<576x128xbf16, #tpu.memory_space<vmem>>, vector<192x128xbf16>
    %cst_13 = arith.constant dense<0.000000e+00> : vector<80x128xf32>
    %28 = tpu.matmul %26, %27, %cst_13 {dimension_numbers = #tpu.dot_dimension_numbers<[1], [0], [0], [1], [0, 0, 1, 1], [], []>} : vector<80x192xbf16>, vector<192x128xbf16>, vector<80x128xf32> -> vector<80x128xf32>
    %c192 = arith.constant 192 : index
    %c0_14 = arith.constant 0 : index
    %29 = vector.load %arg7[%c192, %c0_14] : memref<576x128xbf16, #tpu.memory_space<vmem>>, vector<192x128xbf16>
    %cst_15 = arith.constant dense<0.000000e+00> : vector<80x128xf32>
    %30 = tpu.matmul %23, %29, %cst_15 {dimension_numbers = #tpu.dot_dimension_numbers<[1], [0], [0], [1], [0, 0, 1, 1], [], []>} : vector<80x192xbf16>, vector<192x128xbf16>, vector<80x128xf32> -> vector<80x128xf32>
    %31 = arith.addf %28, %30 : vector<80x128xf32>
    %32 = vector.extract_strided_slice %23 {offsets = [8, 0], sizes = [72, 192], strides = [1, 1]} : vector<80x192xbf16> to vector<72x192xbf16>
    %33 = vector.extract_strided_slice %23 {offsets = [0, 0], sizes = [8, 192], strides = [1, 1]} : vector<80x192xbf16> to vector<8x192xbf16>
    %34 = tpu.concatenate %32, %33 in 0 : vector<72x192xbf16>, vector<8x192xbf16> -> vector<80x192xbf16>
    %c384 = arith.constant 384 : index
    %c0_16 = arith.constant 0 : index
    %35 = vector.load %arg7[%c384, %c0_16] : memref<576x128xbf16, #tpu.memory_space<vmem>>, vector<192x128xbf16>
    %cst_17 = arith.constant dense<0.000000e+00> : vector<80x128xf32>
    %36 = tpu.matmul %34, %35, %cst_17 {dimension_numbers = #tpu.dot_dimension_numbers<[1], [0], [0], [1], [0, 0, 1, 1], [], []>} : vector<80x192xbf16>, vector<192x128xbf16>, vector<80x128xf32> -> vector<80x128xf32>
    %37 = arith.addf %31, %36 : vector<80x128xf32>
    %c0_18 = arith.constant 0 : index
    %c0_19 = arith.constant 0 : index
    %38 = vector.load %arg8[%c0_18, %c0_19] : memref<1x128xf32, #tpu.memory_space<vmem>>, vector<1x128xf32>
    %39 = vector.broadcast %38 : vector<1x128xf32> to vector<80x128xf32>
    %40 = arith.addf %37, %39 : vector<80x128xf32>
    %cst_20 = arith.constant 0.000000e+00 : f32
    %41 = vector.broadcast %cst_20 : f32 to vector<80x128xf32>
    %42 = arith.maximumf %40, %41 : vector<80x128xf32>
    %43 = vector.extract_strided_slice %42 {offsets = [9, 0], sizes = [1, 128], strides = [1, 1]} : vector<80x128xf32> to vector<1x128xf32>
    %44 = vector.extract_strided_slice %42 {offsets = [11, 0], sizes = [1, 128], strides = [1, 1]} : vector<80x128xf32> to vector<1x128xf32>
    %45 = arith.maximumf %43, %44 : vector<1x128xf32>
    %46 = vector.extract_strided_slice %42 {offsets = [25, 0], sizes = [1, 128], strides = [1, 1]} : vector<80x128xf32> to vector<1x128xf32>
    %47 = arith.maximumf %45, %46 : vector<1x128xf32>
    %48 = vector.extract_strided_slice %42 {offsets = [27, 0], sizes = [1, 128], strides = [1, 1]} : vector<80x128xf32> to vector<1x128xf32>
    %49 = arith.maximumf %47, %48 : vector<1x128xf32>
    %50 = vector.extract_strided_slice %42 {offsets = [49, 0], sizes = [1, 128], strides = [1, 1]} : vector<80x128xf32> to vector<1x128xf32>
    %51 = vector.extract_strided_slice %42 {offsets = [51, 0], sizes = [1, 128], strides = [1, 1]} : vector<80x128xf32> to vector<1x128xf32>
    %52 = arith.maximumf %50, %51 : vector<1x128xf32>
    %53 = vector.extract_strided_slice %42 {offsets = [65, 0], sizes = [1, 128], strides = [1, 1]} : vector<80x128xf32> to vector<1x128xf32>
    %54 = arith.maximumf %52, %53 : vector<1x128xf32>
    %55 = vector.extract_strided_slice %42 {offsets = [67, 0], sizes = [1, 128], strides = [1, 1]} : vector<80x128xf32> to vector<1x128xf32>
    %56 = arith.maximumf %54, %55 : vector<1x128xf32>
    %57 = vector.shape_cast %49 : vector<1x128xf32> to vector<1x1x128xf32>
    %58 = vector.shape_cast %56 : vector<1x128xf32> to vector<1x1x128xf32>
    %59 = tpu.concatenate %57, %58 in 0 : vector<1x1x128xf32>, vector<1x1x128xf32> -> vector<2x1x128xf32>
    %c0_21 = arith.constant 0 : index
    %c0_22 = arith.constant 0 : index
    %c0_23 = arith.constant 0 : index
    %60 = vector.load %arg10[%c0_21, %c0_22, %c0_23] : memref<2x1x128xf32, #tpu.memory_space<vmem>>, vector<2x1x128xf32>
    tpu.vector_store %arg10[%c0_21, %c0_22, %c0_23], %59 {strides = array<i32>} : memref<2x1x128xf32, #tpu.memory_space<vmem>>, vector<2x1x128xf32>,
    return
  }
  func.func @transform_0(%arg0: i32) -> (i32, i32, i32) {
    %c0_i32 = arith.constant 0 : i32
    %c0_i32_0 = arith.constant 0 : i32
    %c0_i32_1 = arith.constant 0 : i32
    return %c0_i32, %arg0, %c0_i32_0 : i32, i32, i32
  }
  func.func @transform_1(%arg0: i32) -> (i32, i32) {
    %c0_i32 = arith.constant 0 : i32
    %c0_i32_0 = arith.constant 0 : i32
    %c0_i32_1 = arith.constant 0 : i32
    return %c0_i32, %c0_i32_0 : i32, i32
  }
  func.func @transform_2(%arg0: i32) -> (i32, i32) {
    %c0_i32 = arith.constant 0 : i32
    %c0_i32_0 = arith.constant 0 : i32
    %c0_i32_1 = arith.constant 0 : i32
    return %c0_i32, %c0_i32_0 : i32, i32
  }
  func.func @transform_3(%arg0: i32) -> (i32, i32, i32) {
    %c0_i32 = arith.constant 0 : i32
    %c0_i32_0 = arith.constant 0 : i32
    %c0_i32_1 = arith.constant 0 : i32
    %c0_i32_2 = arith.constant 0 : i32
    return %c0_i32, %c0_i32_0, %c0_i32_1 : i32, i32, i32
  }
  func.func @transform_4(%arg0: i32) -> (i32, i32, i32) {
    %c0_i32 = arith.constant 0 : i32
    %c0_i32_0 = arith.constant 0 : i32
    %c0_i32_1 = arith.constant 0 : i32
    %c0_i32_2 = arith.constant 0 : i32
    return %c0_i32, %c0_i32_0, %c0_i32_1 : i32, i32, i32
  }
  func.func @transform_5(%arg0: i32) -> (i32, i32, i32) {
    %c0_i32 = arith.constant 0 : i32
    %c0_i32_0 = arith.constant 0 : i32
    %c0_i32_1 = arith.constant 0 : i32
    %c0_i32_2 = arith.constant 0 : i32
    return %c0_i32, %c0_i32_0, %c0_i32_1 : i32, i32, i32
  }
  func.func @transform_6(%arg0: i32) -> (i32, i32) {
    %c0_i32 = arith.constant 0 : i32
    %c0_i32_0 = arith.constant 0 : i32
    %c0_i32_1 = arith.constant 0 : i32
    return %c0_i32, %c0_i32_0 : i32, i32
  }
  func.func @transform_7(%arg0: i32) -> (i32, i32) {
    %c0_i32 = arith.constant 0 : i32
    %c0_i32_0 = arith.constant 0 : i32
    %c0_i32_1 = arith.constant 0 : i32
    return %c0_i32, %c0_i32_0 : i32, i32
  }
  func.func @transform_8(%arg0: i32) -> (i32, i32) {
    %c0_i32 = arith.constant 0 : i32
    %c0_i32_0 = arith.constant 0 : i32
    %c0_i32_1 = arith.constant 0 : i32
    return %c0_i32, %c0_i32_0 : i32, i32
  }
  func.func @transform_9(%arg0: i32) -> (i32, i32, i32) {
    %c0_i32 = arith.constant 0 : i32
    %c0_i32_0 = arith.constant 0 : i32
    %c0_i32_1 = arith.constant 0 : i32
    return %arg0, %c0_i32, %c0_i32_0 : i32, i32, i32
  }
}

</mosaic_0001>

<bundles_post_ra>
// kernel: encoder_forward.1
= control target key start
LH: loop header
LB: loop body
LE: loop exit
PB: predicated region body
PF: predicated region fallthrough
CT: control target
= control target key end

     0   :  { %vm271_vm0 = vcmask 1041408   ;;  %vm210_vm1 = vcmask 293888   ;;  %vm508_vm2 = vcmask 523264   ;;  %s5470_s1 = inlined_call_operand.vmem [shape: bf16[36,64], index: 1, kind: input, shape index: {}]   ;;  %s5471_s3 = inlined_call_operand.vmem [shape: bf16[12,576,64], index: 3, kind: input, shape index: {}]   ;;  %s5472_s4 = inlined_call_operand.vmem [shape: f32[12,1,64], index: 4, kind: input, shape index: {}]   ;;  %s5473_s5 = inlined_call_operand.vmem [shape: f32[12,1,64], index: 5, kind: input, shape index: {}]   ;;  %s5474_s6 = inlined_call_operand.vmem [shape: bf16[576,128], index: 6, kind: input, shape index: {}]   ;;  %s5475_s7 = inlined_call_operand.vmem [shape: f32[1,128], index: 7, kind: input, shape index: {}]   ;;  %s5476_s9 = inlined_call_operand.vmem [shape: f32[2,1,128], index: 9, kind: output, shape index: {}]   ;;  %s5477_s0 = inlined_call_operand.vmem [shape: bf16[4,80,36], index: 0, kind: input, shape index: {}]   ;;  %s5478_s2 = inlined_call_operand.vmem [shape: f32[1,64], index: 2, kind: input, shape index: {}]   ;;  %s5479_s8 = inlined_call_operand.vmem [shape: f32[80,64], index: 8, kind: input, shape index: {}]  }
   0x1   :  { %v3623_v0 = vld [vmem:[%s5470_s1 + $0x10] ss:$0 sps:$4 sm:$0x33]   ;;  %v3624_v1 = vld [vmem:[%s5470_s1 + $0x8] sm:$0xff]   ;;  %v3625_v3 = vld [vmem:[%s5470_s1] sm:$0xff]  }
   0x2   :  { %3529 = vmatprep.subr.msk.bf16.mxu0 %vm271_vm0, %v3623_v0  ;;  %3530 = vmatprep.subr.msk.bf16.mxu1 %vm271_vm0, %v3623_v0  ;;  %v273_v2 = vsel %vm271_vm0, %v3623_v0, 0  ;;  %v3626_v4 = vld [vmem:[%s5477_s0] sm:$0xff]   ;;  %v3627_v5 = vld [vmem:[%s5477_s0 + $0x50] sm:$0xff]   ;;  %v3628_v6 = vld [vmem:[%s5477_s0 + $0x8] sm:$0xff]  }
   0x3   :  { %3454 = vmatpush3.bf16.msra.mxu0 %v273_v2  ;;  %3502 = vmatpush3.bf16.msra.mxu1 %v273_v2  ;;  %v3629_v7 = vld [vmem:[%s5477_s0 + $0x58] sm:$0xff]   ;;  %v3630_v8 = vld [vmem:[%s5477_s0 + $0x10] sm:$0xff]   ;;  %v3631_v9 = vld [vmem:[%s5477_s0 + $0x60] sm:$0xff]  }
   0x4   :  { %3455 = vmatprep.subr.bf16.mxu0 %v3624_v1  ;;  %3500 = vmatprep.subr.bf16.mxu1 %v3624_v1  ;;  %v3632_v10 = vld [vmem:[%s5477_s0 + $0x18] sm:$0xff]   ;;  %v3633_v11 = vld [vmem:[%s5477_s0 + $0x68] sm:$0xff]   ;;  %v3634_v12 = vld [vmem:[%s5477_s0 + $0x20] sm:$0xff]  }
   0x5   :  { %3459 = vmatprep.mubr.msk.bf16.mxu0 %vm210_vm1, %v3626_v4  ;;  %3479 = vmatprep.mubr.msk.bf16.mxu1 %vm210_vm1, %v3627_v5  ;;  %v3635_v13 = vld [vmem:[%s5477_s0 + $0x70] sm:$0xff]   ;;  %v3636_v14 = vld [vmem:[%s5477_s0 + $0x28] sm:$0xff]   ;;  %v3637_v15 = vld [vmem:[%s5477_s0 + $0x78] sm:$0xff]  }
   0x6   :  { %v3638_v16 = vld [vmem:[%s5477_s0 + $0x30] sm:$0xff]   ;;  %v3639_v17 = vld [vmem:[%s5477_s0 + $0x80] sm:$0xff]   ;;  %v3640_v18 = vld [vmem:[%s5477_s0 + $0x38] sm:$0xff]  }
   0x7   :  { %3456 = vmatpush3.bf16.msra.mxu0 %v3624_v1  ;;  %3503 = vmatpush3.bf16.msra.mxu1 %v3624_v1  ;;  %v3641_v19 = vld [vmem:[%s5477_s0 + $0x88] sm:$0xff]   ;;  %v3642_v20 = vld [vmem:[%s5477_s0 + $0x40] sm:$0xff]   ;;  %v3643_v21 = vld [vmem:[%s5477_s0 + $0x90] sm:$0xff]  }
   0x8   :  { %3457 = vmatprep.subr.bf16.mxu0 %v3625_v3  ;;  %3501 = vmatprep.subr.bf16.mxu1 %v3625_v3  ;;  %v3644_v22 = vld [vmem:[%s5477_s0 + $0x48] sm:$0xff]   ;;  %v3645_v23 = vld [vmem:[%s5477_s0 + $0x98] sm:$0xff]   ;;  %v4071_v28 = vld [vmem:[%s5478_s2] ss:$0 sm:$0xff] }
   0xb   :  { %3458 = vmatpush3.bf16.msra.mxu0 %v3625_v3  ;;  %3504 = vmatpush3.bf16.msra.mxu1 %v3625_v3 }
   0xe   :  { %3460 = vmatmul.mubr.msk.bf16.vlgmr.msra.gmra.mxu0 %vm210_vm1, %v3628_v6  ;;  %3480 = vmatmul.mubr.msk.bf16.vlgmr.msra.gmra.mxu1 %vm210_vm1, %v3629_v7 }
   0xf   :  { %3463 = vmatprep.mubr.msk.bf16.mxu0 %vm210_vm1, %v3630_v8  ;;  %3483 = vmatprep.mubr.msk.bf16.mxu1 %vm210_vm1, %v3631_v9 }
  0x16   :  { %3464 = vmatmul.mubr.msk.bf16.gmra.mxu0 %vm210_vm1, %v3632_v10  ;;  %3484 = vmatmul.mubr.msk.bf16.gmra.mxu1 %vm210_vm1, %v3633_v11 }
  0x17   :  { %3467 = vmatprep.mubr.msk.bf16.mxu0 %vm210_vm1, %v3634_v12  ;;  %3487 = vmatprep.mubr.msk.bf16.mxu1 %vm210_vm1, %v3635_v13 }
  0x1e   :  { %3468 = vmatmul.mubr.msk.bf16.gmra.mxu0 %vm210_vm1, %v3636_v14  ;;  %3488 = vmatmul.mubr.msk.bf16.gmra.mxu1 %vm210_vm1, %v3637_v15 }
  0x1f   :  { %3471 = vmatprep.mubr.msk.bf16.mxu0 %vm210_vm1, %v3638_v16  ;;  %3491 = vmatprep.mubr.msk.bf16.mxu1 %vm210_vm1, %v3639_v17 }
  0x26   :  { %3472 = vmatmul.mubr.msk.bf16.gmra.mxu0 %vm210_vm1, %v3640_v18  ;;  %3492 = vmatmul.mubr.msk.bf16.gmra.mxu1 %vm210_vm1, %v3641_v19 }
  0x27   :  { %3475 = vmatprep.mubr.msk.bf16.mxu0 %vm210_vm1, %v3642_v20  ;;  %3495 = vmatprep.mubr.msk.bf16.mxu1 %vm210_vm1, %v3643_v21 }
  0x2e   :  { %3476 = vmatmul.mubr.msk.bf16.gmra.mxu0 %vm210_vm1, %v3644_v22  ;;  %3496 = vmatmul.mubr.msk.bf16.gmra.mxu1 %vm210_vm1, %v3645_v23 }
  0xce   :  { %v3461_v24 = vpop.f32.mrf.mxu0  ;;  %v3481_v25 = vpop.f32.mrf.mxu1 }
  0xcf   :  { %v318_v31 = vadd.f32 %v3461_v24, %v4071_v28  ;;  %v398_v32 = vadd.f32 %v3481_v25, %v4071_v28 }
  0xd0   :  { %v309_v26 = vpop.f32.mrf.mxu0  ;;  %v389_v27 = vpop.f32.mrf.mxu1 }
  0xd1   :  { %v310_v35 = vadd.f32 %v4071_v28, %v309_v26  ;;  %v390_v36 = vadd.f32 %v4071_v28, %v389_v27  ;;  %v470_v43 = vmax.f32 %v318_v31, 0.0  ;;  %v490_v44 = vmax.f32 %v398_v32, 0.0 }
  0xd2   :  { %v3462_v29 = vpop.f32.mrf.mxu0  ;;  %v3482_v30 = vpop.f32.mrf.mxu1 }
  0xd3   :  { %v321_v37 = vadd.f32 %v3462_v29, %v4071_v28  ;;  %v401_v38 = vadd.f32 %v3482_v30, %v4071_v28  ;;  %v468_v48 = vmax.f32 %v310_v35, 0.0  ;;  %v488_v49 = vmax.f32 %v390_v36, 0.0 }
  0xd4   :  { %v312_v33 = vpop.f32.mrf.mxu0  ;;  %v392_v34 = vpop.f32.mrf.mxu1  ;;  %v4085_v58 = vsel %vm508_vm2, %v470_v43, -inf  ;;  %v4088_v59 = vsel %vm508_vm2, %v490_v44, -inf }
  0xd5   :  { %v313_v41 = vadd.f32 %v4071_v28, %v312_v33  ;;  %v393_v42 = vadd.f32 %v4071_v28, %v392_v34  ;;  %v471_v50 = vmax.f32 %v321_v37, 0.0  ;;  %v491_v51 = vmax.f32 %v401_v38, 0.0 }
  0xd6   :  { %v3465_v39 = vpop.f32.mrf.mxu0  ;;  %v3485_v40 = vpop.f32.mrf.mxu1  ;;  %v509_v0 = vsel %vm508_vm2, %v468_v48, -inf  ;;  %v512_v1 = vsel %vm508_vm2, %v488_v49, -inf }
  0xd7   :  { %v334_v45 = vadd.f32 %v3465_v39, %v4071_v28  ;;  %v414_v52 = vadd.f32 %v3485_v40, %v4071_v28  ;;  %v469_v55 = vmax.f32 %v313_v41, 0.0  ;;  %v489_v56 = vmax.f32 %v393_v42, 0.0 }
  0xd8   :  { %v325_v46 = vpop.f32.mrf.mxu0  ;;  %v405_v47 = vpop.f32.mrf.mxu1  ;;  %v4096_v4 = vsel %vm508_vm2, %v471_v50, -inf  ;;  %v4099_v5 = vsel %vm508_vm2, %v491_v51, -inf }
  0xd9   :  { %v326_v57 = vadd.f32 %v4071_v28, %v325_v46  ;;  %v474_v60 = vmax.f32 %v334_v45, 0.0  ;;  %v406_v61 = vadd.f32 %v4071_v28, %v405_v47  ;;  %v494_v6 = vmax.f32 %v414_v52, 0.0 }
  0xda   :  { %v3466_v53 = vpop.f32.mrf.mxu0  ;;  %v3486_v54 = vpop.f32.mrf.mxu1  ;;  %v516_v10 = vsel %vm508_vm2, %v469_v55, -inf  ;;  %v519_v11 = vsel %vm508_vm2, %v489_v56, -inf  ;;  %v4143_v55 = vld [vmem:[%s5479_s8] sm:$0xff] }
  0xdb   :  { %v4102_v7 = vadd.f32 %v3466_v53, %v4071_v28  ;;  %v472_v12 = vmax.f32 %v326_v57, 0.0  ;;  %v4107_v13 = vadd.f32 %v3486_v54, %v4071_v28  ;;  %v4110_v14 = vsel %vm508_vm2, %v474_v60, -inf }
  0xdc   :  { %v328_v62 = vpop.f32.mrf.mxu0  ;;  %v408_v63 = vpop.f32.mrf.mxu1  ;;  %v492_v15 = vmax.f32 %v406_v61, 0.0  ;;  %v4117_v24 = vsel %vm508_vm2, %v494_v6, -inf }
  0xdd   :  { %v329_v2 = vadd.f32 %v4071_v28, %v328_v62  ;;  %v409_v3 = vadd.f32 %v4071_v28, %v408_v63  ;;  %v475_v25 = vmax.f32 %v4102_v7, 0.0  ;;  %v537_v31 = vsel %vm508_vm2, %v472_v12, -inf }
  0xde   :  { %v3469_v8 = vpop.f32.mrf.mxu0  ;;  %v3489_v9 = vpop.f32.mrf.mxu1  ;;  %v495_v32 = vmax.f32 %v4107_v13, 0.0  ;;  %v540_v35 = vsel %vm508_vm2, %v492_v15, -inf }
  0xdf   :  { %v350_v16 = vadd.f32 %v3469_v8, %v4071_v28  ;;  %v430_v17 = vadd.f32 %v3489_v9, %v4071_v28  ;;  %v473_v20 = vmax.f32 %v329_v2, 0.0  ;;  %v493_v21 = vmax.f32 %v409_v3, 0.0 }
  0xe0   :  { %v341_v18 = vpop.f32.mrf.mxu0  ;;  %v421_v19 = vpop.f32.mrf.mxu1 }
  0xe1   :  { %v342_v22 = vadd.f32 %v4071_v28, %v341_v18  ;;  %v422_v23 = vadd.f32 %v4071_v28, %v421_v19  ;;  %v478_v26 = vmax.f32 %v350_v16, 0.0  ;;  %v498_v27 = vmax.f32 %v430_v17, 0.0 }
  0xe2   :  { %v3470_v29 = vpop.f32.mrf.mxu0  ;;  %v3490_v30 = vpop.f32.mrf.mxu1  ;;  %v4127_v41 = vsel %vm508_vm2, %v473_v20, -inf  ;;  %v4130_v42 = vsel %vm508_vm2, %v493_v21, -inf }
  0xe3   :  { %v353_v33 = vadd.f32 %v3470_v29, %v4071_v28  ;;  %v433_v34 = vadd.f32 %v3490_v30, %v4071_v28  ;;  %v510_v36 = vsel %vm508_vm2, %v478_v26, -inf  ;;  %v476_v37 = vmax.f32 %v342_v22, 0.0 }
  0xe4   :  { %v496_v38 = vmax.f32 %v422_v23, 0.0  ;;  %v344_v39 = vpop.f32.mrf.mxu0  ;;  %v424_v40 = vpop.f32.mrf.mxu1  ;;  %v511_v43 = vmax.f32 %v509_v0, %v510_v36  ;;  %v514_v45 = vsel %vm508_vm2, %v498_v27, -inf }
  0xe5   :  { %v479_v44 = vmax.f32 %v353_v33, 0.0  ;;  %v499_v46 = vmax.f32 %v433_v34, 0.0  ;;  %v345_v47 = vadd.f32 %v4071_v28, %v344_v39  ;;  %v4135_v48 = vadd.f32 %v4071_v28, %v424_v40 }
  0xe6   :  { %v3473_v49 = vpop.f32.mrf.mxu0  ;;  %v3493_v50 = vpop.f32.mrf.mxu1  ;;  %v513_v51 = vmax.f32 %v511_v43, %v512_v1  ;;  %v4146_v56 = vsel %vm508_vm2, %v476_v37, -inf  ;;  %v4149_v57 = vsel %vm508_vm2, %v496_v38, -inf  ;;  %v4180_v43 = vld [vmem:[%s5479_s8 + $0x20] sm:$0xff] }
  0xe7   :  { %v517_v52 = vsel %vm508_vm2, %v479_v44, -inf  ;;  %v366_v53 = vadd.f32 %v3473_v49, %v4071_v28  ;;  %v446_v54 = vadd.f32 %v3493_v50, %v4071_v28  ;;  %v521_v61 = vsel %vm508_vm2, %v499_v46, -inf }
  0xe8   :  { %v518_v60 = vmax.f32 %v516_v10, %v517_v52  ;;  %v357_v62 = vpop.f32.mrf.mxu0  ;;  %v437_v63 = vpop.f32.mrf.mxu1  ;;  %v515_v0 = vmax.f32 %v513_v51, %v514_v45  ;;  %v477_v8 = vmax.f32 %v345_v47, 0.0  ;;  %v497_v9 = vmax.f32 %v4135_v48, 0.0  ;;  %v4161_v10 = vld [vmem:[%s5479_s8 + $0x8] sm:$0xff] }
  0xe9   :  { %v482_v1 = vmax.f32 %v366_v53, 0.0  ;;  %v502_v2 = vmax.f32 %v446_v54, 0.0  ;;  %v358_v3 = vadd.f32 %v4071_v28, %v357_v62  ;;  %v438_v12 = vadd.f32 %v4071_v28, %v437_v63  ;;  %v4189_v53 = vld [vmem:[%s5479_s8 + $0x10] sm:$0xff] }
  0xea   :  { %v520_v6 = vmax.f32 %v518_v60, %v519_v11  ;;  %v3474_v15 = vpop.f32.mrf.mxu0  ;;  %v3494_v16 = vpop.f32.mrf.mxu1  ;;  %v4156_v17 = vmul.f32 %v515_v0, %v4143_v55   ;;  %v4174_v37 = vsel %vm508_vm2, %v477_v8, -inf  ;;  %v561_v48 = vsel %vm508_vm2, %v495_v32, -inf }
  0xeb   :  { %v538_v18 = vsel %vm508_vm2, %v482_v1, -inf  ;;  %v542_v19 = vsel %vm508_vm2, %v502_v2, -inf  ;;  %v480_v11 = vmax.f32 %v358_v3, 0.0  ;;  %v500_v22 = vmax.f32 %v438_v12, 0.0 }
  0xec   :  { %v522_v20 = vmax.f32 %v520_v6, %v521_v61  ;;  %v539_v21 = vmax.f32 %v537_v31, %v538_v18  ;;  %v369_v23 = vadd.f32 %v3474_v15, %v4071_v28  ;;  %v360_v26 = vpop.f32.mrf.mxu0  ;;  %v440_v27 = vpop.f32.mrf.mxu1  ;;  %v449_v30 = vadd.f32 %v3494_v16, %v4071_v28 }
  0xed   :  { %v524_v29 = vsel %vm508_vm2, %v480_v11, -inf  ;;  %v361_v33 = vadd.f32 %v4071_v28, %v360_v26  ;;  %v441_v34 = vadd.f32 %v4071_v28, %v440_v27  ;;  %v528_v44 = vsel %vm508_vm2, %v500_v22, -inf }
  0xee   :  { %v4171_v36 = vmul.f32 %v522_v20, %v4161_v10   ;;  %v541_v31 = vmax.f32 %v539_v21, %v540_v35  ;;  %v525_v38 = vmax.f32 %v4085_v58, %v524_v29  ;;  %v3477_v39 = vpop.f32.mrf.mxu0  ;;  %v3497_v40 = vpop.f32.mrf.mxu1  ;;  %v483_v45 = vmax.f32 %v369_v23, 0.0 }
  0xef   :  { %v503_v46 = vmax.f32 %v449_v30, 0.0  ;;  %v481_v47 = vmax.f32 %v361_v33, 0.0  ;;  %v382_v51 = vadd.f32 %v3477_v39, %v4071_v28  ;;  %v462_v35 = vadd.f32 %v3497_v40, %v4071_v28 }
  0xf0   :  { %v543_v49 = vmax.f32 %v541_v31, %v542_v19  ;;  %v527_v50 = vmax.f32 %v525_v38, %v4088_v59  ;;  %v373_v58 = vpop.f32.mrf.mxu0  ;;  %v453_v52 = vpop.f32.mrf.mxu1  ;;  %v545_v54 = vsel %vm508_vm2, %v483_v45, -inf  ;;  %v501_v62 = vmax.f32 %v441_v34, 0.0 }
  0xf1   :  { %v549_v60 = vsel %vm508_vm2, %v503_v46, -inf  ;;  %v531_v61 = vsel %vm508_vm2, %v481_v47, -inf  ;;  %v546_v0 = vmax.f32 %v4127_v41, %v545_v54  ;;  %v486_v6 = vmax.f32 %v382_v51, 0.0  ;;  %v4213_v41 = vld [vmem:[%s5479_s8 + $0x18] sm:$0xff] }
  0xf2   :  { %v4195_v59 = vmul.f32 %v543_v49, %v4180_v43   ;;  %v529_v63 = vmax.f32 %v527_v50, %v528_v44  ;;  %v532_v1 = vmax.f32 %v4096_v4, %v531_v61  ;;  %v3478_v2 = vpop.f32.mrf.mxu0  ;;  %v3498_v3 = vpop.f32.mrf.mxu1  ;;  %v506_v8 = vmax.f32 %v462_v35, 0.0  ;;  %v4208_v4 = vld [vmem:[%s5479_s8 + $0x28] sm:$0xff] }
  0xf3   :  { %v374_v12 = vadd.f32 %v4071_v28, %v373_v58  ;;  %v454_v15 = vadd.f32 %v4071_v28, %v453_v52  ;;  %v548_v18 = vmax.f32 %v546_v0, %v4130_v42  ;;  %v385_v11 = vadd.f32 %v3478_v2, %v4071_v28  ;;  %v4244_v52 = vld [vmem:[%s5479_s8 + $0x30] sm:$0xff] }
  0xf4   :  { %v581_v16 = vmul.f32 %v529_v63, %v4189_v53   ;;  %v534_v19 = vmax.f32 %v532_v1, %v4099_v5  ;;  %v376_v20 = vpop.f32.mrf.mxu0  ;;  %v535_v21 = vsel %vm508_vm2, %v501_v62, -inf  ;;  %v566_v22 = vsel %vm508_vm2, %v486_v6, -inf  ;;  %v456_v30 = vpop.f32.mrf.mxu1  ;;  %v4262_v1 = vld [vmem:[%s5479_s8 + $0x38] sm:$0xff] }
  0xf5   :  { %v570_v42 = vsel %vm508_vm2, %v506_v8, -inf  ;;  %v484_v5 = vmax.f32 %v374_v12, 0.0  ;;  %v550_v23 = vmax.f32 %v548_v18, %v549_v60  ;;  %v567_v27 = vmax.f32 %v4146_v56, %v566_v22  ;;  %v4229_v56 = vld [vmem:[%s5479_s8 + $0x40] sm:$0xff] }
  0xf6   :  { %v536_v26 = vmax.f32 %v534_v19, %v535_v21  ;;  %v487_v29 = vmax.f32 %v385_v11, 0.0  ;;  %v504_v34 = vmax.f32 %v454_v15, 0.0  ;;  %v465_v31 = vadd.f32 %v3498_v3, %v4071_v28 }
  0xf7   :  { %v552_v33 = vsel %vm508_vm2, %v484_v5, -inf  ;;  %v377_v38 = vadd.f32 %v4071_v28, %v376_v20  ;;  %v584_v39 = vmul.f32 %v550_v23, %v4208_v4   ;;  %v569_v44 = vmax.f32 %v567_v27, %v4149_v57 }
  0xf8   :  { %v582_v40 = vmul.f32 %v536_v26, %v4213_v41   ;;  %v553_v45 = vmax.f32 %v4110_v14, %v552_v33  ;;  %v573_v46 = vsel %vm508_vm2, %v487_v29, -inf  ;;  %v507_v47 = vmax.f32 %v465_v31, 0.0 }
  0xf9   :  { %v485_v49 = vmax.f32 %v377_v38, 0.0  ;;  %v457_v50 = vadd.f32 %v4071_v28, %v456_v30  ;;  %v558_v51 = vsel %vm508_vm2, %v475_v25, -inf  ;;  %v571_v35 = vmax.f32 %v569_v44, %v570_v42 }
  0xfa   :  { %v555_v57 = vmax.f32 %v553_v45, %v4117_v24  ;;  %v574_v14 = vmax.f32 %v4174_v37, %v573_v46  ;;  %v575_v58 = vsel %vm508_vm2, %v497_v9, -inf  ;;  %v556_v28 = vsel %vm508_vm2, %v504_v34, -inf  ;;  %v4255_v9 = vld [vmem:[%s5479_s8 + $0x48] sm:$0xff]  ;;  %s4290_s8 = smov 0  }
  0xfb   :  { %v559_v7 = vsel %vm508_vm2, %v485_v49, -inf  ;;  %v505_v54 = vmax.f32 %v457_v50, 0.0  ;;  %v587_v25 = vmul.f32 %v571_v35, %v4229_v56   ;;  %v577_v37 = vsel %vm508_vm2, %v507_v47, -inf }
  0xfc   :  { %v557_v60 = vmax.f32 %v555_v57, %v556_v28  ;;  %v576_v24 = vmax.f32 %v574_v14, %v575_v58  ;;  %v560_v61 = vmax.f32 %v558_v51, %v559_v7 }
  0xfd   :  { %v563_v13 = vsel %vm508_vm2, %v505_v54, -inf }
  0xfe   :  { %v585_v62 = vmul.f32 %v557_v60, %v4244_v52   ;;  %v578_v63 = vmax.f32 %v576_v24, %v577_v37  ;;  %v562_v0 = vmax.f32 %v560_v61, %v561_v48 }
 0x100   :  { %v588_v32 = vmul.f32 %v578_v63, %v4255_v9   ;;  %v564_v2 = vmax.f32 %v562_v0, %v563_v13 }
 0x102   :  { %v586_v3 = vmul.f32 %v564_v2, %v4262_v1  }
 0x103 LB: > { %v619_v6 = vrot.slane %v3919_v17, 7  ;;  %v3646_v8 = vpack.i.bf16 %v3915_v36, %v3919_v17  ;;  %s3429_s30 = smul.u32 576, %s3923_s8  ;;  %v649_v12 = vrot.slane %v3919_v17, 1  ;;  %v620_v15 = vrot.slane %v3915_v36, 7  ;;  %s3925_s10 = smov 64   ;;  %s3923_s8 = sphi %s4290_s8, %s594_s8   ;;  %v3919_v17 = vphi %v4156_v17, %v5498_v17   ;;  %v3915_v36 = vphi %v4171_v36, %v5497_v36   ;;  %v3911_v16 = vphi %v581_v16, %v5496_v16   ;;  %v3907_v40 = vphi %v582_v40, %v5495_v40   ;;  %v3903_v59 = vphi %v4195_v59, %v5494_v59   ;;  %v3899_v39 = vphi %v584_v39, %v5493_v39   ;;  %v3895_v62 = vphi %v585_v62, %v5492_v62   ;;  %v3891_v3 = vphi %v586_v3, %v5491_v3   ;;  %v3887_v25 = vphi %v587_v25, %v5490_v25   ;;  %v3883_v32 = vphi %v588_v32, %v5489_v32  }
 0x104   : > { %v650_v18 = vrot.slane %v3915_v36, 1  ;;  %v622_v19 = vrot.slane %v3911_v16, 7  ;;  %v3651_v11 = vpack.i.bf16 %v3907_v40, %v3911_v16  ;;  %v624_v17 = vrot.slane %v3907_v40, 7  ;;  %s3190_s2 = sshll.u32 %s3923_s8, 1  ;;  %s594_s8 = sadd.s32 1, %s3923_s8  }
 0x105   : > { %3647 = vrot.lane.b32.xlu0 %v3646_v8, %s3925_s10  ;;  %s4339_s0 = scalar_lea.vmem %s5471_s3, %s3429_s30  ;;  %v654_v20 = vrot.slane %v3907_v40, 1  ;;  %v634_v36 = vrot.slane %v3887_v25, 7  ;;  %v664_v21 = vrot.slane %v3887_v25, 1  ;;  %v3666_v22 = vpack.i.bf16 %v3883_v32, %v3887_v25  ;;  %s4750_s15 = scalar_lea.vmem %s5472_s4, %s3190_s2 }
 0x106   : > { %v607_v42 = vrot.slane %v3883_v32, 7  ;;  %v666_v5 = vrot.slane %v3883_v32, 1  ;;  %v3696_v23 = vld [vmem:[%s4339_s0 + $0x98] sm:$0xff]   ;;  %v3656_v26 = vpack.i.bf16 %v3899_v39, %v3903_v59  ;;  %v628_v27 = vrot.slane %v3899_v39, 7  ;;  %v3697_v33 = vld [vmem:[%s4339_s0 + $0x90] sm:$0xff]   ;;  %v3698_v51 = vld [vmem:[%s4339_s0 + $0x88] sm:$0xff]   ;;  %s4755_s18 = scalar_lea.vmem %s5473_s5, %s3190_s2 }
 0x107   : > { %v658_v29 = vrot.slane %v3899_v39, 1  ;;  %v626_v30 = vrot.slane %v3903_v59, 7  ;;  %v656_v34 = vrot.slane %v3903_v59, 1  ;;  %v632_v31 = vrot.slane %v3891_v3, 7  ;;  %v3700_v59 = vld [vmem:[%s4339_s0 + $0x38] sm:$0xff]   ;;  %v3702_v46 = vld [vmem:[%s4339_s0 + $0x30] sm:$0xff]  }
 0x108   : > { %3657 = vrot.lane.b32.xlu1 %v3656_v26, %s3925_s10  ;;  %v3926_v38 = vmov 0   ;;  %v630_v40 = vrot.slane %v3895_v62, 7  ;;  %v660_v44 = vrot.slane %v3895_v62, 1  ;;  %v3661_v39 = vpack.i.bf16 %v3891_v3, %v3895_v62  ;;  %v3704_v24 = vld [vmem:[%s4339_s0 + $0x28] sm:$0xff]   ;;  %v3699_v13 = vld [vmem:[%s4339_s0 + $0x80] sm:$0xff]   ;;  %v3703_v26 = vld [vmem:[%s4339_s0 + $0x70] sm:$0xff]  }
 0x109   : > { %3652 = vrot.lane.b32.xlu0 %v3651_v11, %s3925_s10  ;;  %909 = vmatprep.subr.bf16.mxu0 %v3926_v38  ;;  %v662_v45 = vrot.slane %v3891_v3, 1  ;;  %vm618_vm3 = vcmask 1040384   ;;  %vm648_vm4 = vcmask 1046528   ;;  %v652_v14 = vrot.slane %v3911_v16, 1  ;;  %p591_p0 = scmp.ge.s32.totalorder %s594_s8, 6  }
 0x10a   : > { %910 = vmatpush1.bf16.msra.mxu0 %v3696_v23  ;;  %1068 = vmatprep.subr.bf16.mxu1 %v3926_v38  ;;  %v4374_v47 = vsel %vm618_vm3, %v619_v6, %v620_v15  ;;  %v4377_v49 = vsel %vm618_vm3, %v607_v42, %v619_v6  ;;  %v4380_v50 = vsel %vm618_vm3, %v620_v15, %v622_v19  ;;  %vm742_vm5 = vcmask 1043456   ;;  %s3927_s20 = smov (%p591_p0), 64  }
 0x10b   : > { %911 = vmatprep.subr.bf16.mxu0 %v3926_v38  ;;  %1069 = vmatpush1.bf16.msra.mxu1 %v3700_v59  ;;  %v4384_v35 = vsel %vm618_vm3, %v622_v19, %v624_v17  ;;  %v651_v57 = vsel %vm648_vm4, %v649_v12, %v650_v18  ;;  %v4389_v58 = vsel %vm618_vm3, %v632_v31, %v634_v36  ;;  %v3706_v19 = vld [vmem:[%s4339_s0 + $0x20] sm:$0xff]   ;;  %v3717_v59 = vld [vmem:[%s4339_s0 + $0x50] sm:$0xff]  }
 0x10c   : > { %3662 = vrot.lane.b32.xlu1 %v3661_v39, %s3925_s10  ;;  %1070 = vmatprep.subr.bf16.mxu1 %v3926_v38  ;;  %v4393_v28 = vsel %vm618_vm3, %v634_v36, %v607_v42  ;;  %v657_v7 = vsel %vm648_vm4, %v654_v20, %v656_v34  ;;  %v4397_v54 = vsel %vm618_vm3, %v624_v17, %v626_v30  ;;  %v3701_v36 = vld [vmem:[%s4339_s0 + $0x78] sm:$0xff]  }
 0x10d   : > { %3667 = vrot.lane.b32.xlu0 %v3666_v22, %s3925_s10  ;;  %v4400_v60 = vsel %vm618_vm3, %v626_v30, %v628_v27  ;;  %v653_v16 = vsel %vm648_vm4, %v650_v18, %v652_v14  ;;  %v655_v61 = vsel %vm648_vm4, %v652_v14, %v654_v20  ;;  %v667_v48 = vsel %vm648_vm4, %v664_v21, %v666_v5  ;;  %v3708_v42 = vld [vmem:[%s4339_s0 + $0x18] sm:$0xff]   ;;  %v3705_v30 = vld [vmem:[%s4339_s0 + $0x68] sm:$0xff]   ;;  %v3721_v14 = vld [vmem:[%s4339_s0 + $0x40] sm:$0xff]  }
 0x10e   : > { %912 = vmatpush1.bf16.msra.mxu0 %v3697_v33  ;;  %v679_v37 = vsel %vm648_vm4, %v666_v5, %v649_v12  ;;  %v721_v62 = vpack.c.bf16 %v653_v16, %v651_v57  ;;  %v4410_v63 = vpack.c.bf16 %v657_v7, %v655_v61  ;;  %v659_v32 = vsel %vm648_vm4, %v656_v34, %v658_v29  ;;  %v3712_v33 = vld [vmem:[%s4339_s0 + $0x8] sm:$0xff]   ;;  %v3707_v34 = vld [vmem:[%s4339_s0 + $0x60] sm:$0xff]   ;;  %v3716_v39 = vld [vmem:[%s4339_s0 + $0x58] sm:$0xff]  }
 0x10f   : > { %913 = vmatprep.subr.bf16.mxu0 %v3926_v38  ;;  %1071 = vmatpush1.bf16.msra.mxu1 %v3702_v46  ;;  %v4412_v0 = vpack.c.bf16 %v679_v37, %v667_v48  ;;  %v661_v2 = vsel %vm648_vm4, %v658_v29, %v660_v44  ;;  %v4418_v3 = vsel %vm618_vm3, %v628_v27, %v630_v40  ;;  %v3710_v27 = vld [vmem:[%s4339_s0 + $0x10] sm:$0xff]   ;;  %v3713_v46 = vld [vmem:[%s4339_s0 + $0xa8] sm:$0xff]   ;;  %v3715_v57 = vld [vmem:[%s4339_s0 + $0xa0] sm:$0xff]  }
 0x110   : > { %1072 = vmatprep.subr.bf16.mxu1 %v3926_v38  ;;  %v4421_v6 = vsel %vm618_vm3, %v630_v40, %v632_v31  ;;  %v744_v8 = vrot.slane %v721_v62, 4  ;;  %3205 = vmatprep.mubr.msk.bf16.mxu0 %vm508_vm2, %v721_v62  ;;  %v4425_v12 = vpack.c.bf16 %v661_v2, %v659_v32  ;;  %v663_v15 = vsel %vm648_vm4, %v660_v44, %v662_v45  ;;  %v3714_v31 = vld [vmem:[%s4339_s0] sm:$0xff]   ;;  %v3709_v44 = vld [vmem:[%s4339_s0 + $0xb8] sm:$0xff]  }
 0x111   : > { %v665_v18 = vsel %vm648_vm4, %v662_v45, %v664_v21  ;;  %v747_v11 = vrot.slane %v4410_v63, 4  ;;  %v733_v20 = vrot.slane %v4412_v0, 4  ;;  %v3711_v45 = vld [vmem:[%s4339_s0 + $0xb0] sm:$0xff]   ;;  %v3718_v37 = vld [vmem:[%s4339_s0 + $0xf8] sm:$0xff]  }
 0x112   : > { %914 = vmatpush1.bf16.msra.mxu0 %v3698_v51  ;;  %v4433_v17 = vpack.c.bf16 %v665_v18, %v663_v15  ;;  %v751_v25 = vrot.slane %v4425_v12, 4  ;;  %v3719_v51 = vld [vmem:[%s4339_s0 + $0x48] sm:$0xff]  }
 0x113   : > { %915 = vmatprep.subr.bf16.mxu0 %v3926_v38  ;;  %1073 = vmatpush1.bf16.msra.mxu1 %v3704_v24  ;;  %v4440_v22 = vsel %vm742_vm5, %v744_v8, %v747_v11  ;;  %v4444_v21 = vsel %vm742_vm5, %v733_v20, %v744_v8 }
 0x114   : > { %1074 = vmatprep.subr.bf16.mxu1 %v3926_v38  ;;  %3222 = vmatprep.mubr.msk.bf16.mxu1 %vm508_vm2, %v4444_v21  ;;  %v755_v5 = vrot.slane %v4433_v17, 4  ;;  %v4451_v23 = vsel %vm742_vm5, %v747_v11, %v751_v25 }
 0x116   : > { %916 = vmatpush1.bf16.msra.mxu0 %v3699_v13  ;;  %v4458_v29 = vsel %vm742_vm5, %v751_v25, %v755_v5  ;;  %v4469_v40 = vsel %vm742_vm5, %v755_v5, %v733_v20 }
 0x117   : > { %917 = vmatprep.subr.bf16.mxu0 %v3926_v38  ;;  %1075 = vmatpush1.bf16.msra.mxu1 %v3706_v19  ;;  %v3720_v19 = vld [vmem:[%s4339_s0 + $0xf0] sm:$0xff]  }
 0x118   : > { %1076 = vmatprep.subr.bf16.mxu1 %v3926_v38 }
 0x11a   : > { %918 = vmatpush1.bf16.msra.mxu0 %v3701_v36 }
 0x11b   : > { %919 = vmatprep.subr.bf16.mxu0 %v3926_v38  ;;  %1077 = vmatpush1.bf16.msra.mxu1 %v3708_v42 }
 0x11c   : > { %1078 = vmatprep.subr.bf16.mxu1 %v3926_v38 }
 0x11e   : > { %920 = vmatpush1.bf16.msra.mxu0 %v3703_v26 }
 0x11f   : > { %921 = vmatprep.subr.bf16.mxu0 %v3926_v38  ;;  %1079 = vmatpush1.bf16.msra.mxu1 %v3710_v27 }
 0x120   : > { %1080 = vmatprep.subr.bf16.mxu1 %v3926_v38 }
 0x122   : > { %922 = vmatpush1.bf16.msra.mxu0 %v3705_v30 }
 0x123   : > { %923 = vmatprep.subr.bf16.mxu0 %v3926_v38  ;;  %1081 = vmatpush1.bf16.msra.mxu1 %v3712_v33  ;;  %v3722_v33 = vld [vmem:[%s4339_s0 + $0xe8] sm:$0xff]  }
 0x124   : > { %1082 = vmatprep.subr.bf16.mxu1 %v3926_v38 }
 0x126   : > { %924 = vmatpush1.bf16.msra.mxu0 %v3707_v34 }
 0x127   : > { %933 = vmatprep.subr.bf16.mxu0 %v3926_v38  ;;  %1083 = vmatpush1.bf16.msra.mxu1 %v3714_v31 }
 0x128   : > { %1092 = vmatprep.subr.bf16.mxu1 %v3926_v38 }
 0x12a   : > { %934 = vmatpush2.bf16.msra.mxu0 %v3709_v44 }
 0x12b   : > { %935 = vmatprep.subr.bf16.mxu0 %v3926_v38  ;;  %1093 = vmatpush2.bf16.msra.mxu1 %v3716_v39 }
 0x12c   : > { %1094 = vmatprep.subr.bf16.mxu1 %v3926_v38 }
 0x12e   : > { %936 = vmatpush2.bf16.msra.mxu0 %v3711_v45 }
 0x12f   : > { %937 = vmatprep.subr.bf16.mxu0 %v3926_v38  ;;  %1095 = vmatpush2.bf16.msra.mxu1 %v3717_v59 }
 0x130   : > { %1096 = vmatprep.subr.bf16.mxu1 %v3926_v38 }
 0x132   : > { %938 = vmatpush2.bf16.msra.mxu0 %v3713_v46  ;;  %v3723_v46 = vld [vmem:[%s4339_s0 + $0xe0] sm:$0xff]  }
 0x133   : > { %939 = vmatprep.subr.bf16.mxu0 %v3926_v38  ;;  %1097 = vmatpush2.bf16.msra.mxu1 %v3719_v51 }
 0x134   : > { %1098 = vmatprep.subr.bf16.mxu1 %v3926_v38 }
 0x136   : > { %940 = vmatpush2.bf16.msra.mxu0 %v3715_v57 }
 0x137   : > { %1237 = vmatprep.subr.bf16.mxu0 %v3926_v38  ;;  %1099 = vmatpush2.bf16.msra.mxu1 %v3721_v14  ;;  %v3724_v14 = vld [vmem:[%s4339_s0 + $0xd8] sm:$0xff]  }
 0x138   : > { %1794 = vmatprep.subr.bf16.mxu1 %v3926_v38 }
 0x177   : > { %v3648_v7 = vpop.permute.xlu0 %3647 }
 0x178   : > { %v3650_v24 = vunpack.i.h.bf16 %v3648_v7  ;;  %v3649_v16 = vunpack.i.l.bf16 %v3648_v7  ;;  %v3726_v7 = vld [vmem:[%s4339_s0 + $0xc8] sm:$0xff]  }
 0x17a   : > { %v710_v61 = vsel %vm508_vm2, %v4377_v49, %v3649_v16  ;;  %v711_v48 = vsel %vm508_vm2, %v4374_v47, %v3650_v24  ;;  %v3658_v8 = vpop.permute.xlu1 %3657  ;;  %v3727_v24 = vld [vmem:[%s4339_s0 + $0xc0] sm:$0xff]   ;;  %v3729_v16 = vld [vmem:[%s4339_s0 + $0x110] sm:$0xff]  }
 0x17b   : > { %v3653_v62 = vpop.permute.xlu0 %3652  ;;  %v720_v13 = vpack.c.bf16 %v711_v48, %v710_v61  ;;  %v3660_v49 = vunpack.i.h.bf16 %v3658_v8  ;;  %v3659_v47 = vunpack.i.l.bf16 %v3658_v8  ;;  %v3731_v61 = vld [vmem:[%s4339_s0 + $0x100] sm:$0xff]  }
 0x17c   : > { %v3655_v32 = vunpack.i.h.bf16 %v3653_v62  ;;  %v3654_v2 = vunpack.i.l.bf16 %v3653_v62 }
 0x17d   : > { %942 = vmatmul.mubr.bf16.vlgmr.msra.gmra.mxu0 %v720_v13  ;;  %v743_v42 = vrot.slane %v720_v13, 4 }
 0x17e   : > { %v712_v15 = vsel %vm508_vm2, %v4380_v50, %v3654_v2  ;;  %v713_v18 = vsel %vm508_vm2, %v4384_v35, %v3655_v32  ;;  %1238 = vmatpush1.bf16.msra.mxu0 %v3718_v37  ;;  %3206 = vmatprep.mubr.msk.bf16.mxu0 %vm508_vm2, %v4410_v63  ;;  %v714_v50 = vsel %vm508_vm2, %v4397_v54, %v3659_v47  ;;  %v3663_v26 = vpop.permute.xlu1 %3662 }
 0x17f   : > { %v3668_v11 = vpop.permute.xlu0 %3667  ;;  %1239 = vmatprep.subr.bf16.mxu0 %v3926_v38  ;;  %v722_v20 = vpack.c.bf16 %v713_v18, %v712_v15  ;;  %v715_v35 = vsel %vm508_vm2, %v4400_v60, %v3660_v49  ;;  %v3665_v34 = vunpack.i.h.bf16 %v3663_v26  ;;  %v3664_v31 = vunpack.i.l.bf16 %v3663_v26 }
 0x180   : > { %v3670_v36 = vunpack.i.h.bf16 %v3668_v11  ;;  %v3669_v25 = vunpack.i.l.bf16 %v3668_v11  ;;  %v724_v27 = vpack.c.bf16 %v715_v35, %v714_v50 }
 0x181   : > { %v745_v5 = vrot.slane %v722_v20, 4  ;;  %v716_v39 = vsel %vm508_vm2, %v4418_v3, %v3664_v31 }
 0x182   : > { %v718_v63 = vsel %vm508_vm2, %v4389_v58, %v3669_v25  ;;  %v719_v30 = vsel %vm508_vm2, %v4393_v28, %v3670_v36  ;;  %1240 = vmatpush1.bf16.msra.mxu0 %v3720_v19  ;;  %v749_v54 = vrot.slane %v724_v27, 4  ;;  %v717_v58 = vsel %vm508_vm2, %v4421_v6, %v3665_v34 }
 0x183   : > { %v728_v44 = vpack.c.bf16 %v719_v30, %v718_v63  ;;  %1241 = vmatprep.subr.bf16.mxu0 %v3926_v38  ;;  %v746_v60 = vsel %vm742_vm5, %v743_v42, %v745_v5  ;;  %v726_v45 = vpack.c.bf16 %v717_v58, %v716_v39 }
 0x184   : > { %v750_v59 = vsel %vm742_vm5, %v745_v5, %v749_v54 }
 0x185   : > { %950 = vmatmul.mubr.bf16.gmra.mxu0 %v722_v20  ;;  %v732_v28 = vrot.slane %v728_v44, 4  ;;  %v753_v3 = vrot.slane %v726_v45, 4 }
 0x186   : > { %1242 = vmatpush1.bf16.msra.mxu0 %v3722_v33  ;;  %3207 = vmatprep.mubr.msk.bf16.mxu0 %vm508_vm2, %v4425_v12  ;;  %v3725_v12 = vld [vmem:[%s4339_s0 + $0xd0] sm:$0xff]  }
 0x187   : > { %v766_v51 = vsel %vm742_vm5, %v732_v28, %v743_v42  ;;  %1243 = vmatprep.subr.bf16.mxu0 %v3926_v38  ;;  %v754_v6 = vsel %vm742_vm5, %v749_v54, %v753_v3  ;;  %v757_v57 = vsel %vm742_vm5, %v753_v3, %v732_v28  ;;  %v3732_v28 = vld [vmem:[%s4339_s0 + $0x1b8] sm:$0xff]   ;;  %v3742_v3 = vld [vmem:[%s4339_s0 + $0x150] sm:$0xff]  }
 0x188   : > { %1101 = vmatmul.mubr.bf16.vlgmr.msra.gmra.mxu1 %v766_v51 }
 0x189   : > { %3223 = vmatprep.mubr.msk.bf16.mxu1 %vm508_vm2, %v4440_v22  ;;  %1795 = vmatpush1.bf16.msra.mxu1 %v3732_v28 }
 0x18a   : > { %1244 = vmatpush1.bf16.msra.mxu0 %v3723_v46  ;;  %v3740_v46 = vld [vmem:[%s4339_s0 + $0x158] sm:$0xff]   ;;  %1796 = vmatprep.subr.bf16.mxu1 %v3926_v38 }
 0x18b   : > { %1245 = vmatprep.subr.bf16.mxu0 %v3926_v38 }
 0x18d   : > { %958 = vmatmul.mubr.bf16.gmra.mxu0 %v724_v27 }
 0x18e   : > { %1246 = vmatpush1.bf16.msra.mxu0 %v3724_v14  ;;  %3208 = vmatprep.mubr.msk.bf16.mxu0 %vm508_vm2, %v4433_v17  ;;  %v3728_v17 = vld [vmem:[%s4339_s0 + $0x118] sm:$0xff]   ;;  %v3734_v14 = vld [vmem:[%s4339_s0 + $0x1a8] sm:$0xff]  }
 0x18f   : > { %1247 = vmatprep.subr.bf16.mxu0 %v3926_v38 }
 0x190   : > { %1109 = vmatmul.mubr.bf16.gmra.mxu1 %v746_v60 }
 0x191   : > { %3224 = vmatprep.mubr.msk.bf16.mxu1 %vm508_vm2, %v4451_v23 }
 0x192   : > { %1248 = vmatpush1.bf16.msra.mxu0 %v3725_v12 }
 0x193   : > { %1249 = vmatprep.subr.bf16.mxu0 %v3926_v38 }
 0x195   : > { %966 = vmatmul.mubr.bf16.gmra.mxu0 %v726_v45 }
 0x196   : > { %1250 = vmatpush1.bf16.msra.mxu0 %v3726_v7  ;;  %3209 = vmatprep.mubr.msk.bf16.mxu0 %vm508_vm2, %v4412_v0  ;;  %v3730_v0 = vld [vmem:[%s4339_s0 + $0x108] sm:$0xff]  }
 0x197   : > { %1251 = vmatprep.subr.bf16.mxu0 %v3926_v38 }
 0x198   : > { %1117 = vmatmul.mubr.bf16.gmra.mxu1 %v750_v59 }
 0x199   : > { %3225 = vmatprep.mubr.msk.bf16.mxu1 %vm508_vm2, %v4458_v29 }
 0x19a   : > { %1252 = vmatpush1.bf16.msra.mxu0 %v3727_v24  ;;  %v3744_v24 = vld [vmem:[%s4339_s0 + $0x148] sm:$0xff]  }
 0x19b   : > { %1261 = vmatprep.subr.bf16.mxu0 %v3926_v38 }
 0x19d   : > { %974 = vmatmul.mubr.bf16.gmra.mxu0 %v728_v44 }
 0x19e   : > { %1262 = vmatpush2.bf16.msra.mxu0 %v3728_v17  ;;  %3239 = vmatprep.mubr.msk.bf16.mxu0 %vm508_vm2, %v4440_v22 }
 0x19f   : > { %1263 = vmatprep.subr.bf16.mxu0 %v3926_v38 }
 0x1a0   : > { %1125 = vmatmul.mubr.bf16.gmra.mxu1 %v754_v6 }
 0x1a1   : > { %3226 = vmatprep.mubr.msk.bf16.mxu1 %vm508_vm2, %v4469_v40 }
 0x1a2   : > { %1264 = vmatpush2.bf16.msra.mxu0 %v3729_v16 }
 0x1a3   : > { %1265 = vmatprep.subr.bf16.mxu0 %v3926_v38 }
 0x1a6   : > { %1266 = vmatpush2.bf16.msra.mxu0 %v3730_v0 }
 0x1a7   : > { %1267 = vmatprep.subr.bf16.mxu0 %v3926_v38 }
 0x1a8   : > { %1133 = vmatmul.mubr.bf16.gmra.mxu1 %v757_v57 }
 0x1aa   : > { %1268 = vmatpush2.bf16.msra.mxu0 %v3731_v61  ;;  %v3735_v61 = vld [vmem:[%s4339_s0 + $0x1a0] sm:$0xff]  }
 0x1ab   : > { %1953 = vmatprep.subr.bf16.mxu0 %v3926_v38 }
 0x1ad   : > { %1270 = vmatmul.mubr.bf16.vlgmr.msra.gmra.mxu0 %v746_v60 }
 0x1ae   : > { %3240 = vmatprep.mubr.msk.bf16.mxu0 %vm508_vm2, %v4451_v23  ;;  %1954 = vmatpush1.bf16.msra.mxu0 %v3740_v46 }
 0x1af   : > { %1955 = vmatprep.subr.bf16.mxu0 %v3926_v38 }
 0x1b2   : > { %1956 = vmatpush1.bf16.msra.mxu0 %v3742_v3  ;;  %v3739_v3 = vld [vmem:[%s4339_s0 + $0x180] sm:$0xff]  }
 0x1b3   : > { %1957 = vmatprep.subr.bf16.mxu0 %v3926_v38 }
 0x1b5   : > { %1278 = vmatmul.mubr.bf16.gmra.mxu0 %v750_v59  ;;  %v3733_v59 = vld [vmem:[%s4339_s0 + $0x1b0] sm:$0xff]  }
 0x1b6   : > { %3241 = vmatprep.mubr.msk.bf16.mxu0 %vm508_vm2, %v4458_v29  ;;  %1797 = vmatpush1.bf16.msra.mxu1 %v3733_v59 }
 0x1b7   : > { %1798 = vmatprep.subr.bf16.mxu1 %v3926_v38  ;;  %1958 = vmatpush1.bf16.msra.mxu0 %v3744_v24  ;;  %v3741_v24 = vld [vmem:[%s4339_s0 + $0x1d8] sm:$0xff]  }
 0x1b8   : > { %1959 = vmatprep.subr.bf16.mxu0 %v3926_v38 }
 0x1ba   : > { %1799 = vmatpush1.bf16.msra.mxu1 %v3734_v14 }
 0x1bb   : > { %1800 = vmatprep.subr.bf16.mxu1 %v3926_v38 }
 0x1bd   : > { %1286 = vmatmul.mubr.bf16.gmra.mxu0 %v754_v6 }
 0x1be   : > { %3242 = vmatprep.mubr.msk.bf16.mxu0 %vm508_vm2, %v4469_v40  ;;  %1801 = vmatpush1.bf16.msra.mxu1 %v3735_v61 }
 0x1bf   : > { %1802 = vmatprep.subr.bf16.mxu1 %v3926_v38 }
 0x1c5   : > { %1294 = vmatmul.mubr.bf16.gmra.mxu0 %v757_v57 }
 0x1c6   : > { %3243 = vmatprep.mubr.msk.bf16.mxu0 %vm508_vm2, %v4444_v21 }
 0x1cd   : > { %1302 = vmatmul.mubr.bf16.gmra.mxu0 %v766_v51 }
 0x23d   : > { %v943_v22 = vpop.f32.mrf.mxu0 }
 0x23f   : > { %v945_v48 = vpop.f32.mrf.mxu0 }
 0x241   : > { %v946_v37 = vpop.f32.mrf.mxu0 }
 0x243   : > { %v948_v62 = vpop.f32.mrf.mxu0 }
 0x245   : > { %v951_v13 = vpop.f32.mrf.mxu0 }
 0x247   : > { %v953_v32 = vpop.f32.mrf.mxu0 }
 0x248   : > { %v1102_v23 = vpop.f32.mrf.mxu1 }
 0x249   : > { %v4565_v2 = vpop.f32.mrf.mxu0  ;;  %v1103_v16 = vadd.f32 %v1102_v23, %v943_v22  ;;  %v3736_v23 = vld [vmem:[%s4339_s0 + $0x198] sm:$0xff]  }
 0x24a   : > { %v1104_v8 = vpop.f32.mrf.mxu1  ;;  %1803 = vmatpush1.bf16.msra.mxu1 %v3736_v23 }
 0x24b   : > { %v956_v29 = vpop.f32.mrf.mxu0  ;;  %v3746_v8 = vld [vmem:[%s4339_s0 + $0x140] sm:$0xff]   ;;  %1804 = vmatprep.subr.bf16.mxu1 %v3926_v38 }
 0x24c   : > { %v1105_v15 = vpop.f32.mrf.mxu1  ;;  %1960 = vmatpush1.bf16.msra.mxu0 %v3746_v8 }
 0x24d   : > { %v4567_v18 = vpop.f32.mrf.mxu0  ;;  %v1106_v7 = vadd.f32 %v1105_v15, %v946_v37  ;;  %1961 = vmatprep.subr.bf16.mxu0 %v3926_v38 }
 0x24e   : > { %v1107_v40 = vpop.f32.mrf.mxu1 }
 0x24f   : > { %v961_v19 = vpop.f32.mrf.mxu0 }
 0x250   : > { %v1110_v49 = vpop.f32.mrf.mxu1 }
 0x251   : > { %v4569_v47 = vpop.f32.mrf.mxu0  ;;  %v1111_v62 = vadd.f32 %v1110_v49, %v951_v13 }
 0x252   : > { %v1112_v21 = vpop.f32.mrf.mxu1 }
 0x253   : > { %v964_v11 = vpop.f32.mrf.mxu0 }
 0x254   : > { %v1113_v20 = vpop.f32.mrf.mxu1 }
 0x255   : > { %v4571_v36 = vpop.f32.mrf.mxu0  ;;  %v1114_v13 = vadd.f32 %v1113_v20, %v4565_v2 }
 0x256   : > { %v1115_v25 = vpop.f32.mrf.mxu1 }
 0x257   : > { %v969_v50 = vpop.f32.mrf.mxu0  ;;  %v3737_v25 = vld [vmem:[%s4339_s0 + $0x190] sm:$0xff]  }
 0x258   : > { %v4573_v35 = vpop.f32.mrf.mxu1  ;;  %1805 = vmatpush1.bf16.msra.mxu1 %v3737_v25 }
 0x259   : > { %v4575_v42 = vpop.f32.mrf.mxu0  ;;  %v1119_v2 = vadd.f32 %v4573_v35, %v4567_v18  ;;  %1806 = vmatprep.subr.bf16.mxu1 %v3926_v38 }
 0x25a   : > { %v1120_v5 = vpop.f32.mrf.mxu1 }
 0x25b   : > { %v972_v26 = vpop.f32.mrf.mxu0 }
 0x25c   : > { %v4577_v27 = vpop.f32.mrf.mxu1 }
 0x25d   : > { %v4579_v63 = vpop.f32.mrf.mxu0 }
 0x25e   : > { %v1123_v30 = vpop.f32.mrf.mxu1 }
 0x25f   : > { %v977_v33 = vpop.f32.mrf.mxu0 }
 0x260   : > { %v4581_v34 = vpop.f32.mrf.mxu1 }
 0x261   : > { %v4583_v31 = vpop.f32.mrf.mxu0  ;;  %v1127_v14 = vadd.f32 %v4581_v34, %v4571_v36 }
 0x262   : > { %v1128_v44 = vpop.f32.mrf.mxu1 }
 0x263   : > { %v980_v54 = vpop.f32.mrf.mxu0 }
 0x264   : > { %v4585_v60 = vpop.f32.mrf.mxu1 }
 0x266   : > { %v1131_v39 = vpop.f32.mrf.mxu1 }
 0x267   : > { %v3738_v39 = vld [vmem:[%s4339_s0 + $0x188] sm:$0xff]  }
 0x268   : > { %v4587_v58 = vpop.f32.mrf.mxu1  ;;  %1807 = vmatpush1.bf16.msra.mxu1 %v3738_v39 }
 0x269   : > { %1808 = vmatprep.subr.bf16.mxu1 %v3926_v38 }
 0x26a   : > { %v1136_v45 = vpop.f32.mrf.mxu1 }
 0x26c   : > { %v4593_v51 = vpop.f32.mrf.mxu1  ;;  %1809 = vmatpush1.bf16.msra.mxu1 %v3739_v3 }
 0x26d   : > { %v1271_v6 = vpop.f32.mrf.mxu0  ;;  %1818 = vmatprep.subr.bf16.mxu1 %v3926_v38 }
 0x26e   : > { %v1139_v57 = vpop.f32.mrf.mxu1  ;;  %v4605_v32 = vadd.f32 %v1271_v6, %v1103_v16 }
 0x26f   : > { %v1273_v12 = vpop.f32.mrf.mxu0 }
 0x270   : > { %v1324_v40 = vmul.f32 %v4605_v32, %v4143_v55  ;;  %1819 = vmatpush2.bf16.msra.mxu1 %v3741_v24 }
 0x271   : > { %v1274_v17 = vpop.f32.mrf.mxu0  ;;  %1820 = vmatprep.subr.bf16.mxu1 %v3926_v38 }
 0x272   : > { %v4601_v0 = vadd.f32 %v1274_v17, %v1106_v7  ;;  %v1334_v20 = vsel %vm508_vm2, %v1324_v40, 0.0  ;;  %v1122_v17 = vadd.f32 %v4577_v27, %v4569_v47 }
 0x273   : > { %v1276_v48 = vpop.f32.mrf.mxu0 }
 0x274   : > { %v1325_v29 = vmul.f32 %v4601_v0, %v4161_v10 }
 0x275   : > { %v1279_v37 = vpop.f32.mrf.mxu0 }
 0x276   : > { %v4611_v22 = vadd.f32 %v1279_v37, %v1111_v62  ;;  %v1335_v21 = vsel %vm508_vm2, %v1325_v29, 0.0  ;;  %v1130_v62 = vadd.f32 %v4585_v60, %v4575_v42  ;;  %v3743_v29 = vld [vmem:[%s4339_s0 + $0x1d0] sm:$0xff]  }
 0x277   : > { %v1281_v15 = vpop.f32.mrf.mxu0  ;;  %v1336_v30 = vadd.f32 %v1335_v21, %v1334_v20  ;;  %1821 = vmatpush2.bf16.msra.mxu1 %v3743_v29 }
 0x278   : > { %v1326_v19 = vmul.f32 %v4611_v22, %v4189_v53  ;;  %v1135_v15 = vadd.f32 %v4587_v58, %v4579_v63  ;;  %1822 = vmatprep.subr.bf16.mxu1 %v3926_v38  ;;  %v1138_v63 = vadd.f32 %v4593_v51, %v4583_v31 }
 0x279   : > { %v1282_v49 = vpop.f32.mrf.mxu0 }
 0x27a   : > { %v4622_v11 = vadd.f32 %v1282_v49, %v1114_v13  ;;  %v1337_v5 = vsel %vm508_vm2, %v1326_v19, 0.0  ;;  %v3745_v49 = vld [vmem:[%s4339_s0 + $0x1c8] sm:$0xff]  }
 0x27b   : > { %v1284_v50 = vpop.f32.mrf.mxu0  ;;  %v1338_v28 = vadd.f32 %v1337_v5, %v1336_v30  ;;  %1823 = vmatpush2.bf16.msra.mxu1 %v3745_v49 }
 0x27c   : > { %v1327_v26 = vmul.f32 %v4622_v11, %v4213_v41  ;;  %1824 = vmatprep.subr.bf16.mxu1 %v3926_v38 }
 0x27d   : > { %v1287_v33 = vpop.f32.mrf.mxu0 }
 0x27e   : > { %v1339_v44 = vsel %vm508_vm2, %v1327_v26, 0.0  ;;  %v4633_v54 = vadd.f32 %v1287_v33, %v1119_v2 }
 0x27f   : > { %v1289_v45 = vpop.f32.mrf.mxu0  ;;  %v1340_v35 = vadd.f32 %v1339_v44, %v1338_v28 }
 0x280   : > { %v1328_v18 = vmul.f32 %v4633_v54, %v4180_v43 }
 0x281   : > { %v1290_v59 = vpop.f32.mrf.mxu0 }
 0x282   : > { %v1341_v46 = vsel %vm508_vm2, %v1328_v18, 0.0  ;;  %v4652_v37 = vadd.f32 %v1290_v59, %v1122_v17 }
 0x283   : > { %v1342_v6 = vadd.f32 %v1341_v46, %v1340_v35  ;;  %v1292_v57 = vpop.f32.mrf.mxu0 }
 0x284   : > { %v1329_v60 = vmul.f32 %v4652_v37, %v4208_v4 }
 0x285   : > { %v1343_v12 = vrot.slane %v1342_v6, 4  ;;  %v1295_v7 = vpop.f32.mrf.mxu0 }
 0x286   : > { %v4647_v61 = vadd.f32 %v1295_v7, %v1127_v14  ;;  %v1349_v20 = vsel %vm508_vm2, %v1329_v60, 0.0 }
 0x287   : > { %v1344_v16 = vadd.f32 %v1343_v12, %v1342_v6  ;;  %v1297_v48 = vpop.f32.mrf.mxu0 }
 0x288   : > { %v1330_v47 = vmul.f32 %v4647_v61, %v4244_v52 }
 0x289   : > { %v1345_v8 = vrot.slane %v1344_v16, 2  ;;  %v1298_v36 = vpop.f32.mrf.mxu0 }
 0x28a   : > { %v4654_v34 = vadd.f32 %v1298_v36, %v1130_v62  ;;  %v1350_v25 = vsel %vm508_vm2, %v1330_v47, 0.0 }
 0x28b   : > { %v1346_v23 = vadd.f32 %v1345_v8, %v1344_v16  ;;  %v1300_v27 = vpop.f32.mrf.mxu0  ;;  %v1351_v30 = vadd.f32 %v1350_v25, %v1349_v20 }
 0x28c   : > { %v1331_v13 = vmul.f32 %v4654_v34, %v4262_v1 }
 0x28d   : > { %v1347_v42 = vrot.slane %v1346_v23, 1  ;;  %v1303_v40 = vpop.f32.mrf.mxu0 }
 0x28e   : > { %v1318_v19 = vadd.f32 %v1303_v40, %v1135_v15  ;;  %v1352_v5 = vsel %vm508_vm2, %v1331_v13, 0.0 }
 0x28f   : > { %v1348_v21 = vadd.f32 %v1347_v42, %v1346_v23  ;;  %v1305_v50 = vpop.f32.mrf.mxu0  ;;  %v1353_v35 = vadd.f32 %v1352_v5, %v1351_v30 }
 0x290   : > { %v1332_v58 = vmul.f32 %v1318_v19, %v4229_v56 }
 0x291   : > { %v1364_v2 = vmul.f32 0.11111111, %v1348_v21  ;;  %v1306_v26 = vpop.f32.mrf.mxu0 }
 0x292   : > { %v1354_v33 = vsel %vm508_vm2, %v1332_v58, 0.0  ;;  %v1319_v44 = vadd.f32 %v1306_v26, %v1138_v63 }
 0x293   : > { %v4676_v39 = vsub.f32 %v4605_v32, %v1364_v2  ;;  %v4679_v28 = vsub.f32 %v4601_v0, %v1364_v2  ;;  %v4682_v31 = vsub.f32 %v4611_v22, %v1364_v2  ;;  %v4685_v51 = vsub.f32 %v4622_v11, %v1364_v2  ;;  %v1308_v45 = vpop.f32.mrf.mxu0 }
 0x294   : > { %v4689_v18 = vsub.f32 %v4633_v54, %v1364_v2  ;;  %v1333_v59 = vmul.f32 %v1319_v44, %v4255_v9  ;;  %v1355_v46 = vadd.f32 %v1354_v33, %v1353_v35 }
 0x295   : > { %v1376_v32 = vmul.f32 %v4676_v39, %v4676_v39  ;;  %v1377_v0 = vmul.f32 %v4679_v28, %v4679_v28  ;;  %v1378_v22 = vmul.f32 %v4682_v31, %v4682_v31  ;;  %v1379_v11 = vmul.f32 %v4685_v51, %v4685_v51 }
 0x296   : > { %v1356_v3 = vsel %vm508_vm2, %v1333_v59, 0.0  ;;  %v1380_v54 = vmul.f32 %v4689_v18, %v4689_v18 }
 0x297   : > { %v1386_v6 = vmul.f32 %v1376_v32, %v4143_v55  ;;  %v1387_v57 = vmul.f32 %v1377_v0, %v4161_v10  ;;  %v1388_v14 = vmul.f32 %v1378_v22, %v4189_v53  ;;  %v1357_v12 = vadd.f32 %v1356_v3, %v1355_v46 }
 0x298   : > { %v1389_v7 = vmul.f32 %v1379_v11, %v4213_v41  ;;  %v1390_v62 = vmul.f32 %v1380_v54, %v4180_v43 }
 0x299   : > { %v1396_v24 = vsel %vm508_vm2, %v1386_v6, 0.0  ;;  %v1397_v17 = vsel %vm508_vm2, %v1387_v57, 0.0  ;;  %v1358_v48 = vrot.slane %v1357_v12, 4  ;;  %v1399_v8 = vsel %vm508_vm2, %v1388_v14, 0.0 }
 0x29a   : > { %v1398_v16 = vadd.f32 %v1397_v17, %v1396_v24  ;;  %v1401_v23 = vsel %vm508_vm2, %v1389_v7, 0.0  ;;  %v1403_v15 = vsel %vm508_vm2, %v1390_v62, 0.0 }
 0x29b   : > { %v1359_v29 = vadd.f32 %v1358_v48, %v1357_v12 }
 0x29c   : > { %v1400_v36 = vadd.f32 %v1399_v8, %v1398_v16 }
 0x29d   : > { %v1360_v27 = vrot.slane %v1359_v29, 2 }
 0x29e   : > { %v1402_v47 = vadd.f32 %v1401_v23, %v1400_v36  ;;  %v4758_v36 = vld [vmem:[%s4750_s15] ss:$0 sm:$0xff] }
 0x29f   : > { %v1361_v60 = vadd.f32 %v1360_v27, %v1359_v29 }
 0x2a0   : > { %v1404_v42 = vadd.f32 %v1403_v15, %v1402_v47 }
 0x2a1   : > { %v1362_v40 = vrot.slane %v1361_v60, 1 }
 0x2a2   : > { %v1405_v13 = vrot.slane %v1404_v42, 4 }
 0x2a3   : > { %v1363_v21 = vadd.f32 %v1362_v40, %v1361_v60  ;;  %v3748_v60 = vld [vmem:[%s4339_s0 + $0x138] sm:$0xff]  }
 0x2a4   : > { %v1406_v49 = vadd.f32 %v1405_v13, %v1404_v42  ;;  %v3747_v42 = vld [vmem:[%s4339_s0 + $0x1c0] sm:$0xff]   ;;  %1962 = vmatpush1.bf16.msra.mxu0 %v3748_v60 }
 0x2a5   : > { %v1365_v50 = vmul.f32 0.11111111, %v1363_v21  ;;  %v4767_v13 = vld [vmem:[%s4755_s18] ss:$0 sm:$0xff]  ;;  %1825 = vmatpush2.bf16.msra.mxu1 %v3747_v42  ;;  %1963 = vmatprep.subr.bf16.mxu0 %v3926_v38 }
 0x2a6   : > { %v1407_v25 = vrot.slane %v1406_v49, 2  ;;  %2122 = vmatprep.subr.bf16.mxu1 %v3926_v38 }
 0x2a7   : > { %v4714_v58 = vsub.f32 %v4652_v37, %v1365_v50  ;;  %v4717_v2 = vsub.f32 %v4647_v61, %v1365_v50  ;;  %v4720_v20 = vsub.f32 %v4654_v34, %v1365_v50  ;;  %v4722_v5 = vsub.f32 %v1318_v19, %v1365_v50 }
 0x2a8   : > { %v1408_v63 = vadd.f32 %v1407_v25, %v1406_v49  ;;  %v4724_v26 = vsub.f32 %v1319_v44, %v1365_v50 }
 0x2a9   : > { %v1381_v33 = vmul.f32 %v4714_v58, %v4714_v58  ;;  %v1382_v45 = vmul.f32 %v4717_v2, %v4717_v2  ;;  %v1383_v37 = vmul.f32 %v4720_v20, %v4720_v20  ;;  %v1384_v61 = vmul.f32 %v4722_v5, %v4722_v5 }
 0x2aa   : > { %v1409_v30 = vrot.slane %v1408_v63, 1  ;;  %v1385_v34 = vmul.f32 %v4724_v26, %v4724_v26 }
 0x2ab   : > { %v1391_v44 = vmul.f32 %v1381_v33, %v4208_v4  ;;  %v1392_v35 = vmul.f32 %v1382_v45, %v4244_v52  ;;  %v1393_v59 = vmul.f32 %v1383_v37, %v4262_v1  ;;  %v1394_v0 = vmul.f32 %v1384_v61, %v4229_v56  ;;  %v3749_v33 = vld [vmem:[%s4339_s0 + $0x130] sm:$0xff]  }
 0x2ac   : > { %v1410_v19 = vadd.f32 %v1409_v30, %v1408_v63  ;;  %v1395_v54 = vmul.f32 %v1385_v34, %v4255_v9  ;;  %1964 = vmatpush1.bf16.msra.mxu0 %v3749_v33 }
 0x2ad   : > { %v1411_v22 = vsel %vm508_vm2, %v1391_v44, 0.0  ;;  %v1412_v11 = vsel %vm508_vm2, %v1392_v35, 0.0  ;;  %v1414_v6 = vsel %vm508_vm2, %v1393_v59, 0.0  ;;  %v1416_v14 = vsel %vm508_vm2, %v1394_v0, 0.0  ;;  %v3751_v59 = vld [vmem:[%s4339_s0 + $0x128] sm:$0xff]   ;;  %1965 = vmatprep.subr.bf16.mxu0 %v3926_v38 }
 0x2ae   : > { %v1426_v32 = vmul.f32 0.11111111, %v1410_v19  ;;  %v1413_v46 = vadd.f32 %v1412_v11, %v1411_v22  ;;  %v1418_v7 = vsel %vm508_vm2, %v1395_v54, 0.0 }
 0x2b0   : > { %v1428_v3 = vadd.f32 1e-05, %v1426_v32  ;;  %v1415_v57 = vadd.f32 %v1414_v6, %v1413_v46  ;;  %1966 = vmatpush1.bf16.msra.mxu0 %v3751_v59 }
 0x2b1   : > { %1967 = vmatprep.subr.bf16.mxu0 %v3926_v38 }
 0x2b2   : > { %3768 = vrsqrt.f32 %v1428_v3  ;;  %v1417_v12 = vadd.f32 %v1416_v14, %v1415_v57 }
 0x2b4   : > { %v1419_v24 = vadd.f32 %v1418_v7, %v1417_v12 }
 0x2b6   : > { %v1420_v17 = vrot.slane %v1419_v24, 4 }
 0x2b8   : > { %v1421_v16 = vadd.f32 %v1420_v17, %v1419_v24 }
 0x2ba   : > { %v1422_v48 = vrot.slane %v1421_v16, 2 }
 0x2bc   : > { %v1423_v62 = vadd.f32 %v1422_v48, %v1421_v16 }
 0x2be   : > { %v1424_v29 = vrot.slane %v1423_v62, 1 }
 0x2bf   : > { %v3769_v8 = vpop.eup %3768 }
 0x2c0   : > { %v1436_v23 = vmul.f32 %v3769_v8, %v4689_v18  ;;  %v1434_v47 = vmul.f32 %v3769_v8, %v4682_v31  ;;  %v1435_v27 = vmul.f32 %v3769_v8, %v4685_v51  ;;  %v1432_v15 = vmul.f32 %v3769_v8, %v4676_v39 }
 0x2c1   : > { %v1425_v40 = vadd.f32 %v1424_v29, %v1423_v62  ;;  %v1433_v49 = vmul.f32 %v3769_v8, %v4679_v28  ;;  %v3753_v62 = vld [vmem:[%s4339_s0 + $0x120] sm:$0xff]  }
 0x2c2   : > { %v1452_v21 = vmul.f32 %v4758_v36, %v1436_v23  ;;  %v1450_v25 = vmul.f32 %v4758_v36, %v1434_v47  ;;  %v1451_v18 = vmul.f32 %v4758_v36, %v1435_v27  ;;  %v1448_v31 = vmul.f32 %v4758_v36, %v1432_v15  ;;  %1968 = vmatpush1.bf16.msra.mxu0 %v3753_v62 }
 0x2c3   : > { %v1427_v51 = vmul.f32 0.11111111, %v1425_v40  ;;  %v1449_v39 = vmul.f32 %v4758_v36, %v1433_v49  ;;  %1977 = vmatprep.subr.bf16.mxu0 %v3926_v38 }
 0x2c4   : > { %v1468_v50 = vadd.f32 %v4767_v13, %v1452_v21  ;;  %v1466_v28 = vadd.f32 %v4767_v13, %v1450_v25  ;;  %v1467_v63 = vadd.f32 %v4767_v13, %v1451_v18  ;;  %v1464_v30 = vadd.f32 %v4767_v13, %v1448_v31  ;;  %v3755_v21 = vld [vmem:[%s4339_s0 + $0x178] sm:$0xff]  }
 0x2c5   : > { %v1429_v45 = vadd.f32 1e-05, %v1427_v51  ;;  %v1465_v37 = vadd.f32 %v4767_v13, %v1449_v39 }
 0x2c6   : > { %v1476_v61 = vmax.f32 %v1466_v28, 0.0  ;;  %v1477_v34 = vmax.f32 %v1467_v63, 0.0  ;;  %v1474_v19 = vmax.f32 %v1464_v30, 0.0  ;;  %v1478_v44 = vmax.f32 %v1468_v50, 0.0  ;;  %1978 = vmatpush2.bf16.msra.mxu0 %v3755_v21 }
 0x2c7   : > { %3770 = vrsqrt.f32 %v1429_v45  ;;  %v1475_v35 = vmax.f32 %v1465_v37, 0.0  ;;  %1979 = vmatprep.subr.bf16.mxu0 %v3926_v38  ;;  %v3757_v45 = vld [vmem:[%s4339_s0 + $0x170] sm:$0xff]  }
 0x2c8   : > { %v1486_v32 = vmul.f32 %v1476_v61, %v4189_v53  ;;  %v1487_v0 = vmul.f32 %v1477_v34, %v4213_v41  ;;  %v4787_v22 = vmul.f32 %v1474_v19, %v4143_v55  ;;  %v4790_v11 = vmul.f32 %v1478_v44, %v4180_v43 }
 0x2c9   : > { %v1485_v46 = vmul.f32 %v1475_v35, %v4161_v10 }
 0x2ca   : > { %v3676_v3 = vpack.i.bf16 %v1487_v0, %v1486_v32  ;;  %v1535_v54 = vrot.slane %v4787_v22, 1  ;;  %v1538_v6 = vrot.slane %v1486_v32, 1  ;;  %v1511_v57 = vrot.slane %v1487_v0, 7  ;;  %1980 = vmatpush2.bf16.msra.mxu0 %v3757_v45 }
 0x2cb   : > { %v3671_v14 = vpack.i.bf16 %v1485_v46, %v4787_v22  ;;  %v1536_v12 = vrot.slane %v1485_v46, 1  ;;  %v1507_v7 = vrot.slane %v1485_v46, 7  ;;  %v1509_v24 = vrot.slane %v1486_v32, 7  ;;  %1981 = vmatprep.subr.bf16.mxu0 %v3926_v38  ;;  %v3759_v46 = vld [vmem:[%s4339_s0 + $0x168] sm:$0xff]  }
 0x2cc   : > { %3677 = vrot.lane.b32.xlu0 %v3676_v3, %s3925_s10  ;;  %v1506_v17 = vrot.slane %v4787_v22, 7  ;;  %v1540_v16 = vrot.slane %v1487_v0, 1  ;;  %v1542_v48 = vrot.slane %v4790_v11, 1  ;;  %v1513_v8 = vrot.slane %v4790_v11, 7 }
 0x2cd   : > { %3672 = vrot.lane.b32.xlu1 %v3671_v14, %s3925_s10  ;;  %v1537_v29 = vsel %vm648_vm4, %v1535_v54, %v1536_v12  ;;  %v1539_v23 = vsel %vm648_vm4, %v1536_v12, %v1538_v6  ;;  %v4808_v47 = vsel %vm618_vm3, %v1507_v7, %v1509_v24  ;;  %v4811_v27 = vsel %vm618_vm3, %v1509_v24, %v1511_v57 }
 0x2ce   : > { %v4813_v15 = vpack.c.bf16 %v1539_v23, %v1537_v29  ;;  %v4818_v42 = vsel %vm618_vm3, %v1506_v17, %v1507_v7  ;;  %v1541_v60 = vsel %vm648_vm4, %v1538_v6, %v1540_v16  ;;  %v1543_v40 = vsel %vm648_vm4, %v1540_v16, %v1542_v48  ;;  %1982 = vmatpush2.bf16.msra.mxu0 %v3759_v46 }
 0x2cf   : > { %v4824_v49 = vpack.c.bf16 %v1543_v40, %v1541_v60  ;;  %v4830_v25 = vsel %vm618_vm3, %v1511_v57, %v1513_v8  ;;  %1983 = vmatprep.subr.bf16.mxu0 %v3926_v38 }
 0x2d0   : > { %v1629_v18 = vrot.slane %v4813_v15, 4  ;;  %3308 = vmatprep.mubr.msk.bf16.mxu1 %vm508_vm2, %v4813_v15 }
 0x2d1   : > { %v1632_v31 = vrot.slane %v4824_v49, 4 }
 0x2d3   : > { %v4842_v51 = vsel %vm742_vm5, %v1629_v18, %v1632_v31 }
 0x2d4   : > { %v3771_v39 = vpop.eup %3770 }
 0x2d5   : > { %v1441_v50 = vmul.f32 %v3771_v39, %v4724_v26  ;;  %v1438_v28 = vmul.f32 %v3771_v39, %v4717_v2  ;;  %v1439_v63 = vmul.f32 %v3771_v39, %v4720_v20  ;;  %v1437_v30 = vmul.f32 %v3771_v39, %v4714_v58 }
 0x2d6   : > { %v1440_v33 = vmul.f32 %v3771_v39, %v4722_v5 }
 0x2d7   : > { %v1457_v37 = vmul.f32 %v4758_v36, %v1441_v50  ;;  %v1454_v61 = vmul.f32 %v4758_v36, %v1438_v28  ;;  %v1455_v34 = vmul.f32 %v4758_v36, %v1439_v63  ;;  %v1453_v19 = vmul.f32 %v4758_v36, %v1437_v30 }
 0x2d8   : > { %v1456_v26 = vmul.f32 %v4758_v36, %v1440_v33 }
 0x2d9   : > { %v1473_v2 = vadd.f32 %v4767_v13, %v1457_v37  ;;  %v1470_v20 = vadd.f32 %v4767_v13, %v1454_v61  ;;  %v1471_v58 = vadd.f32 %v4767_v13, %v1455_v34  ;;  %v1469_v5 = vadd.f32 %v4767_v13, %v1453_v19 }
 0x2da   : > { %v1472_v44 = vadd.f32 %v4767_v13, %v1456_v26  ;;  %v3761_v13 = vld [vmem:[%s4339_s0 + $0x160] sm:$0xff]  }
 0x2db   : > { %v1480_v35 = vmax.f32 %v1470_v20, 0.0  ;;  %v1481_v59 = vmax.f32 %v1471_v58, 0.0  ;;  %v1479_v32 = vmax.f32 %v1469_v5, 0.0  ;;  %v1483_v0 = vmax.f32 %v1473_v2, 0.0  ;;  %1984 = vmatpush2.bf16.msra.mxu0 %v3761_v13 }
 0x2dc   : > { %v1482_v36 = vmax.f32 %v1472_v44, 0.0 }
 0x2dd   : > { %v1490_v3 = vmul.f32 %v1480_v35, %v4244_v52  ;;  %v1491_v6 = vmul.f32 %v1481_v59, %v4262_v1  ;;  %v1489_v57 = vmul.f32 %v1479_v32, %v4208_v4  ;;  %v1493_v14 = vmul.f32 %v1483_v0, %v4255_v9 }
 0x2de   : > { %v1492_v12 = vmul.f32 %v1482_v36, %v4229_v56 }
 0x2df   : > { %v3686_v7 = vpack.i.bf16 %v1491_v6, %v1490_v3  ;;  %v3681_v24 = vpack.i.bf16 %v1489_v57, %v4790_v11  ;;  %v1552_v16 = vrot.slane %v1493_v14, 1  ;;  %v1495_v62 = vrot.slane %v1493_v14, 7 }
 0x2e0   : > { %v3691_v29 = vpack.i.bf16 %v1493_v14, %v1492_v12  ;;  %v1550_v23 = vrot.slane %v1492_v12, 1  ;;  %v1544_v60 = vrot.slane %v1489_v57, 1  ;;  %v1546_v40 = vrot.slane %v1490_v3, 1 }
 0x2e1   : > { %3687 = vrot.lane.b32.xlu0 %v3686_v7, %s3925_s10  ;;  %3682 = vrot.lane.b32.xlu1 %v3681_v24, %s3925_s10  ;;  %v1565_v21 = vsel %vm648_vm4, %v1552_v16, %v1535_v54  ;;  %v1534_v39 = vsel %vm618_vm3, %v1495_v62, %v1506_v17  ;;  %v1519_v50 = vrot.slane %v1491_v6, 7  ;;  %v1515_v28 = vrot.slane %v1489_v57, 7 }
 0x2e2   : > { %v1553_v63 = vsel %vm648_vm4, %v1550_v23, %v1552_v16  ;;  %v1545_v30 = vsel %vm648_vm4, %v1542_v48, %v1544_v60  ;;  %v1547_v33 = vsel %vm648_vm4, %v1544_v60, %v1546_v40  ;;  %v1517_v45 = vrot.slane %v1490_v3, 7 }
 0x2e3   : > { %v4884_v37 = vpack.c.bf16 %v1565_v21, %v1553_v63  ;;  %v1611_v61 = vpack.c.bf16 %v1547_v33, %v1545_v30  ;;  %v1516_v22 = vsel %vm618_vm3, %v1513_v8, %v1515_v28  ;;  %v1521_v54 = vrot.slane %v1492_v12, 7  ;;  %v3750_v12 = vld [vmem:[%s4339_s0 + $0x218] sm:$0xff]   ;;  %v3760_v33 = vld [vmem:[%s4339_s0 + $0x1f0] sm:$0xff]  }
 0x2e4   : > { %v1518_v17 = vsel %vm618_vm3, %v1515_v28, %v1517_v45  ;;  %v1520_v34 = vsel %vm618_vm3, %v1517_v45, %v1519_v50  ;;  %v1548_v19 = vrot.slane %v1491_v6, 1 }
 0x2e5   : > { %3692 = vrot.lane.b32.xlu1 %v3691_v29, %s3925_s10  ;;  %v1619_v48 = vrot.slane %v4884_v37, 4  ;;  %v1636_v26 = vrot.slane %v1611_v61, 4  ;;  %v4894_v2 = vsel %vm618_vm3, %v1519_v50, %v1521_v54  ;;  %v4897_v20 = vsel %vm618_vm3, %v1521_v54, %v1495_v62  ;;  %v3756_v62 = vld [vmem:[%s4339_s0 + $0x200] sm:$0xff]  }
 0x2e6   : > { %v1549_v11 = vsel %vm648_vm4, %v1546_v40, %v1548_v19  ;;  %v1551_v8 = vsel %vm648_vm4, %v1548_v19, %v1550_v23 }
 0x2e7   : > { %v4904_v58 = vsel %vm742_vm5, %v1619_v48, %v1629_v18  ;;  %v1613_v5 = vpack.c.bf16 %v1551_v8, %v1549_v11  ;;  %v4909_v44 = vsel %vm742_vm5, %v1632_v31, %v1636_v26 }
 0x2e8   : > { %3325 = vmatprep.mubr.msk.bf16.mxu0 %vm508_vm2, %v4904_v58 }
 0x2e9   : > { %v1640_v35 = vrot.slane %v1613_v5, 4 }
 0x2eb   : > { %v4914_v59 = vsel %vm742_vm5, %v1636_v26, %v1640_v35  ;;  %v4917_v32 = vsel %vm742_vm5, %v1640_v35, %v1619_v48 }
 0x33e   : > { %v3678_v15 = vpop.permute.xlu0 %3677 }
 0x33f   : > { %v3680_v18 = vunpack.i.h.bf16 %v3678_v15  ;;  %v3679_v0 = vunpack.i.l.bf16 %v3678_v15  ;;  %v3673_v46 = vpop.permute.xlu1 %3672 }
 0x340   : > { %v3675_v36 = vunpack.i.h.bf16 %v3673_v46  ;;  %v3674_v3 = vunpack.i.l.bf16 %v3673_v46  ;;  %v3766_v46 = vld [vmem:[%s4339_s0 + $0x228] sm:$0xff]  }
 0x341   : > { %v1598_v31 = vsel %vm508_vm2, %v4808_v47, %v3679_v0  ;;  %v1599_v6 = vsel %vm508_vm2, %v4811_v27, %v3680_v18  ;;  %v3752_v47 = vld [vmem:[%s4339_s0 + $0x210] sm:$0xff]   ;;  %v3763_v18 = vld [vmem:[%s4339_s0 + $0x1e0] sm:$0xff]  }
 0x342   : > { %v1596_v57 = vsel %vm508_vm2, %v1534_v39, %v3674_v3  ;;  %v1597_v14 = vsel %vm508_vm2, %v4818_v42, %v3675_v36  ;;  %v1608_v13 = vpack.c.bf16 %v1599_v6, %v1598_v31  ;;  %v3754_v42 = vld [vmem:[%s4339_s0 + $0x208] sm:$0xff]   ;;  %v3765_v0 = vld [vmem:[%s4339_s0 + $0x230] sm:$0xff]  }
 0x343   : > { %v1606_v7 = vpack.c.bf16 %v1597_v14, %v1596_v57 }
 0x344   : > { %v1630_v24 = vrot.slane %v1608_v13, 4 }
 0x345   : > { %v1628_v16 = vrot.slane %v1606_v7, 4  ;;  %1827 = vmatmul.mubr.bf16.vlgmr.msra.gmra.mxu1 %v1606_v7 }
 0x346   : > { %2123 = vmatpush1.bf16.msra.mxu1 %v3750_v12  ;;  %3309 = vmatprep.mubr.msk.bf16.mxu1 %vm508_vm2, %v4824_v49  ;;  %v3758_v49 = vld [vmem:[%s4339_s0 + $0x1f8] sm:$0xff]  }
 0x347   : > { %2124 = vmatprep.subr.bf16.mxu1 %v3926_v38  ;;  %v4932_v27 = vsel %vm742_vm5, %v1628_v16, %v1630_v24 }
 0x34a   : > { %2125 = vmatpush1.bf16.msra.mxu1 %v3752_v47 }
 0x34b   : > { %2126 = vmatprep.subr.bf16.mxu1 %v3926_v38 }
 0x34d   : > { %1835 = vmatmul.mubr.bf16.gmra.mxu1 %v1608_v13 }
 0x34e   : > { %2127 = vmatpush1.bf16.msra.mxu1 %v3754_v42  ;;  %3310 = vmatprep.mubr.msk.bf16.mxu1 %vm508_vm2, %v1611_v61 }
 0x34f   : > { %2128 = vmatprep.subr.bf16.mxu1 %v3926_v38 }
 0x352   : > { %2129 = vmatpush1.bf16.msra.mxu1 %v3756_v62 }
 0x353   : > { %v3688_v29 = vpop.permute.xlu0 %3687  ;;  %v3683_v23 = vpop.permute.xlu1 %3682  ;;  %2130 = vmatprep.subr.bf16.mxu1 %v3926_v38 }
 0x354   : > { %v3690_v60 = vunpack.i.h.bf16 %v3688_v29  ;;  %v3689_v40 = vunpack.i.l.bf16 %v3688_v29  ;;  %v3685_v21 = vunpack.i.h.bf16 %v3683_v23  ;;  %v3684_v39 = vunpack.i.l.bf16 %v3683_v23 }
 0x356   : > { %v1602_v50 = vsel %vm508_vm2, %v1518_v17, %v3689_v40  ;;  %v1603_v28 = vsel %vm508_vm2, %v1520_v34, %v3690_v60  ;;  %v1600_v63 = vsel %vm508_vm2, %v4830_v25, %v3684_v39  ;;  %v1601_v30 = vsel %vm508_vm2, %v1516_v22, %v3685_v21  ;;  %2131 = vmatpush1.bf16.msra.mxu1 %v3758_v49  ;;  %v3762_v22 = vld [vmem:[%s4339_s0 + $0x1e8] sm:$0xff]  }
 0x357   : > { %v1612_v45 = vpack.c.bf16 %v1603_v28, %v1602_v50  ;;  %v3693_v61 = vpop.permute.xlu1 %3692  ;;  %2132 = vmatprep.subr.bf16.mxu1 %v3926_v38  ;;  %v1610_v54 = vpack.c.bf16 %v1601_v30, %v1600_v63 }
 0x358   : > { %v3695_v19 = vunpack.i.h.bf16 %v3693_v61  ;;  %v3694_v48 = vunpack.i.l.bf16 %v3693_v61 }
 0x359   : > { %v1638_v26 = vrot.slane %v1612_v45, 4  ;;  %v1634_v17 = vrot.slane %v1610_v54, 4  ;;  %1843 = vmatmul.mubr.bf16.gmra.mxu1 %v1610_v54 }
 0x35a   : > { %v1605_v34 = vsel %vm508_vm2, %v4897_v20, %v3695_v19  ;;  %v1604_v25 = vsel %vm508_vm2, %v4894_v2, %v3694_v48  ;;  %2133 = vmatpush1.bf16.msra.mxu1 %v3760_v33  ;;  %3311 = vmatprep.mubr.msk.bf16.mxu1 %vm508_vm2, %v1613_v5  ;;  %v3764_v5 = vld [vmem:[%s4339_s0 + $0x238] sm:$0xff]  }
 0x35b   : > { %v1614_v11 = vpack.c.bf16 %v1605_v34, %v1604_v25  ;;  %2134 = vmatprep.subr.bf16.mxu1 %v3926_v38  ;;  %v1635_v8 = vsel %vm742_vm5, %v1630_v24, %v1634_v17  ;;  %v1639_v35 = vsel %vm742_vm5, %v1634_v17, %v1638_v26 }
 0x35d   : > { %v1618_v15 = vrot.slane %v1614_v11, 4 }
 0x35e   : > { %2135 = vmatpush1.bf16.msra.mxu1 %v3762_v22 }
 0x35f   : > { %v1650_v20 = vsel %vm742_vm5, %v1618_v15, %v1628_v16  ;;  %2136 = vmatprep.subr.bf16.mxu1 %v3926_v38  ;;  %v1642_v2 = vsel %vm742_vm5, %v1638_v26, %v1618_v15 }
 0x360   : > { %1986 = vmatmul.mubr.bf16.vlgmr.msra.gmra.mxu0 %v1650_v20 }
 0x361   : > { %1851 = vmatmul.mubr.bf16.gmra.mxu1 %v1612_v45  ;;  %3326 = vmatprep.mubr.msk.bf16.mxu0 %vm508_vm2, %v4842_v51 }
 0x362   : > { %2137 = vmatpush1.bf16.msra.mxu1 %v3763_v18  ;;  %3312 = vmatprep.mubr.msk.bf16.mxu1 %vm508_vm2, %v4884_v37  ;;  %v3767_v37 = vld [vmem:[%s4339_s0 + $0x220] sm:$0xff]  }
 0x363   : > { %2146 = vmatprep.subr.bf16.mxu1 %v3926_v38 }
 0x366   : > { %2147 = vmatpush2.bf16.msra.mxu1 %v3764_v5 }
 0x367   : > { %2148 = vmatprep.subr.bf16.mxu1 %v3926_v38 }
 0x368   : > { %1994 = vmatmul.mubr.bf16.gmra.mxu0 %v4932_v27 }
 0x369   : > { %1859 = vmatmul.mubr.bf16.gmra.mxu1 %v1614_v11  ;;  %3327 = vmatprep.mubr.msk.bf16.mxu0 %vm508_vm2, %v4909_v44 }
 0x36a   : > { %2149 = vmatpush2.bf16.msra.mxu1 %v3765_v0  ;;  %3366 = vmatprep.mubr.msk.bf16.mxu1 %vm508_vm2, %v4842_v51 }
 0x36b   : > { %2150 = vmatprep.subr.bf16.mxu1 %v3926_v38 }
 0x36e   : > { %2151 = vmatpush2.bf16.msra.mxu1 %v3766_v46 }
 0x36f   : > { %2152 = vmatprep.subr.bf16.mxu1 %v3926_v38 }
 0x370   : > { %2002 = vmatmul.mubr.bf16.gmra.mxu0 %v1635_v8 }
 0x371   : > { %3328 = vmatprep.mubr.msk.bf16.mxu0 %vm508_vm2, %v4914_v59 }
 0x372   : > { %2153 = vmatpush2.bf16.msra.mxu1 %v3767_v37 }
 0x375   : > { %2155 = vmatmul.mubr.bf16.vlgmr.msra.gmra.mxu1 %v4932_v27 }
 0x376   : > { %3367 = vmatprep.mubr.msk.bf16.mxu1 %vm508_vm2, %v4909_v44 }
 0x378   : > { %2010 = vmatmul.mubr.bf16.gmra.mxu0 %v1639_v35 }
 0x379   : > { %3329 = vmatprep.mubr.msk.bf16.mxu0 %vm508_vm2, %v4917_v32 }
 0x37d   : > { %2163 = vmatmul.mubr.bf16.gmra.mxu1 %v1635_v8 }
 0x37e   : > { %3368 = vmatprep.mubr.msk.bf16.mxu1 %vm508_vm2, %v4914_v59 }
 0x380   : > { %2018 = vmatmul.mubr.bf16.gmra.mxu0 %v1642_v2 }
 0x385   : > { %2171 = vmatmul.mubr.bf16.gmra.mxu1 %v1639_v35 }
 0x386   : > { %3369 = vmatprep.mubr.msk.bf16.mxu1 %vm508_vm2, %v4917_v32 }
 0x38d   : > { %2179 = vmatmul.mubr.bf16.gmra.mxu1 %v1642_v2 }
 0x38e   : > { %3370 = vmatprep.mubr.msk.bf16.mxu1 %vm508_vm2, %v4904_v58 }
 0x395   : > { %2187 = vmatmul.mubr.bf16.gmra.mxu1 %v1650_v20 }
 0x405   : > { %v1828_v38 = vpop.f32.mrf.mxu1 }
 0x407   : > { %v1830_v51 = vpop.f32.mrf.mxu1 }
 0x409   : > { %v1831_v44 = vpop.f32.mrf.mxu1 }
 0x40b   : > { %v1833_v36 = vpop.f32.mrf.mxu1 }
 0x40d   : > { %v1836_v3 = vpop.f32.mrf.mxu1 }
 0x40f   : > { %v1838_v31 = vpop.f32.mrf.mxu1 }
 0x411   : > { %v1839_v6 = vpop.f32.mrf.mxu1 }
 0x413   : > { %v1841_v57 = vpop.f32.mrf.mxu1 }
 0x419   : > { %v1844_v14 = vpop.f32.mrf.mxu1 }
 0x41b   : > { %v1846_v59 = vpop.f32.mrf.mxu1 }
 0x41d   : > { %v4991_v12 = vpop.f32.mrf.mxu1 }
 0x41f   : > { %v1849_v13 = vpop.f32.mrf.mxu1 }
 0x420   : > { %v1987_v7 = vpop.f32.mrf.mxu0 }
 0x421   : > { %v4993_v32 = vpop.f32.mrf.mxu1  ;;  %v1988_v63 = vadd.f32 %v1987_v7, %v1828_v38 }
 0x422   : > { %v1989_v24 = vpop.f32.mrf.mxu0 }
 0x423   : > { %v1854_v16 = vpop.f32.mrf.mxu1 }
 0x424   : > { %v1990_v58 = vpop.f32.mrf.mxu0 }
 0x425   : > { %v4995_v47 = vpop.f32.mrf.mxu1  ;;  %v1991_v19 = vadd.f32 %v1990_v58, %v1831_v44 }
 0x426   : > { %v1992_v27 = vpop.f32.mrf.mxu0 }
 0x427   : > { %v1857_v42 = vpop.f32.mrf.mxu1 }
 0x428   : > { %v1995_v62 = vpop.f32.mrf.mxu0 }
 0x429   : > { %v4997_v49 = vpop.f32.mrf.mxu1  ;;  %v1996_v11 = vadd.f32 %v1995_v62, %v1836_v3 }
 0x42a   : > { %v1997_v29 = vpop.f32.mrf.mxu0 }
 0x42b   : > { %v1862_v23 = vpop.f32.mrf.mxu1 }
 0x42c   : > { %v1998_v60 = vpop.f32.mrf.mxu0 }
 0x42d   : > { %v4999_v40 = vpop.f32.mrf.mxu1  ;;  %v1999_v37 = vadd.f32 %v1998_v60, %v1839_v6 }
 0x42e   : > { %v2000_v21 = vpop.f32.mrf.mxu0 }
 0x42f   : > { %v1865_v39 = vpop.f32.mrf.mxu1 }
 0x430   : > { %v2003_v50 = vpop.f32.mrf.mxu0 }
 0x431   : > { %v2004_v13 = vadd.f32 %v2003_v50, %v1844_v14 }
 0x432   : > { %v2005_v28 = vpop.f32.mrf.mxu0 }
 0x434   : > { %v2006_v30 = vpop.f32.mrf.mxu0 }
 0x435   : > { %v2156_v33 = vpop.f32.mrf.mxu1 }
 0x436   : > { %v5001_v45 = vadd.f32 %v2156_v33, %v1988_v63  ;;  %v2008_v61 = vpop.f32.mrf.mxu0  ;;  %v2007_v63 = vadd.f32 %v2006_v30, %v4991_v12 }
 0x437   : > { %v2158_v54 = vpop.f32.mrf.mxu1 }
 0x438   : > { %v2011_v48 = vpop.f32.mrf.mxu0  ;;  %v2209_v17 = vmul.f32 %v5001_v45, %v4143_v55 }
 0x439   : > { %v2159_v26 = vpop.f32.mrf.mxu1  ;;  %v2012_v28 = vadd.f32 %v2011_v48, %v4993_v32 }
 0x43a   : > { %v5005_v34 = vadd.f32 %v2159_v26, %v1991_v19  ;;  %v2013_v25 = vpop.f32.mrf.mxu0  ;;  %v2219_v18 = vsel %vm508_vm2, %v2209_v17, 0.0 }
 0x43b   : > { %v2161_v22 = vpop.f32.mrf.mxu1 }
 0x43c   : > { %v2210_v8 = vmul.f32 %v5005_v34, %v4161_v10  ;;  %v2014_v35 = vpop.f32.mrf.mxu0 }
 0x43d   : > { %v2164_v15 = vpop.f32.mrf.mxu1  ;;  %v2015_v19 = vadd.f32 %v2014_v35, %v4995_v47 }
 0x43e   : > { %v2220_v20 = vsel %vm508_vm2, %v2210_v8, 0.0  ;;  %v2197_v2 = vadd.f32 %v2164_v15, %v1996_v11  ;;  %v2016_v5 = vpop.f32.mrf.mxu0 }
 0x43f   : > { %v2221_v0 = vadd.f32 %v2220_v20, %v2219_v18  ;;  %v2166_v46 = vpop.f32.mrf.mxu1 }
 0x440   : > { %v2211_v38 = vmul.f32 %v2197_v2, %v4189_v53  ;;  %v2019_v51 = vpop.f32.mrf.mxu0 }
 0x441   : > { %v2167_v44 = vpop.f32.mrf.mxu1  ;;  %v2020_v8 = vadd.f32 %v2019_v51, %v4997_v49 }
 0x442   : > { %v2222_v36 = vsel %vm508_vm2, %v2211_v38, 0.0  ;;  %v2198_v3 = vadd.f32 %v2167_v44, %v1999_v37  ;;  %v2021_v31 = vpop.f32.mrf.mxu0 }
 0x443   : > { %v2223_v57 = vadd.f32 %v2222_v36, %v2221_v0  ;;  %v2169_v59 = vpop.f32.mrf.mxu1 }
 0x444   : > { %v2212_v7 = vmul.f32 %v2198_v3, %v4213_v41  ;;  %v2022_v24 = vpop.f32.mrf.mxu0 }
 0x445   : > { %v2172_v16 = vpop.f32.mrf.mxu1  ;;  %v2023_v0 = vadd.f32 %v2022_v24, %v4999_v40 }
 0x446   : > { %v2224_v58 = vsel %vm508_vm2, %v2212_v7, 0.0  ;;  %v2199_v27 = vadd.f32 %v2172_v16, %v2004_v13  ;;  %v2024_v42 = vpop.f32.mrf.mxu0 }
 0x447   : > { %v2225_v6 = vadd.f32 %v2224_v58, %v2223_v57  ;;  %v2174_v62 = vpop.f32.mrf.mxu1 }
 0x448   : > { %v2213_v29 = vmul.f32 %v2199_v27, %v4180_v43 }
 0x449   : > { %v2175_v23 = vpop.f32.mrf.mxu1 }
 0x44a   : > { %v2226_v60 = vsel %vm508_vm2, %v2213_v29, 0.0  ;;  %v5022_v17 = vadd.f32 %v2175_v23, %v2007_v63 }
 0x44b   : > { %v2227_v21 = vadd.f32 %v2226_v60, %v2225_v6  ;;  %v2177_v39 = vpop.f32.mrf.mxu1 }
 0x44c   : > { %v2214_v30 = vmul.f32 %v5022_v17, %v4208_v4 }
 0x44d   : > { %v2228_v14 = vrot.slane %v2227_v21, 4  ;;  %v2180_v50 = vpop.f32.mrf.mxu1 }
 0x44e   : > { %v5019_v61 = vadd.f32 %v2180_v50, %v2012_v28  ;;  %v2234_v49 = vsel %vm508_vm2, %v2214_v30, 0.0 }
 0x44f   : > { %v2229_v33 = vadd.f32 %v2228_v14, %v2227_v21  ;;  %v2182_v54 = vpop.f32.mrf.mxu1 }
 0x450   : > { %v2215_v32 = vmul.f32 %v5019_v61, %v4244_v52 }
 0x451   : > { %v2230_v26 = vrot.slane %v2229_v33, 2  ;;  %v2183_v25 = vpop.f32.mrf.mxu1 }
 0x452   : > { %v5024_v22 = vadd.f32 %v2183_v25, %v2015_v19  ;;  %v2235_v20 = vsel %vm508_vm2, %v2215_v32, 0.0 }
 0x453   : > { %v2231_v11 = vadd.f32 %v2230_v26, %v2229_v33  ;;  %v2185_v48 = vpop.f32.mrf.mxu1  ;;  %v2236_v44 = vadd.f32 %v2235_v20, %v2234_v49 }
 0x454   : > { %v2216_v47 = vmul.f32 %v5024_v22, %v4262_v1 }
 0x455   : > { %v2232_v12 = vrot.slane %v2231_v11, 1  ;;  %v2188_v35 = vpop.f32.mrf.mxu1 }
 0x456   : > { %v2203_v15 = vadd.f32 %v2188_v35, %v2020_v8  ;;  %v2237_v38 = vsel %vm508_vm2, %v2216_v47, 0.0 }
 0x457   : > { %v2233_v18 = vadd.f32 %v2232_v12, %v2231_v11  ;;  %v2190_v5 = vpop.f32.mrf.mxu1  ;;  %v2238_v16 = vadd.f32 %v2237_v38, %v2236_v44 }
 0x458   : > { %v2217_v46 = vmul.f32 %v2203_v15, %v4229_v56 }
 0x459   : > { %v2249_v37 = vmul.f32 0.11111111, %v2233_v18  ;;  %v2191_v51 = vpop.f32.mrf.mxu1 }
 0x45a   : > { %v2239_v36 = vsel %vm508_vm2, %v2217_v46, 0.0  ;;  %v2204_v31 = vadd.f32 %v2191_v51, %v2023_v0 }
 0x45b   : > { %v5040_v57 = vsub.f32 %v5001_v45, %v2249_v37  ;;  %v5043_v59 = vsub.f32 %v5005_v34, %v2249_v37  ;;  %v5045_v13 = vsub.f32 %v2197_v2, %v2249_v37  ;;  %v5047_v40 = vsub.f32 %v2198_v3, %v2249_v37  ;;  %v2193_v7 = vpop.f32.mrf.mxu1 }
 0x45c   : > { %v5049_v24 = vsub.f32 %v2199_v27, %v2249_v37  ;;  %v2218_v58 = vmul.f32 %v2204_v31, %v4255_v9  ;;  %v2240_v3 = vadd.f32 %v2239_v36, %v2238_v16 }
 0x45d   : > { %v2261_v42 = vmul.f32 %v5040_v57, %v5040_v57  ;;  %v2262_v45 = vmul.f32 %v5043_v59, %v5043_v59  ;;  %v2263_v34 = vmul.f32 %v5045_v13, %v5045_v13  ;;  %v2264_v2 = vmul.f32 %v5047_v40, %v5047_v40 }
 0x45e   : > { %v2241_v6 = vsel %vm508_vm2, %v2218_v58, 0.0  ;;  %v2265_v27 = vmul.f32 %v5049_v24, %v5049_v24 }
 0x45f   : > { %v2271_v62 = vmul.f32 %v2261_v42, %v4143_v55  ;;  %v2272_v29 = vmul.f32 %v2262_v45, %v4161_v10  ;;  %v2273_v23 = vmul.f32 %v2263_v34, %v4189_v53  ;;  %v2242_v60 = vadd.f32 %v2241_v6, %v2240_v3 }
 0x460   : > { %v2274_v21 = vmul.f32 %v2264_v2, %v4213_v41  ;;  %v2275_v63 = vmul.f32 %v2265_v27, %v4180_v43 }
 0x461   : > { %v2281_v39 = vsel %vm508_vm2, %v2271_v62, 0.0  ;;  %v2282_v28 = vsel %vm508_vm2, %v2272_v29, 0.0  ;;  %v2243_v50 = vrot.slane %v2242_v60, 4  ;;  %v2284_v33 = vsel %vm508_vm2, %v2273_v23, 0.0 }
 0x462   : > { %v2283_v14 = vadd.f32 %v2282_v28, %v2281_v39  ;;  %v2286_v26 = vsel %vm508_vm2, %v2274_v21, 0.0  ;;  %v2288_v32 = vsel %vm508_vm2, %v2275_v63, 0.0 }
 0x463   : > { %v2244_v19 = vadd.f32 %v2243_v50, %v2242_v60 }
 0x464   : > { %v2285_v54 = vadd.f32 %v2284_v33, %v2283_v14  ;;  %v3375_v33 = vld [vmem:[%s4750_s15 + $0x1] ss:$0 sm:$0xff] }
 0x465   : > { %v2245_v11 = vrot.slane %v2244_v19, 2 }
 0x466   : > { %v2287_v25 = vadd.f32 %v2286_v26, %v2285_v54 }
 0x467   : > { %v2246_v8 = vadd.f32 %v2245_v11, %v2244_v19 }
 0x468   : > { %v2289_v48 = vadd.f32 %v2288_v32, %v2287_v25  ;;  %v3376_v32 = vld [vmem:[%s4755_s18 + $0x1] ss:$0 sm:$0xff] }
 0x469   : > { %v2247_v30 = vrot.slane %v2246_v8, 1 }
 0x46a   : > { %v2290_v12 = vrot.slane %v2289_v48, 4 }
 0x46b   : > { %v2248_v35 = vadd.f32 %v2247_v30, %v2246_v8 }
 0x46c   : > { %v2291_v47 = vadd.f32 %v2290_v12, %v2289_v48 }
 0x46d   : > { %v2250_v20 = vmul.f32 0.11111111, %v2248_v35 }
 0x46e   : > { %v2292_v18 = vrot.slane %v2291_v47, 2 }
 0x46f   : > { %v2256_v0 = vsub.f32 %v5022_v17, %v2250_v20  ;;  %v2257_v46 = vsub.f32 %v5019_v61, %v2250_v20  ;;  %v2258_v37 = vsub.f32 %v5024_v22, %v2250_v20  ;;  %v2259_v49 = vsub.f32 %v2203_v15, %v2250_v20 }
 0x470   : > { %v2293_v5 = vadd.f32 %v2292_v18, %v2291_v47  ;;  %v2260_v38 = vsub.f32 %v2204_v31, %v2250_v20 }
 0x471   : > { %v2266_v44 = vmul.f32 %v2256_v0, %v2256_v0  ;;  %v2267_v36 = vmul.f32 %v2257_v46, %v2257_v46  ;;  %v2268_v7 = vmul.f32 %v2258_v37, %v2258_v37  ;;  %v2269_v16 = vmul.f32 %v2259_v49, %v2259_v49 }
 0x472   : > { %v2294_v51 = vrot.slane %v2293_v5, 1  ;;  %v2270_v58 = vmul.f32 %v2260_v38, %v2260_v38 }
 0x473   : > { %v2276_v45 = vmul.f32 %v2266_v44, %v4208_v4  ;;  %v2277_v34 = vmul.f32 %v2267_v36, %v4244_v52  ;;  %v2278_v2 = vmul.f32 %v2268_v7, %v4262_v1  ;;  %v2279_v61 = vmul.f32 %v2269_v16, %v4229_v56 }
 0x474   : > { %v2295_v42 = vadd.f32 %v2294_v51, %v2293_v5  ;;  %v2280_v6 = vmul.f32 %v2270_v58, %v4255_v9 }
 0x475   : > { %v2296_v22 = vsel %vm508_vm2, %v2276_v45, 0.0  ;;  %v2297_v15 = vsel %vm508_vm2, %v2277_v34, 0.0  ;;  %v2299_v27 = vsel %vm508_vm2, %v2278_v2, 0.0  ;;  %v2301_v29 = vsel %vm508_vm2, %v2279_v61, 0.0 }
 0x476   : > { %v2311_v17 = vmul.f32 0.11111111, %v2295_v42  ;;  %v2298_v31 = vadd.f32 %v2297_v15, %v2296_v22  ;;  %v2303_v60 = vsel %vm508_vm2, %v2280_v6, 0.0 }
 0x478   : > { %v2313_v3 = vadd.f32 1e-05, %v2311_v17  ;;  %v2300_v62 = vadd.f32 %v2299_v27, %v2298_v31 }
 0x47a   : > { %3772 = vrsqrt.f32 %v2313_v3  ;;  %v2302_v23 = vadd.f32 %v2301_v29, %v2300_v62 }
 0x47c   : > { %v2304_v21 = vadd.f32 %v2303_v60, %v2302_v23 }
 0x47e   : > { %v2305_v39 = vrot.slane %v2304_v21, 4 }
 0x480   : > { %v2306_v28 = vadd.f32 %v2305_v39, %v2304_v21 }
 0x482   : > { %v2307_v14 = vrot.slane %v2306_v28, 2 }
 0x484   : > { %v2308_v50 = vadd.f32 %v2307_v14, %v2306_v28  ;;  %v3801_v14 = vld [vmem:[%s5474_s6 + $0x98] sm:$0xff] (%p591_p0)  }
 0x486   : > { %v2309_v54 = vrot.slane %v2308_v50, 1 }
 0x487   : > { %v3773_v63 = vpop.eup %3772 }
 0x488   : > { %v2317_v19 = vmul.f32 %v3773_v63, %v5040_v57  ;;  %v2318_v26 = vmul.f32 %v3773_v63, %v5043_v59  ;;  %v2319_v25 = vmul.f32 %v3773_v63, %v5045_v13  ;;  %v2320_v11 = vmul.f32 %v3773_v63, %v5047_v40 }
 0x489   : > { %v2321_v48 = vmul.f32 %v3773_v63, %v5049_v24  ;;  %v2310_v8 = vadd.f32 %v2309_v54, %v2308_v50 }
 0x48a   : > { %v2333_v12 = vmul.f32 %v3375_v33, %v2317_v19  ;;  %v2334_v30 = vmul.f32 %v3375_v33, %v2318_v26  ;;  %v2335_v47 = vmul.f32 %v3375_v33, %v2319_v25  ;;  %v2336_v35 = vmul.f32 %v3375_v33, %v2320_v11  ;;  %v3806_v26 = vld [vmem:[%s5474_s6 + $0x80] sm:$0xff] (%p591_p0)  }
 0x48b   : > { %v2337_v18 = vmul.f32 %v3375_v33, %v2321_v48  ;;  %v2312_v20 = vmul.f32 0.11111111, %v2310_v8  ;;  %v3809_v11 = vld [vmem:[%s5474_s6 + $0x20] sm:$0xff] (%p591_p0)  }
 0x48c   : > { %v2349_v5 = vadd.f32 %v3376_v32, %v2333_v12  ;;  %v2350_v51 = vadd.f32 %v3376_v32, %v2334_v30  ;;  %v2351_v44 = vadd.f32 %v3376_v32, %v2335_v47  ;;  %v2352_v57 = vadd.f32 %v3376_v32, %v2336_v35  ;;  %v3808_v35 = vld [vmem:[%s5474_s6 + $0x78] sm:$0xff] (%p591_p0)  }
 0x48d   : > { %v2353_v36 = vadd.f32 %v3376_v32, %v2337_v18  ;;  %v2314_v59 = vadd.f32 1e-05, %v2312_v20  ;;  %v3811_v20 = vld [vmem:[%s5474_s6 + $0x18] sm:$0xff] (%p591_p0)  }
 0x48e   : > { %v5094_v17 = vmul.f32 %v2349_v5, %v4143_v55   ;;  %v5097_v40 = vmul.f32 %v2350_v51, %v4161_v10   ;;  %v5100_v16 = vmul.f32 %v2351_v44, %v4189_v53   ;;  %v3803_v55 = vld [vmem:[%s5474_s6 + $0x38] sm:$0xff] (%p591_p0)   ;;  %v3802_v10 = vld [vmem:[%s5474_s6 + $0x90] sm:$0xff] (%p591_p0)  }
 0x48f   : > { %v5106_v42 = vmul.f32 %v2353_v36, %v4180_v43   ;;  %3774 = vrsqrt.f32 %v2314_v59  ;;  %v3805_v43 = vld [vmem:[%s5474_s6 + $0x30] sm:$0xff] (%p591_p0)  }
 0x490   : > { %v5480_v13 = vmov %v5094_v17  ;;  %v5481_v7 = vmov %v5097_v40  ;;  %v5482_v24 = vmov %v5100_v16  ;;  %v5103_v40 = vmul.f32 %v2352_v57, %v4213_v41  }
 0x491   : > { %v5494_v59 = vmov %v5106_v42  ;;  %v5497_v36 = vmov %v5481_v7  ;;  %v3776_v28 = vpack.i.bf16 (%p591_p0), %v5481_v7, %v5480_v13  ;;  %v2413_v41 = vrot.slane (%p591_p0), %v5481_v7, 1 }
 0x492   : > { %v5483_v58 = vmov %v5103_v40  ;;  %v2419_v47 = vrot.slane (%p591_p0), %v5106_v42, 1  ;;  %v3810_v36 = vld [vmem:[%s5474_s6 + $0x70] sm:$0xff] (%p591_p0)  }
 0x493   : > { %v5495_v40 = vmov %v5483_v58  ;;  %3777 = vrot.lane.b32.xlu0 (%p591_p0), %v3776_v28, %s3927_s20  ;;  %v2417_v8 = vrot.slane (%p591_p0), %v5483_v58, 1  ;;  %v3823_v28 = vld [vmem:[%s5474_s6 + $0x48] sm:$0xff] (%p591_p0)  }
 0x494   :  { %v3813_v40 = vld [vmem:[%s5474_s6 + $0x10] sm:$0xff] (%p591_p0)  }
 0x495   :  { %v2420_v51 = vsel (%p591_p0), %vm648_vm4, %v2417_v8, %v2419_v47 }
 0x49c   : > { %v3775_v45 = vpop.eup %3774 }
 0x49d   : > { %v2322_v34 = vmul.f32 %v3775_v45, %v2256_v0  ;;  %v2323_v2 = vmul.f32 %v3775_v45, %v2257_v46  ;;  %v2324_v61 = vmul.f32 %v3775_v45, %v2258_v37  ;;  %v2325_v22 = vmul.f32 %v3775_v45, %v2259_v49 }
 0x49e   : > { %v2326_v15 = vmul.f32 %v3775_v45, %v2260_v38  ;;  %v3786_v38 = vpack.i.bf16 (%p591_p0), %v5483_v58, %v5482_v24 }
 0x49f   : > { %v2338_v17 = vmul.f32 %v3375_v33, %v2322_v34  ;;  %v2339_v31 = vmul.f32 %v3375_v33, %v2323_v2  ;;  %v2340_v3 = vmul.f32 %v3375_v33, %v2324_v61  ;;  %v2341_v6 = vmul.f32 %v3375_v33, %v2325_v22  ;;  %v3812_v61 = vld [vmem:[%s5474_s6 + $0x68] sm:$0xff] (%p591_p0)  }
 0x4a0   : > { %v2342_v27 = vmul.f32 %v3375_v33, %v2326_v15  ;;  %3787 = vrot.lane.b32.xlu1 (%p591_p0), %v3786_v38, %s3927_s20  ;;  %v3928_v33 = vmov (%p591_p0), 0   ;;  %v3820_v38 = vld [vmem:[%s5474_s6 + $0xa8] sm:$0xff] (%p591_p0)  }
 0x4a1   : > { %v2354_v62 = vadd.f32 %v3376_v32, %v2338_v17  ;;  %v2355_v16 = vadd.f32 %v3376_v32, %v2339_v31  ;;  %v2356_v29 = vadd.f32 %v3376_v32, %v2340_v3  ;;  %v2357_v23 = vadd.f32 %v3376_v32, %v2341_v6  ;;  %2669 = vmatprep.subr.bf16.mxu0 (%p591_p0), %v3928_v33  ;;  %v3817_v6 = vld [vmem:[%s5474_s6] sm:$0xff] (%p591_p0)  }
 0x4a2   : > { %v2358_v60 = vadd.f32 %v3376_v32, %v2342_v27  ;;  %v5498_v17 = vmov %v5480_v13  ;;  %2822 = vmatprep.subr.bf16.mxu1 (%p591_p0), %v3928_v33  ;;  %2670 = vmatpush1.bf16.msra.mxu0 (%p591_p0), %v3801_v14  ;;  %v3822_v14 = vld [vmem:[%s5474_s6 + $0xa0] sm:$0xff] (%p591_p0)  }
 0x4a3   : > { %v5109_v39 = vmul.f32 %v2354_v62, %v4208_v4   ;;  %v5112_v62 = vmul.f32 %v2355_v16, %v4244_v52   ;;  %v5115_v3 = vmul.f32 %v2356_v29, %v4262_v1   ;;  %v5118_v25 = vmul.f32 %v2357_v23, %v4229_v56   ;;  %593 = sbr.rel (!%p591_p0) target bundleno = 259 (0x103), region = 69  ;;  %2671 = vmatprep.subr.bf16.mxu0 (%p591_p0), %v3928_v33  ;;  %v3804_v56 = vld [vmem:[%s5474_s6 + $0x88] sm:$0xff] (%p591_p0)   ;;  %v3819_v29 = vld [vmem:[%s5474_s6 + $0x58] sm:$0xff] (%p591_p0)   ;;  %v3818_v23 = vld [vmem:[%s5474_s6 + $0xb0] sm:$0xff] (%p591_p0)  }
 0x4a4   : > { %v5121_v32 = vmul.f32 %v2358_v60, %v4255_v9   ;;  %v5496_v16 = vmov %v5482_v24  ;;  %2823 = vmatpush1.bf16.msra.mxu1 (%p591_p0), %v3803_v55  ;;  %v2412_v4 = vrot.slane (%p591_p0), %v5480_v13, 1  ;;  %v2415_v52 = vrot.slane (%p591_p0), %v5482_v24, 1  ;;  %v3807_v9 = vld [vmem:[%s5474_s6 + $0x28] sm:$0xff] (%p591_p0)   ;;  %v3821_v60 = vld [vmem:[%s5474_s6 + $0x50] sm:$0xff] (%p591_p0)  }
 0x4a5   : > { %v5484_v21 = vmov %v5109_v39  ;;  %v5485_v0 = vmov %v5112_v62  ;;  %v5486_v46 = vmov %v5115_v3  ;;  %v5487_v37 = vmov %v5118_v25  ;;  %2824 = vmatprep.subr.bf16.mxu1 (%p591_p0), %v3928_v33  ;;  %v3815_v17 = vld [vmem:[%s5474_s6 + $0x8] sm:$0xff] (%p591_p0)   ;;  %v3816_v16 = vld [vmem:[%s5474_s6 + $0xb8] sm:$0xff] (%p591_p0)  }
 0x4a6   : > { %v5488_v49 = vmov %v5121_v32  ;;  %v5490_v25 = vmov %v5487_v37  ;;  %v5491_v3 = vmov %v5486_v46  ;;  %v5492_v62 = vmov %v5485_v0  ;;  %2672 = vmatpush1.bf16.msra.mxu0 (%p591_p0), %v3802_v10 }
 0x4a7   : > { %v5489_v32 = vmov %v5488_v49  ;;  %v5493_v39 = vmov %v5484_v21  ;;  %v3781_v50 = vpack.i.bf16 (%p591_p0), %v5488_v49, %v5487_v37  ;;  %v3791_v63 = vpack.i.bf16 (%p591_p0), %v5484_v21, %v5106_v42  ;;  %2673 = vmatprep.subr.bf16.mxu0 (%p591_p0), %v3928_v33  ;;  %v3814_v3 = vld [vmem:[%s5474_s6 + $0x60] sm:$0xff] (%p591_p0)  }
 0x4a8   :  { %v3796_v53 = vpack.i.bf16 %v5486_v46, %v5485_v0  ;;  %2825 = vmatpush1.bf16.msra.mxu1 %v3805_v43  ;;  %v2414_v1 = vsel %vm648_vm4, %v2412_v4, %v2413_v41  ;;  %v2416_v39 = vsel %vm648_vm4, %v2413_v41, %v2415_v52  ;;  %v2427_v19 = vrot.slane %v5487_v37, 1 }
 0x4a9   :  { %3782 = vrot.lane.b32.xlu0 %v3781_v50, %s3927_s20  ;;  %3792 = vrot.lane.b32.xlu1 %v3791_v63, %s3927_s20  ;;  %v2484_v54 = vpack.c.bf16 %v2416_v39, %v2414_v1  ;;  %v2429_v25 = vrot.slane %v5488_v49, 1  ;;  %v2418_v18 = vsel %vm648_vm4, %v2415_v52, %v2417_v8  ;;  %v2425_v45 = vrot.slane %v5486_v46, 1  ;;  %v3825_v50 = vld [vmem:[%s5474_s6 + $0x40] sm:$0xff]  }
 0x4aa   :  { %2826 = vmatprep.subr.bf16.mxu1 %v3928_v33  ;;  %2674 = vmatpush1.bf16.msra.mxu0 %v3804_v56  ;;  %v5225_v44 = vpack.c.bf16 %v2420_v51, %v2418_v18  ;;  %v2423_v2 = vrot.slane %v5485_v0, 1  ;;  %v2383_v63 = vrot.slane %v5481_v7, 7  ;;  %v2370_v55 = vrot.slane %v5488_v49, 7 }
 0x4ab   :  { %2675 = vmatprep.subr.bf16.mxu0 %v3928_v33  ;;  %3389 = vmatprep.mubr.msk.bf16.mxu0 %vm508_vm2, %v2484_v54  ;;  %v2430_v32 = vsel %vm648_vm4, %v2427_v19, %v2429_v25  ;;  %v2442_v48 = vsel %vm648_vm4, %v2429_v25, %v2412_v4  ;;  %v2507_v30 = vrot.slane %v2484_v54, 4  ;;  %v2428_v15 = vsel %vm648_vm4, %v2425_v45, %v2427_v19  ;;  %v3824_v54 = vld [vmem:[%s5474_s6 + $0xf8] sm:$0xff]  }
 0x4ac   :  { %2827 = vmatpush1.bf16.msra.mxu1 %v3807_v9  ;;  %v5209_v12 = vpack.c.bf16 %v2442_v48, %v2430_v32  ;;  %v2510_v59 = vrot.slane %v5225_v44, 4  ;;  %v2426_v22 = vsel %vm648_vm4, %v2423_v2, %v2425_v45  ;;  %v2382_v10 = vrot.slane %v5480_v13, 7 }
 0x4ad   :  { %3797 = vrot.lane.b32.xlu0 %v3796_v53, %s3927_s20  ;;  %2828 = vmatprep.subr.bf16.mxu1 %v3928_v33  ;;  %v5260_v31 = vpack.c.bf16 %v2428_v15, %v2426_v22  ;;  %v2395_v41 = vrot.slane %v5486_v46, 7  ;;  %v2397_v56 = vrot.slane %v5487_v37, 7  ;;  %v2385_v39 = vrot.slane %v5482_v24, 7 }
 0x4ae   :  { %2676 = vmatpush1.bf16.msra.mxu0 %v3806_v26  ;;  %v2496_v5 = vrot.slane %v5209_v12, 4  ;;  %v5245_v34 = vsel %vm742_vm5, %v2507_v30, %v2510_v59  ;;  %v2384_v53 = vsel %vm618_vm3, %v2382_v10, %v2383_v63  ;;  %v2410_v4 = vsel %vm618_vm3, %v2370_v55, %v2382_v10 }
 0x4af   :  { %2677 = vmatprep.subr.bf16.mxu0 %v3928_v33  ;;  %v2518_v27 = vrot.slane %v5260_v31, 4  ;;  %v2387_v7 = vrot.slane %v5483_v58, 7  ;;  %v2398_v37 = vsel %vm618_vm3, %v2395_v41, %v2397_v56  ;;  %v2399_v26 = vsel %vm618_vm3, %v2397_v56, %v2370_v55 }
 0x4b0   :  { %2829 = vmatpush1.bf16.msra.mxu1 %v3809_v11  ;;  %v5228_v57 = vsel %vm742_vm5, %v2496_v5, %v2507_v30  ;;  %v2386_v48 = vsel %vm618_vm3, %v2383_v63, %v2385_v39  ;;  %v2421_v30 = vrot.slane %v5484_v21, 1  ;;  %v2393_v55 = vrot.slane %v5485_v0, 7 }
 0x4b1   :  { %2830 = vmatprep.subr.bf16.mxu1 %v3928_v33  ;;  %3406 = vmatprep.mubr.msk.bf16.mxu1 %vm508_vm2, %v5228_v57  ;;  %v5274_v62 = vsel %vm742_vm5, %v2518_v27, %v2496_v5  ;;  %v2388_v8 = vsel %vm618_vm3, %v2385_v39, %v2387_v7 }
 0x4b2   :  { %2678 = vmatpush1.bf16.msra.mxu0 %v3808_v35 }
 0x4b3   :  { %2679 = vmatprep.subr.bf16.mxu0 %v3928_v33 }
 0x4b4   :  { %2831 = vmatpush1.bf16.msra.mxu1 %v3811_v20  ;;  %v3826_v20 = vld [vmem:[%s5474_s6 + $0xf0] sm:$0xff]  }
 0x4b5   :  { %2832 = vmatprep.subr.bf16.mxu1 %v3928_v33 }
 0x4b6   :  { %2680 = vmatpush1.bf16.msra.mxu0 %v3810_v36  ;;  %v2389_v36 = vrot.slane %v5106_v42, 7 }
 0x4b7   :  { %2681 = vmatprep.subr.bf16.mxu0 %v3928_v33 }
 0x4b8   :  { %2833 = vmatpush1.bf16.msra.mxu1 %v3813_v40 }
 0x4b9   :  { %2834 = vmatprep.subr.bf16.mxu1 %v3928_v33 }
 0x4ba   :  { %2682 = vmatpush1.bf16.msra.mxu0 %v3812_v61  ;;  %v2391_v61 = vrot.slane %v5484_v21, 7 }
 0x4bb   :  { %2683 = vmatprep.subr.bf16.mxu0 %v3928_v33 }
 0x4bc   :  { %2835 = vmatpush1.bf16.msra.mxu1 %v3815_v17  ;;  %v2422_v17 = vsel %vm648_vm4, %v2419_v47, %v2421_v30  ;;  %v2390_v47 = vsel %vm618_vm3, %v2387_v7, %v2389_v36 }
 0x4bd   :  { %2836 = vmatprep.subr.bf16.mxu1 %v3928_v33 }
 0x4be   :  { %2684 = vmatpush1.bf16.msra.mxu0 %v3814_v3  ;;  %v2424_v3 = vsel %vm648_vm4, %v2421_v30, %v2423_v2 }
 0x4bf   :  { %2693 = vmatprep.subr.bf16.mxu0 %v3928_v33  ;;  %v2488_v2 = vpack.c.bf16 %v2424_v3, %v2422_v17 }
 0x4c0   :  { %2837 = vmatpush1.bf16.msra.mxu1 %v3817_v6  ;;  %v3827_v6 = vld [vmem:[%s5474_s6 + $0xe8] sm:$0xff]  }
 0x4c1   :  { %2846 = vmatprep.subr.bf16.mxu1 %v3928_v33 }
 0x4c2   :  { %2694 = vmatpush2.bf16.msra.mxu0 %v3816_v16 }
 0x4c3   :  { %2695 = vmatprep.subr.bf16.mxu0 %v3928_v33 }
 0x4c4   :  { %2847 = vmatpush2.bf16.msra.mxu1 %v3819_v29 }
 0x4c5   :  { %2848 = vmatprep.subr.bf16.mxu1 %v3928_v33 }
 0x4c6   :  { %2696 = vmatpush2.bf16.msra.mxu0 %v3818_v23  ;;  %v2392_v23 = vsel %vm618_vm3, %v2389_v36, %v2391_v61 }
 0x4c7   :  { %2697 = vmatprep.subr.bf16.mxu0 %v3928_v33 }
 0x4c8   :  { %2849 = vmatpush2.bf16.msra.mxu1 %v3821_v60 }
 0x4c9   :  { %2850 = vmatprep.subr.bf16.mxu1 %v3928_v33 }
 0x4ca   :  { %2698 = vmatpush2.bf16.msra.mxu0 %v3820_v38 }
 0x4cb   :  { %2699 = vmatprep.subr.bf16.mxu0 %v3928_v33 }
 0x4cc   :  { %2851 = vmatpush2.bf16.msra.mxu1 %v3823_v28  ;;  %v3828_v28 = vld [vmem:[%s5474_s6 + $0xe0] sm:$0xff]  }
 0x4cd   :  { %2852 = vmatprep.subr.bf16.mxu1 %v3928_v33 }
 0x4ce   :  { %2700 = vmatpush2.bf16.msra.mxu0 %v3822_v14 }
 0x4cf   :  { %2985 = vmatprep.subr.bf16.mxu0 %v3928_v33 }
 0x4d0   :  { %2853 = vmatpush2.bf16.msra.mxu1 %v3825_v50  ;;  %v2514_v50 = vrot.slane %v2488_v2, 4 }
 0x4d1   :  { %3505 = vmatprep.subr.bf16.mxu1 %v3928_v33 }
 0x4d2   :  { %v5387_v0 = vsel %vm742_vm5, %v2510_v59, %v2514_v50 }
 0x505   :  { %v3778_v43 = vpop.permute.xlu0 %3777 }
 0x506   :  { %v3780_v52 = vunpack.i.h.bf16 %v3778_v43  ;;  %v3779_v9 = vunpack.i.l.bf16 %v3778_v43  ;;  %v3829_v43 = vld [vmem:[%s5474_s6 + $0xd8] sm:$0xff]  }
 0x508   :  { %v2473_v49 = vsel %vm508_vm2, %v2410_v4, %v3779_v9  ;;  %v2474_v13 = vsel %vm508_vm2, %v2384_v53, %v3780_v52  ;;  %v2394_v52 = vsel %vm618_vm3, %v2391_v61, %v2393_v55  ;;  %v2396_v9 = vsel %vm618_vm3, %v2393_v55, %v2395_v41  ;;  %v3831_v41 = vld [vmem:[%s5474_s6 + $0xc8] sm:$0xff]  }
 0x509   :  { %v2483_v25 = vpack.c.bf16 %v2474_v13, %v2473_v49  ;;  %v2519_v49 = vsel %vm742_vm5, %v2514_v50, %v2518_v27  ;;  %v3832_v13 = vld [vmem:[%s5474_s6 + $0xc0] sm:$0xff]   ;;  %v3833_v27 = vld [vmem:[%s5474_s6 + $0x118] sm:$0xff]  }
 0x50b   :  { %2702 = vmatmul.mubr.bf16.vlgmr.msra.gmra.mxu0 %v2483_v25  ;;  %v2506_v15 = vrot.slane %v2483_v25, 4 }
 0x50c   :  { %2986 = vmatpush1.bf16.msra.mxu0 %v3824_v54  ;;  %3390 = vmatprep.mubr.msk.bf16.mxu0 %vm508_vm2, %v5225_v44 }
 0x50d   :  { %2987 = vmatprep.subr.bf16.mxu0 %v3928_v33 }
 0x510   :  { %2988 = vmatpush1.bf16.msra.mxu0 %v3826_v20 }
 0x511   :  { %2989 = vmatprep.subr.bf16.mxu0 %v3928_v33 }
 0x512   :  { %v3788_v1 = vpop.permute.xlu1 %3787 }
 0x513   :  { %v3790_v11 = vunpack.i.h.bf16 %v3788_v1  ;;  %v3789_v24 = vunpack.i.l.bf16 %v3788_v1  ;;  %v3830_v1 = vld [vmem:[%s5474_s6 + $0xd0] sm:$0xff]  }
 0x514   :  { %2990 = vmatpush1.bf16.msra.mxu0 %v3827_v6 }
 0x515   :  { %v2475_v40 = vsel %vm508_vm2, %v2386_v48, %v3789_v24  ;;  %v2476_v45 = vsel %vm508_vm2, %v2388_v8, %v3790_v11  ;;  %2991 = vmatprep.subr.bf16.mxu0 %v3928_v33 }
 0x516   :  { %v2485_v42 = vpack.c.bf16 %v2476_v45, %v2475_v40 }
 0x518   :  { %2709 = vmatmul.mubr.bf16.gmra.mxu0 %v2485_v42  ;;  %v2508_v14 = vrot.slane %v2485_v42, 4 }
 0x519   :  { %3391 = vmatprep.mubr.msk.bf16.mxu0 %vm508_vm2, %v2488_v2  ;;  %2992 = vmatpush1.bf16.msra.mxu0 %v3828_v28 }
 0x51a   :  { %v5380_v53 = vsel %vm742_vm5, %v2506_v15, %v2508_v14  ;;  %2993 = vmatprep.subr.bf16.mxu0 %v3928_v33 }
 0x51b   :  { %v3783_v19 = vpop.permute.xlu0 %3782  ;;  %v3793_v51 = vpop.permute.xlu1 %3792 }
 0x51c   :  { %v3785_v32 = vunpack.i.h.bf16 %v3783_v19  ;;  %v3784_v58 = vunpack.i.l.bf16 %v3783_v19  ;;  %v3795_v16 = vunpack.i.h.bf16 %v3793_v51  ;;  %v3794_v29 = vunpack.i.l.bf16 %v3793_v51  ;;  %v3835_v19 = vld [vmem:[%s5474_s6 + $0x108] sm:$0xff]  }
 0x51d   :  { %2994 = vmatpush1.bf16.msra.mxu0 %v3829_v43 }
 0x51e   :  { %v2481_v35 = vsel %vm508_vm2, %v2398_v37, %v3784_v58  ;;  %v2482_v18 = vsel %vm508_vm2, %v2399_v26, %v3785_v32  ;;  %v2477_v60 = vsel %vm508_vm2, %v2390_v47, %v3794_v29  ;;  %v2478_v38 = vsel %vm508_vm2, %v2392_v23, %v3795_v16  ;;  %2995 = vmatprep.subr.bf16.mxu0 %v3928_v33 }
 0x51f   :  { %v5338_v5 = vpack.c.bf16 %v2482_v18, %v2481_v35  ;;  %v3798_v63 = vpop.permute.xlu0 %3797  ;;  %v2487_v10 = vpack.c.bf16 %v2478_v38, %v2477_v60 }
 0x520   :  { %v3800_v4 = vunpack.i.h.bf16 %v3798_v63  ;;  %v3799_v56 = vunpack.i.l.bf16 %v3798_v63 }
 0x521   :  { %v2495_v22 = vrot.slane %v5338_v5, 4  ;;  %2716 = vmatmul.mubr.bf16.gmra.mxu0 %v2487_v10  ;;  %v2512_v44 = vrot.slane %v2487_v10, 4 }
 0x522   :  { %v2479_v59 = vsel %vm508_vm2, %v2394_v52, %v3799_v56  ;;  %v2480_v46 = vsel %vm508_vm2, %v2396_v9, %v3800_v4  ;;  %3392 = vmatprep.mubr.msk.bf16.mxu0 %vm508_vm2, %v5260_v31  ;;  %2996 = vmatpush1.bf16.msra.mxu0 %v3830_v1  ;;  %v3428_v56 = vld [vmem:[%s5475_s7] ss:$0 sm:$0xff] }
 0x523   :  { %v5358_v21 = vsel %vm742_vm5, %v2495_v22, %v2506_v15  ;;  %v2489_v39 = vpack.c.bf16 %v2480_v46, %v2479_v59  ;;  %v2513_v7 = vsel %vm742_vm5, %v2508_v14, %v2512_v44  ;;  %2997 = vmatprep.subr.bf16.mxu0 %v3928_v33 }
 0x524   :  { %2855 = vmatmul.mubr.bf16.vlgmr.msra.gmra.mxu1 %v5358_v21 }
 0x525   :  { %3517 = vmatpush1.bf16.msra.mxu1 %v3824_v54  ;;  %3407 = vmatprep.mubr.msk.bf16.mxu1 %vm508_vm2, %v5245_v34  ;;  %v2516_v31 = vrot.slane %v2489_v39, 4 }
 0x526   :  { %3506 = vmatprep.subr.bf16.mxu1 %v3928_v33  ;;  %2998 = vmatpush1.bf16.msra.mxu0 %v3831_v41 }
 0x527   :  { %2999 = vmatprep.subr.bf16.mxu0 %v3928_v33  ;;  %v2517_v54 = vsel %vm742_vm5, %v2512_v44, %v2516_v31  ;;  %v2520_v37 = vsel %vm742_vm5, %v2516_v31, %v2495_v22 }
 0x529   :  { %3518 = vmatpush1.bf16.msra.mxu1 %v3826_v20  ;;  %2722 = vmatmul.mubr.bf16.gmra.mxu0 %v2489_v39 }
 0x52a   :  { %3507 = vmatprep.subr.bf16.mxu1 %v3928_v33  ;;  %3393 = vmatprep.mubr.msk.bf16.mxu0 %vm508_vm2, %v5209_v12  ;;  %v3834_v12 = vld [vmem:[%s5474_s6 + $0x110] sm:$0xff]  }
 0x52b   :  { %3000 = vmatpush1.bf16.msra.mxu0 %v3832_v13 }
 0x52c   :  { %2862 = vmatmul.mubr.bf16.gmra.mxu1 %v5380_v53  ;;  %3009 = vmatprep.subr.bf16.mxu0 %v3928_v33 }
 0x52d   :  { %3519 = vmatpush1.bf16.msra.mxu1 %v3827_v6  ;;  %3408 = vmatprep.mubr.msk.bf16.mxu1 %vm508_vm2, %v5387_v0 }
 0x52e   :  { %3508 = vmatprep.subr.bf16.mxu1 %v3928_v33 }
 0x52f   :  { %3010 = vmatpush2.bf16.msra.mxu0 %v3833_v27 }
 0x530   :  { %3011 = vmatprep.subr.bf16.mxu0 %v3928_v33 }
 0x531   :  { %3520 = vmatpush1.bf16.msra.mxu1 %v3828_v28  ;;  %2729 = vmatmul.mubr.bf16.gmra.mxu0 %v5338_v5 }
 0x532   :  { %3509 = vmatprep.subr.bf16.mxu1 %v3928_v33  ;;  %3423 = vmatprep.mubr.msk.bf16.mxu0 %vm508_vm2, %v5245_v34  ;;  %v3836_v34 = vld [vmem:[%s5474_s6 + $0x100] sm:$0xff]  }
 0x533   :  { %3012 = vmatpush2.bf16.msra.mxu0 %v3834_v12 }
 0x534   :  { %2869 = vmatmul.mubr.bf16.gmra.mxu1 %v2513_v7  ;;  %3013 = vmatprep.subr.bf16.mxu0 %v3928_v33 }
 0x535   :  { %3521 = vmatpush1.bf16.msra.mxu1 %v3829_v43  ;;  %3409 = vmatprep.mubr.msk.bf16.mxu1 %vm508_vm2, %v2519_v49 }
 0x536   :  { %3510 = vmatprep.subr.bf16.mxu1 %v3928_v33 }
 0x537   :  { %3014 = vmatpush2.bf16.msra.mxu0 %v3835_v19 }
 0x538   :  { %3015 = vmatprep.subr.bf16.mxu0 %v3928_v33 }
 0x539   :  { %3522 = vmatpush1.bf16.msra.mxu1 %v3830_v1 }
 0x53a   :  { %3511 = vmatprep.subr.bf16.mxu1 %v3928_v33 }
 0x53b   :  { %3016 = vmatpush2.bf16.msra.mxu0 %v3836_v34 }
 0x53c   :  { %2875 = vmatmul.mubr.bf16.gmra.mxu1 %v2517_v54 }
 0x53d   :  { %3523 = vmatpush1.bf16.msra.mxu1 %v3831_v41  ;;  %3410 = vmatprep.mubr.msk.bf16.mxu1 %vm508_vm2, %v5274_v62 }
 0x53e   :  { %3512 = vmatprep.subr.bf16.mxu1 %v3928_v33  ;;  %3018 = vmatmul.mubr.bf16.vlgmr.msra.gmra.mxu0 %v5380_v53 }
 0x53f   :  { %3424 = vmatprep.mubr.msk.bf16.mxu0 %vm508_vm2, %v5387_v0 }
 0x541   :  { %3524 = vmatpush1.bf16.msra.mxu1 %v3832_v13 }
 0x542   :  { %3513 = vmatprep.subr.bf16.mxu1 %v3928_v33 }
 0x544   :  { %2882 = vmatmul.mubr.bf16.gmra.mxu1 %v2520_v37 }
 0x545   :  { %3525 = vmatpush2.bf16.msra.mxu1 %v3833_v27  ;;  %3426 = vmatprep.mubr.msk.bf16.mxu1 %vm508_vm2, %v5274_v62 }
 0x546   :  { %3514 = vmatprep.subr.bf16.mxu1 %v3928_v33  ;;  %3025 = vmatmul.mubr.bf16.gmra.mxu0 %v2513_v7 }
 0x547   :  { %3425 = vmatprep.mubr.msk.bf16.mxu0 %vm508_vm2, %v2519_v49 }
 0x549   :  { %3526 = vmatpush2.bf16.msra.mxu1 %v3834_v12 }
 0x54a   :  { %3515 = vmatprep.subr.bf16.mxu1 %v3928_v33 }
 0x54d   :  { %3527 = vmatpush2.bf16.msra.mxu1 %v3835_v19 }
 0x54e   :  { %3516 = vmatprep.subr.bf16.mxu1 %v3928_v33  ;;  %3032 = vmatmul.mubr.bf16.gmra.mxu0 %v2517_v54 }
 0x551   :  { %3528 = vmatpush2.bf16.msra.mxu1 %v3836_v34 }
 0x554   :  { %3038 = vmatmul.mubr.bf16.vlgmr.msra.gmra.mxu1 %v2520_v37 }
 0x555   :  { %3427 = vmatprep.mubr.msk.bf16.mxu1 %vm508_vm2, %v5228_v57 }
 0x55c   :  { %3045 = vmatmul.mubr.bf16.gmra.mxu1 %v5358_v21 }
 0x5cb   :  { %v2703_v62 = vpop.f32.mrf.mxu0 }
 0x5cd   :  { %v2704_v26 = vpop.f32.mrf.mxu0 }
 0x5cf   :  { %v2705_v25 = vpop.f32.mrf.mxu0 }
 0x5d1   :  { %v2707_v11 = vpop.f32.mrf.mxu0 }
 0x5d8   :  { %v2710_v33 = vpop.f32.mrf.mxu0 }
 0x5da   :  { %v2711_v58 = vpop.f32.mrf.mxu0 }
 0x5dc   :  { %v2712_v8 = vpop.f32.mrf.mxu0 }
 0x5de   :  { %v2714_v35 = vpop.f32.mrf.mxu0 }
 0x5e1   :  { %v2717_v20 = vpop.f32.mrf.mxu0 }
 0x5e3   :  { %v2718_v5 = vpop.f32.mrf.mxu0 }
 0x5e4   :  { %v2856_v24 = vpop.f32.mrf.mxu1 }
 0x5e5   :  { %v2719_v36 = vpop.f32.mrf.mxu0 }
 0x5e6   :  { %v2857_v32 = vpop.f32.mrf.mxu1 }
 0x5e7   :  { %v2720_v45 = vpop.f32.mrf.mxu0 }
 0x5e8   :  { %v2858_v48 = vpop.f32.mrf.mxu1 }
 0x5e9   :  { %v2723_v22 = vpop.f32.mrf.mxu0  ;;  %v2859_v53 = vadd.f32 %v2858_v48, %v2705_v25 }
 0x5ea   :  { %v2860_v30 = vpop.f32.mrf.mxu1 }
 0x5eb   :  { %v2725_v17 = vpop.f32.mrf.mxu0 }
 0x5ec   :  { %v2863_v18 = vpop.f32.mrf.mxu1 }
 0x5ed   :  { %v2726_v6 = vpop.f32.mrf.mxu0 }
 0x5ee   :  { %v2864_v57 = vpop.f32.mrf.mxu1 }
 0x5ef   :  { %v2727_v29 = vpop.f32.mrf.mxu0 }
 0x5f0   :  { %v2865_v51 = vpop.f32.mrf.mxu1 }
 0x5f1   :  { %v2730_v42 = vpop.f32.mrf.mxu0  ;;  %v2866_v13 = vadd.f32 %v2865_v51, %v2712_v8 }
 0x5f2   :  { %v2867_v40 = vpop.f32.mrf.mxu1 }
 0x5f3   :  { %v2732_v23 = vpop.f32.mrf.mxu0 }
 0x5f4   :  { %v2870_v61 = vpop.f32.mrf.mxu1 }
 0x5f5   :  { %v2733_v60 = vpop.f32.mrf.mxu0 }
 0x5f6   :  { %v2871_v15 = vpop.f32.mrf.mxu1 }
 0x5f7   :  { %v2734_v28 = vpop.f32.mrf.mxu0 }
 0x5f8   :  { %v2872_v3 = vpop.f32.mrf.mxu1 }
 0x5fa   :  { %v2873_v16 = vpop.f32.mrf.mxu1 }
 0x5fc   :  { %v2876_v21 = vpop.f32.mrf.mxu1 }
 0x5fd   :  { %v2877_v52 = vadd.f32 %v2876_v21, %v2723_v22 }
 0x5fe   :  { %v2878_v47 = vpop.f32.mrf.mxu1  ;;  %v3019_v10 = vpop.f32.mrf.mxu0 }
 0x600   :  { %v2879_v2 = vpop.f32.mrf.mxu1  ;;  %v3020_v43 = vpop.f32.mrf.mxu0 }
 0x602   :  { %v2880_v38 = vpop.f32.mrf.mxu1  ;;  %v3021_v4 = vpop.f32.mrf.mxu0 }
 0x603   :  { %v3052_v0 = vadd.f32 %v3021_v4, %v2859_v53 }
 0x604   :  { %v2883_v14 = vpop.f32.mrf.mxu1  ;;  %v3023_v9 = vpop.f32.mrf.mxu0 }
 0x605   :  { %v3063_v1 = vadd.f32 %v3428_v56, %v3052_v0  ;;  %v2884_v34 = vadd.f32 %v2883_v14, %v2730_v42 }
 0x606   :  { %v2885_v50 = vpop.f32.mrf.mxu1  ;;  %v3026_v46 = vpop.f32.mrf.mxu0 }
 0x607   :  { %v3067_v41 = vmax.f32 %v3063_v1, 0.0 }
 0x608   :  { %v2886_v63 = vpop.f32.mrf.mxu1  ;;  %v3027_v49 = vpop.f32.mrf.mxu0 }
 0x609   :  { %v3072_v12 = vrot.slane %v3067_v41, 2 }
 0x60a   :  { %v2887_v55 = vpop.f32.mrf.mxu1  ;;  %v3028_v54 = vpop.f32.mrf.mxu0 }
 0x60b   :  { %v3053_v19 = vadd.f32 %v3028_v54, %v2866_v13  ;;  %v3074_v32 = vmax.f32 %v3067_v41, %v3072_v12 }
 0x60c   :  { %v3030_v62 = vpop.f32.mrf.mxu0 }
 0x60d   :  { %v3064_v26 = vadd.f32 %v3428_v56, %v3053_v19 }
 0x60e   :  { %v3033_v33 = vpop.f32.mrf.mxu0 }
 0x60f   :  { %v3068_v58 = vmax.f32 %v3064_v26, 0.0 }
 0x610   :  { %v3034_v35 = vpop.f32.mrf.mxu0 }
 0x611   :  { %v3075_v18 = vmax.f32 %v3074_v32, %v3068_v58  ;;  %v3077_v8 = vrot.slane %v3068_v58, 2 }
 0x612   :  { %v3035_v51 = vpop.f32.mrf.mxu0 }
 0x613   :  { %v3079_v36 = vmax.f32 %v3075_v18, %v3077_v8 }
 0x614   :  { %v3039_v44 = vpop.f32.mrf.mxu1  ;;  %v3036_v22 = vpop.f32.mrf.mxu0 }
 0x615   :  { %v3054_v59 = vadd.f32 %v3039_v44, %v2877_v52  ;;  %3089 = vst [vmem:[%s5476_s9 - $0x1] sm:$0x2] %v3079_v36 }
 0x616   :  { %v3041_v39 = vpop.f32.mrf.mxu1 }
 0x617   :  { %v3065_v7 = vadd.f32 %v3428_v56, %v3054_v59 }
 0x618   :  { %v3042_v31 = vpop.f32.mrf.mxu1 }
 0x619   :  { %v3069_v27 = vmax.f32 %v3065_v7, 0.0 }
 0x61a   :  { %v3043_v37 = vpop.f32.mrf.mxu1 }
 0x61b   :  { %v3081_v11 = vrot.slane %v3069_v27, 2 }
 0x61c   :  { %v3046_v25 = vpop.f32.mrf.mxu1 }
 0x61d   :  { %v3055_v24 = vadd.f32 %v3046_v25, %v2884_v34  ;;  %v3083_v57 = vmax.f32 %v3069_v27, %v3081_v11 }
 0x61e   :  { %v3048_v48 = vpop.f32.mrf.mxu1 }
 0x61f   :  { %v3066_v30 = vadd.f32 %v3428_v56, %v3055_v24 }
 0x620   :  { %v3049_v20 = vpop.f32.mrf.mxu1 }
 0x621   :  { %v3070_v5 = vmax.f32 %v3066_v30, 0.0 }
 0x622   :  { %v3050_v40 = vpop.f32.mrf.mxu1 }
 0x623   :  { %v3084_v45 = vmax.f32 %v3083_v57, %v3070_v5  ;;  %v3086_v61 = vrot.slane %v3070_v5, 2 }
 0x625   :  { %v3088_v15 = vmax.f32 %v3084_v45, %v3086_v61 }
 0x627   :  { %3090 = vst [vmem:[%s5476_s9] sm:$0x2] %v3088_v15 }

</bundles_post_ra>
